<compile_context>
chip_gen: v7x
topology: tpu7x:2x2x1
jax: 0.10.0
libtpu: 0.0.40
codegen_flags: <defaults>
</compile_context>

<pallas_src>
import jax
import jax.numpy as jnp
from jax.experimental import pallas as pl
from jax.experimental.pallas import tpu as pltpu

SLOPE = 0.1  # nn.LeakyReLU(0.1) in the reference module


# ----------------------------------------------------------------------------
# Pallas kernels
# ----------------------------------------------------------------------------
def _conv_matmul_kernel(p_ref, w_ref, b_ref, o_ref):
    """One M-tile of a conv lowered to im2col matmul: o = lrelu(p @ w + b)."""
    y = jnp.dot(p_ref[...], w_ref[...], preferred_element_type=jnp.float32)
    y = y + b_ref[...]
    y = jnp.where(y >= 0.0, y, SLOPE * y)
    o_ref[...] = y.astype(o_ref.dtype)


def _conv_attn_kernel(p_ref, w_ref, b_ref, wq_ref, wk_ref, wv_ref,
                      bq_ref, bk_ref, bv_ref, gamma_ref,
                      out_ref, attn_ref):
    """Fused conv(matmul)+LeakyReLU + SAGAN self-attention, one batch element."""
    # conv as matmul over im2col patches: (N, K) @ (K, C) -> (N, C)
    x = jnp.dot(p_ref[0], w_ref[...], preferred_element_type=jnp.float32)
    x = x + b_ref[...]
    x = jnp.where(x >= 0.0, x, SLOPE * x)                       # (N, C) f32
    xb = x.astype(jnp.bfloat16)

    q = jnp.dot(xb, wq_ref[...], preferred_element_type=jnp.float32) + bq_ref[...]
    k = jnp.dot(xb, wk_ref[...], preferred_element_type=jnp.float32) + bk_ref[...]
    v = jnp.dot(xb, wv_ref[...], preferred_element_type=jnp.float32) + bv_ref[...]

    energy = jnp.dot(q, k.T, preferred_element_type=jnp.float32)  # (N, N)
    energy = energy - jnp.max(energy, axis=-1, keepdims=True)
    p = jnp.exp(energy)
    attn = p * pl.reciprocal(jnp.sum(p, axis=-1, keepdims=True), approx=True)

    o = jnp.dot(attn, v, preferred_element_type=jnp.float32)      # (N, C)
    g = gamma_ref[0, 0]
    out_ref[0] = (g * o + x).astype(out_ref.dtype)
    attn_ref[0] = attn


def _conv_attn_head_kernel(p_ref, w_ref, b_ref, wq_ref, wk_ref, wv_ref,
                           bq_ref, bk_ref, bv_ref, gamma_ref, w5_ref, b5_ref,
                           logit_ref, attn_ref):
    """Fused conv4 + self-attention2 + conv5 head, one batch element."""
    x = jnp.dot(p_ref[0], w_ref[...], preferred_element_type=jnp.float32)
    x = x + b_ref[...]
    x = jnp.where(x >= 0.0, x, SLOPE * x)                       # (16, C) f32
    xb = x.astype(jnp.bfloat16)

    q = jnp.dot(xb, wq_ref[...], preferred_element_type=jnp.float32) + bq_ref[...]
    k = jnp.dot(xb, wk_ref[...], preferred_element_type=jnp.float32) + bk_ref[...]
    v = jnp.dot(xb, wv_ref[...], preferred_element_type=jnp.float32) + bv_ref[...]

    energy = jnp.dot(q, k.T, preferred_element_type=jnp.float32)  # (16, 16)
    energy = energy - jnp.max(energy, axis=-1, keepdims=True)
    p = jnp.exp(energy)
    attn = p * pl.reciprocal(jnp.sum(p, axis=-1, keepdims=True), approx=True)

    o = jnp.dot(attn, v, preferred_element_type=jnp.float32)
    g = gamma_ref[0, 0]
    y = g * o + x                                                 # (16, C) f32

    # conv5: 4x4 VALID conv on the 4x4 map == full (h, w, c) contraction.
    t = jnp.sum(y * w5_ref[...], axis=1, keepdims=True)           # (16, 1)
    logit_ref[0] = jnp.sum(t, axis=0, keepdims=True) + b5_ref[...]
    attn_ref[0] = attn


# ----------------------------------------------------------------------------
# Plain-JAX glue: NHWC im2col, weight repacking, spectral norm, param init
# ----------------------------------------------------------------------------
def _im2col_nhwc(x, kh, kw, stride, pad):
    """x: (B, H, W, C) -> patches (B, Ho*Wo, kh*kw*C), K ordered (kh, kw, C)."""
    b, h, w, c = x.shape
    xp = jnp.pad(x, ((0, 0), (pad, pad), (pad, pad), (0, 0)))
    ho = (h + 2 * pad - kh) // stride + 1
    wo = (w + 2 * pad - kw) // stride + 1
    cols = []
    for i in range(kh):
        for j in range(kw):
            cols.append(xp[:, i:i + stride * ho:stride, j:j + stride * wo:stride, :])
    pat = jnp.stack(cols, axis=3)                      # (B, Ho, Wo, kh*kw, C)
    pat = pat.reshape(b, ho * wo, kh * kw * c)
    return pat.astype(jnp.bfloat16), ho, wo


def _prep_conv_weight(w):
    """PyTorch (Cout, Cin, kh, kw) -> (kh*kw*Cin, Cout) bf16 (matches im2col K)."""
    cout, cin, kh, kw = w.shape
    wt = jnp.transpose(w, (2, 3, 1, 0)).reshape(kh * kw * cin, cout)
    return wt.astype(jnp.bfloat16)


def _spectral_normalize(w, key, n_iter=1, eps=1e-12):
    """W / sigma, sigma from power iteration on W reshaped to (Cout, -1)."""
    w_mat = w.reshape(w.shape[0], -1)
    u = jax.random.normal(key, (w.shape[0],), jnp.float32)
    u = u / (jnp.linalg.norm(u) + eps)
    v = u
    for _ in range(n_iter):
        v = w_mat.T @ u
        v = v / (jnp.linalg.norm(v) + eps)
        u = w_mat @ v
        u = u / (jnp.linalg.norm(u) + eps)
    sigma = u @ (w_mat @ v)
    return w / sigma


def _conv_init(key, cout, cin, kh, kw):
    fan_in = cin * kh * kw
    bound = 1.0 / jnp.sqrt(jnp.float32(fan_in))
    kw_key, kb_key = jax.random.split(key)
    w = jax.random.uniform(kw_key, (cout, cin, kh, kw), jnp.float32, -bound, bound)
    b = jax.random.uniform(kb_key, (cout,), jnp.float32, -bound, bound)
    return w, b


def init_params(key, image_size=8):
    """`image_size` is the base channel count (as in the PyTorch module)."""
    ks = jax.random.split(key, 16)
    p = {}
    w1, b1 = _conv_init(ks[0], image_size, 1, 4, 4)
    w2, b2 = _conv_init(ks[1], image_size * 2, image_size, 4, 4)
    w3, b3 = _conv_init(ks[2], image_size * 4, image_size * 2, 4, 4)
    w4, b4 = _conv_init(ks[3], image_size * 8, image_size * 4, 4, 4)
    w5, b5 = _conv_init(ks[4], 1, image_size * 8, 4, 4)
    p["w1"], p["b1"] = _spectral_normalize(w1, ks[5]), b1
    p["w2"], p["b2"] = _spectral_normalize(w2, ks[6]), b2
    p["w3"], p["b3"] = _spectral_normalize(w3, ks[7]), b3
    p["w4"], p["b4"] = _spectral_normalize(w4, ks[8]), b4
    p["w5"], p["b5"] = w5, b5

    def attn_init(key, c):
        kq, kk, kv = jax.random.split(key, 3)
        wq, bq = _conv_init(kq, c // 8, c, 1, 1)
        wk, bk = _conv_init(kk, c // 8, c, 1, 1)
        wv, bv = _conv_init(kv, c, c, 1, 1)
        gamma = jnp.zeros((1, 1), jnp.float32)   # nn.Parameter(torch.zeros(1))
        return (wq, bq, wk, bk, wv, bv, gamma)

    p["attn1"] = attn_init(ks[9], image_size * 4)
    p["attn2"] = attn_init(ks[10], image_size * 8)
    return p


def _pick_tm(m, limit=1024):
    """Largest power-of-two tile <= limit that divides m (multiple of 8)."""
    for tm in (1024, 512, 256, 128, 64, 32, 16, 8):
        if tm <= limit and m % tm == 0:
            return tm
    return m   # fall back to a single full-extent block


# ----------------------------------------------------------------------------
# Pallas-backed ops
# ----------------------------------------------------------------------------
def conv2d_lrelu_pallas(x_nhwc, w, b, stride, pad):
    """Conv2d (PyTorch cross-correlation) + LeakyReLU(0.1); NHWC in / out (bf16)."""
    bsz = x_nhwc.shape[0]
    cout = w.shape[0]
    pat, ho, wo = _im2col_nhwc(x_nhwc, w.shape[2], w.shape[3], stride, pad)
    m = bsz * ho * wo
    k = pat.shape[-1]
    pat = pat.reshape(m, k)
    tm = _pick_tm(m)
    wt = _prep_conv_weight(w)
    bias = b.reshape(1, cout).astype(jnp.float32)

    out = pl.pallas_call(
        _conv_matmul_kernel,
        grid=(m // tm,),
        out_shape=jax.ShapeDtypeStruct((m, cout), jnp.bfloat16),
        in_specs=[
            pl.BlockSpec((tm, k), lambda i: (i, 0)),
            pl.BlockSpec((k, cout), lambda i: (0, 0)),
            pl.BlockSpec((1, cout), lambda i: (0, 0)),
        ],
        out_specs=pl.BlockSpec((tm, cout), lambda i: (i, 0)),
        compiler_params=pltpu.CompilerParams(
            dimension_semantics=("parallel",)),
    )(pat, wt, bias)
    return out.reshape(bsz, ho, wo, cout)


def conv_attention_pallas(x_nhwc, w, b, attn_params):
    """Fused conv3 + self-attention1. Returns (NHWC features bf16, attn (B,N,N))."""
    wq, bq, wk, bk, wv, bv, gamma = attn_params
    bsz = x_nhwc.shape[0]
    cout = w.shape[0]
    cq = wq.shape[0]
    pat, ho, wo = _im2col_nhwc(x_nhwc, w.shape[2], w.shape[3], 2, 1)   # (B, N, K)
    n = ho * wo
    k = pat.shape[-1]
    wt = _prep_conv_weight(w)
    bias = b.reshape(1, cout).astype(jnp.float32)
    wq_m = wq.reshape(cq, cout).T.astype(jnp.bfloat16)                  # (C, Cq)
    wk_m = wk.reshape(cq, cout).T.astype(jnp.bfloat16)
    wv_m = wv.reshape(cout, cout).T.astype(jnp.bfloat16)                # (C, C)

    out, attn = pl.pallas_call(
        _conv_attn_kernel,
        grid=(bsz,),
        out_shape=(
            jax.ShapeDtypeStruct((bsz, n, cout), jnp.bfloat16),
            jax.ShapeDtypeStruct((bsz, n, n), jnp.float32),
        ),
        in_specs=[
            pl.BlockSpec((1, n, k), lambda i: (i, 0, 0)),
            pl.BlockSpec((k, cout), lambda i: (0, 0)),
            pl.BlockSpec((1, cout), lambda i: (0, 0)),
            pl.BlockSpec((cout, cq), lambda i: (0, 0)),
            pl.BlockSpec((cout, cq), lambda i: (0, 0)),
            pl.BlockSpec((cout, cout), lambda i: (0, 0)),
            pl.BlockSpec((1, cq), lambda i: (0, 0)),
            pl.BlockSpec((1, cq), lambda i: (0, 0)),
            pl.BlockSpec((1, cout), lambda i: (0, 0)),
            pl.BlockSpec(memory_space=pltpu.MemorySpace.SMEM),
        ],
        out_specs=(
            pl.BlockSpec((1, n, cout), lambda i: (i, 0, 0)),
            pl.BlockSpec((1, n, n), lambda i: (i, 0, 0)),
        ),
        compiler_params=pltpu.CompilerParams(
            dimension_semantics=("parallel",)),
    )(pat, wt, bias, wq_m, wk_m, wv_m,
      bq.reshape(1, cq).astype(jnp.float32),
      bk.reshape(1, cq).astype(jnp.float32),
      bv.reshape(1, cout).astype(jnp.float32),
      gamma.astype(jnp.float32))
    return out.reshape(bsz, ho, wo, cout), attn


def conv_attention_head_pallas(x_nhwc, w4, b4, attn_params, w5, b5):
    """Fused conv4 + self-attention2 + conv5. Returns ((B,1,1,1) logit, attn)."""
    wq, bq, wk, bk, wv, bv, gamma = attn_params
    bsz = x_nhwc.shape[0]
    cout = w4.shape[0]
    cq = wq.shape[0]
    pat, ho, wo = _im2col_nhwc(x_nhwc, w4.shape[2], w4.shape[3], 2, 1)  # (B, 16, K)
    n = ho * wo
    k = pat.shape[-1]
    wt = _prep_conv_weight(w4)
    bias = b4.reshape(1, cout).astype(jnp.float32)
    wq_m = wq.reshape(cq, cout).T.astype(jnp.bfloat16)
    wk_m = wk.reshape(cq, cout).T.astype(jnp.bfloat16)
    wv_m = wv.reshape(cout, cout).T.astype(jnp.bfloat16)
    # conv5 weight (1, C, 4, 4) -> (h*w, C) matching the (N, C) feature layout.
    w5_mat = jnp.transpose(w5[0], (1, 2, 0)).reshape(n, cout).astype(jnp.float32)
    b5_m = b5.reshape(1, 1).astype(jnp.float32)

    logit, attn = pl.pallas_call(
        _conv_attn_head_kernel,
        grid=(bsz,),
        out_shape=(
            jax.ShapeDtypeStruct((bsz, 1, 1), jnp.float32),
            jax.ShapeDtypeStruct((bsz, n, n), jnp.float32),
        ),
        in_specs=[
            pl.BlockSpec((1, n, k), lambda i: (i, 0, 0)),
            pl.BlockSpec((k, cout), lambda i: (0, 0)),
            pl.BlockSpec((1, cout), lambda i: (0, 0)),
            pl.BlockSpec((cout, cq), lambda i: (0, 0)),
            pl.BlockSpec((cout, cq), lambda i: (0, 0)),
            pl.BlockSpec((cout, cout), lambda i: (0, 0)),
            pl.BlockSpec((1, cq), lambda i: (0, 0)),
            pl.BlockSpec((1, cq), lambda i: (0, 0)),
            pl.BlockSpec((1, cout), lambda i: (0, 0)),
            pl.BlockSpec(memory_space=pltpu.MemorySpace.SMEM),
            pl.BlockSpec((n, cout), lambda i: (0, 0)),
            pl.BlockSpec((1, 1), lambda i: (0, 0)),
        ],
        out_specs=(
            pl.BlockSpec((1, 1, 1), lambda i: (i, 0, 0)),
            pl.BlockSpec((1, n, n), lambda i: (i, 0, 0)),
        ),
        compiler_params=pltpu.CompilerParams(
            dimension_semantics=("parallel",)),
    )(pat, wt, bias, wq_m, wk_m, wv_m,
      bq.reshape(1, cq).astype(jnp.float32),
      bk.reshape(1, cq).astype(jnp.float32),
      bv.reshape(1, cout).astype(jnp.float32),
      gamma.astype(jnp.float32),
      w5_mat, b5_m)
    return logit.reshape(bsz, 1, 1, 1), attn


def discriminator_forward(params, x):
    # x: (B, 1, H, W) NCHW at the model boundary (PyTorch layout).
    x_nhwc = jnp.transpose(x, (0, 2, 3, 1))   # C == 1 -> effectively a reshape
    h1 = conv2d_lrelu_pallas(x_nhwc, params["w1"], params["b1"], 2, 1)  # (B,32,32, 8)
    h2 = conv2d_lrelu_pallas(h1, params["w2"], params["b2"], 2, 1)      # (B,16,16,16)
    h3, at_map1 = conv_attention_pallas(h2, params["w3"], params["b3"],
                                        params["attn1"])                # (B, 8, 8,32)
    out, at_map2 = conv_attention_head_pallas(h3, params["w4"], params["b4"],
                                              params["attn2"],
                                              params["w5"], params["b5"])
    return out, at_map1, at_map2


# ----------------------------------------------------------------------------
if __name__ == "__main__":
    key = jax.random.PRNGKey(0)
    k_param, k_input = jax.random.split(key)

    IMAGE_SIZE = 8          # base channel count (kept small; torch default is 64)
    B, H, W = 2, 64, 64     # spatial must be 64 so the final 4x4 valid conv fits

    params = init_params(k_param, image_size=IMAGE_SIZE)
    x = jax.random.normal(k_input, (B, 1, H, W), jnp.float32)

    fwd = jax.jit(discriminator_forward)
    out, at1, at2 = fwd(params, x)
    jax.block_until_ready((out, at1, at2))

    assert out.shape == (B, 1, 1, 1), out.shape
    assert at1.shape == (B, 64, 64), at1.shape    # attention over 8x8=64 positions
    assert at2.shape == (B, 16, 16), at2.shape    # attention over 4x4=16 positions
    assert bool(jnp.all(jnp.isfinite(out)))

    print("KERNEL_OK")
</pallas_src>

<mosaic_0001>
module attributes {stable_mosaic.version = 11 : i64} {
  func.func @_conv_matmul_kernel(%arg0: i32, %arg1: memref<1024x16xbf16, #tpu.memory_space<vmem>>, %arg2: memref<16x8xbf16, #tpu.memory_space<vmem>>, %arg3: memref<1x8xf32, #tpu.memory_space<vmem>>, %arg4: memref<1024x8xbf16, #tpu.memory_space<vmem>>) attributes {dimension_semantics = [#tpu.dimension_semantics<parallel>], iteration_bounds = array<i64: 2>, scalar_prefetch = 0 : i64, scratch_operands = 0 : i64, tpu.core_type = #tpu.core_type<tc>, window_params = [{transform_indices = @transform_0, window_bounds = array<i64: 1024, 16>}, {pipeline_mode = #tpu.pipeline_mode<synchronous>, transform_indices = @transform_1, window_bounds = array<i64: 16, 8>}, {pipeline_mode = #tpu.pipeline_mode<synchronous>, transform_indices = @transform_2, window_bounds = array<i64: 1, 8>}, {transform_indices = @transform_3, window_bounds = array<i64: 1024, 8>}]} {
    %c0 = arith.constant 0 : index
    %c0_0 = arith.constant 0 : index
    %0 = vector.load %arg1[%c0, %c0_0] : memref<1024x16xbf16, #tpu.memory_space<vmem>>, vector<1024x16xbf16>
    %c0_1 = arith.constant 0 : index
    %c0_2 = arith.constant 0 : index
    %1 = vector.load %arg2[%c0_1, %c0_2] : memref<16x8xbf16, #tpu.memory_space<vmem>>, vector<16x8xbf16>
    %cst = arith.constant dense<0.000000e+00> : vector<1024x8xf32>
    %2 = tpu.matmul %0, %1, %cst {dimension_numbers = #tpu.dot_dimension_numbers<[1], [0], [0], [1], [0, 0, 1, 1], [], []>} : vector<1024x16xbf16>, vector<16x8xbf16>, vector<1024x8xf32> -> vector<1024x8xf32>
    %c0_3 = arith.constant 0 : index
    %c0_4 = arith.constant 0 : index
    %3 = vector.load %arg3[%c0_3, %c0_4] : memref<1x8xf32, #tpu.memory_space<vmem>>, vector<1x8xf32>
    %4 = vector.broadcast %3 : vector<1x8xf32> to vector<1024x8xf32>
    %5 = arith.addf %2, %4 : vector<1024x8xf32>
    %cst_5 = arith.constant 0.000000e+00 : f32
    %6 = vector.broadcast %cst_5 : f32 to vector<1024x8xf32>
    %7 = arith.cmpf oge, %5, %6 : vector<1024x8xf32>
    %cst_6 = arith.constant 1.000000e-01 : f32
    %8 = vector.broadcast %cst_6 : f32 to vector<1024x8xf32>
    %9 = arith.mulf %8, %5 : vector<1024x8xf32>
    %10 = arith.select %7, %5, %9 : vector<1024x8xi1>, vector<1024x8xf32>
    %11 = arith.truncf %10 : vector<1024x8xf32> to vector<1024x8xbf16>
    %c0_7 = arith.constant 0 : index
    %c0_8 = arith.constant 0 : index
    %12 = vector.load %arg4[%c0_7, %c0_8] : memref<1024x8xbf16, #tpu.memory_space<vmem>>, vector<1024x8xbf16>
    tpu.vector_store %arg4[%c0_7, %c0_8], %11 {strides = array<i32>} : memref<1024x8xbf16, #tpu.memory_space<vmem>>, vector<1024x8xbf16>,
    return
  }
  func.func @transform_0(%arg0: i32) -> (i32, i32) {
    %c0_i32 = arith.constant 0 : i32
    %c0_i32_0 = arith.constant 0 : i32
    return %arg0, %c0_i32 : i32, i32
  }
  func.func @transform_1(%arg0: i32) -> (i32, i32) {
    %c0_i32 = arith.constant 0 : i32
    %c0_i32_0 = arith.constant 0 : i32
    %c0_i32_1 = arith.constant 0 : i32
    return %c0_i32, %c0_i32_0 : i32, i32
  }
  func.func @transform_2(%arg0: i32) -> (i32, i32) {
    %c0_i32 = arith.constant 0 : i32
    %c0_i32_0 = arith.constant 0 : i32
    %c0_i32_1 = arith.constant 0 : i32
    return %c0_i32, %c0_i32_0 : i32, i32
  }
  func.func @transform_3(%arg0: i32) -> (i32, i32) {
    %c0_i32 = arith.constant 0 : i32
    %c0_i32_0 = arith.constant 0 : i32
    return %arg0, %c0_i32 : i32, i32
  }
}

module attributes {stable_mosaic.version = 11 : i64} {
  func.func @_conv_matmul_kernel(%arg0: i32, %arg1: memref<512x128xbf16, #tpu.memory_space<vmem>>, %arg2: memref<128x16xbf16, #tpu.memory_space<vmem>>, %arg3: memref<1x16xf32, #tpu.memory_space<vmem>>, %arg4: memref<512x16xbf16, #tpu.memory_space<vmem>>) attributes {dimension_semantics = [#tpu.dimension_semantics<parallel>], iteration_bounds = array<i64: 1>, scalar_prefetch = 0 : i64, scratch_operands = 0 : i64, tpu.core_type = #tpu.core_type<tc>, window_params = [{transform_indices = @transform_0, window_bounds = array<i64: 512, 128>}, {pipeline_mode = #tpu.pipeline_mode<synchronous>, transform_indices = @transform_1, window_bounds = array<i64: 128, 16>}, {pipeline_mode = #tpu.pipeline_mode<synchronous>, transform_indices = @transform_2, window_bounds = array<i64: 1, 16>}, {transform_indices = @transform_3, window_bounds = array<i64: 512, 16>}]} {
    %c0 = arith.constant 0 : index
    %c0_0 = arith.constant 0 : index
    %0 = vector.load %arg1[%c0, %c0_0] : memref<512x128xbf16, #tpu.memory_space<vmem>>, vector<512x128xbf16>
    %c0_1 = arith.constant 0 : index
    %c0_2 = arith.constant 0 : index
    %1 = vector.load %arg2[%c0_1, %c0_2] : memref<128x16xbf16, #tpu.memory_space<vmem>>, vector<128x16xbf16>
    %cst = arith.constant dense<0.000000e+00> : vector<512x16xf32>
    %2 = tpu.matmul %0, %1, %cst {dimension_numbers = #tpu.dot_dimension_numbers<[1], [0], [0], [1], [0, 0, 1, 1], [], []>} : vector<512x128xbf16>, vector<128x16xbf16>, vector<512x16xf32> -> vector<512x16xf32>
    %c0_3 = arith.constant 0 : index
    %c0_4 = arith.constant 0 : index
    %3 = vector.load %arg3[%c0_3, %c0_4] : memref<1x16xf32, #tpu.memory_space<vmem>>, vector<1x16xf32>
    %4 = vector.broadcast %3 : vector<1x16xf32> to vector<512x16xf32>
    %5 = arith.addf %2, %4 : vector<512x16xf32>
    %cst_5 = arith.constant 0.000000e+00 : f32
    %6 = vector.broadcast %cst_5 : f32 to vector<512x16xf32>
    %7 = arith.cmpf oge, %5, %6 : vector<512x16xf32>
    %cst_6 = arith.constant 1.000000e-01 : f32
    %8 = vector.broadcast %cst_6 : f32 to vector<512x16xf32>
    %9 = arith.mulf %8, %5 : vector<512x16xf32>
    %10 = arith.select %7, %5, %9 : vector<512x16xi1>, vector<512x16xf32>
    %11 = arith.truncf %10 : vector<512x16xf32> to vector<512x16xbf16>
    %c0_7 = arith.constant 0 : index
    %c0_8 = arith.constant 0 : index
    %12 = vector.load %arg4[%c0_7, %c0_8] : memref<512x16xbf16, #tpu.memory_space<vmem>>, vector<512x16xbf16>
    tpu.vector_store %arg4[%c0_7, %c0_8], %11 {strides = array<i32>} : memref<512x16xbf16, #tpu.memory_space<vmem>>, vector<512x16xbf16>,
    return
  }
  func.func @transform_0(%arg0: i32) -> (i32, i32) {
    %c0_i32 = arith.constant 0 : i32
    %c0_i32_0 = arith.constant 0 : i32
    return %arg0, %c0_i32 : i32, i32
  }
  func.func @transform_1(%arg0: i32) -> (i32, i32) {
    %c0_i32 = arith.constant 0 : i32
    %c0_i32_0 = arith.constant 0 : i32
    %c0_i32_1 = arith.constant 0 : i32
    return %c0_i32, %c0_i32_0 : i32, i32
  }
  func.func @transform_2(%arg0: i32) -> (i32, i32) {
    %c0_i32 = arith.constant 0 : i32
    %c0_i32_0 = arith.constant 0 : i32
    %c0_i32_1 = arith.constant 0 : i32
    return %c0_i32, %c0_i32_0 : i32, i32
  }
  func.func @transform_3(%arg0: i32) -> (i32, i32) {
    %c0_i32 = arith.constant 0 : i32
    %c0_i32_0 = arith.constant 0 : i32
    return %arg0, %c0_i32 : i32, i32
  }
}

module attributes {stable_mosaic.version = 11 : i64} {
  func.func @_conv_attn_kernel(%arg0: i32, %arg1: memref<1x64x256xbf16, #tpu.memory_space<vmem>>, %arg2: memref<256x32xbf16, #tpu.memory_space<vmem>>, %arg3: memref<1x32xf32, #tpu.memory_space<vmem>>, %arg4: memref<32x4xbf16, #tpu.memory_space<vmem>>, %arg5: memref<32x4xbf16, #tpu.memory_space<vmem>>, %arg6: memref<32x32xbf16, #tpu.memory_space<vmem>>, %arg7: memref<1x4xf32, #tpu.memory_space<vmem>>, %arg8: memref<1x4xf32, #tpu.memory_space<vmem>>, %arg9: memref<1x32xf32, #tpu.memory_space<vmem>>, %arg10: memref<1x1xf32, #tpu.memory_space<smem>>, %arg11: memref<1x64x32xbf16, #tpu.memory_space<vmem>>, %arg12: memref<1x64x64xf32, #tpu.memory_space<vmem>>) attributes {dimension_semantics = [#tpu.dimension_semantics<parallel>], iteration_bounds = array<i64: 2>, scalar_prefetch = 0 : i64, scratch_operands = 0 : i64, tpu.core_type = #tpu.core_type<tc>, window_params = [{transform_indices = @transform_0, window_bounds = array<i64: 1, 64, 256>}, {pipeline_mode = #tpu.pipeline_mode<synchronous>, transform_indices = @transform_1, window_bounds = array<i64: 256, 32>}, {pipeline_mode = #tpu.pipeline_mode<synchronous>, transform_indices = @transform_2, window_bounds = array<i64: 1, 32>}, {pipeline_mode = #tpu.pipeline_mode<synchronous>, transform_indices = @transform_3, window_bounds = array<i64: 32, 4>}, {pipeline_mode = #tpu.pipeline_mode<synchronous>, transform_indices = @transform_4, window_bounds = array<i64: 32, 4>}, {pipeline_mode = #tpu.pipeline_mode<synchronous>, transform_indices = @transform_5, window_bounds = array<i64: 32, 32>}, {pipeline_mode = #tpu.pipeline_mode<synchronous>, transform_indices = @transform_6, window_bounds = array<i64: 1, 4>}, {pipeline_mode = #tpu.pipeline_mode<synchronous>, transform_indices = @transform_7, window_bounds = array<i64: 1, 4>}, {pipeline_mode = #tpu.pipeline_mode<synchronous>, transform_indices = @transform_8, window_bounds = array<i64: 1, 32>}, {transform_indices = @transform_9, window_bounds = array<i64: 1, 1>}, {transform_indices = @transform_10, window_bounds = array<i64: 1, 64, 32>}, {transform_indices = @transform_11, window_bounds = array<i64: 1, 64, 64>}]} {
    %c0 = arith.constant 0 : index
    %c0_0 = arith.constant 0 : index
    %c0_1 = arith.constant 0 : index
    %0 = vector.load %arg1[%c0, %c0_0, %c0_1] : memref<1x64x256xbf16, #tpu.memory_space<vmem>>, vector<1x64x256xbf16>
    %1 = vector.shape_cast %0 : vector<1x64x256xbf16> to vector<64x256xbf16>
    %c0_2 = arith.constant 0 : index
    %c0_3 = arith.constant 0 : index
    %2 = vector.load %arg2[%c0_2, %c0_3] : memref<256x32xbf16, #tpu.memory_space<vmem>>, vector<256x32xbf16>
    %cst = arith.constant dense<0.000000e+00> : vector<64x32xf32>
    %3 = tpu.matmul %1, %2, %cst {dimension_numbers = #tpu.dot_dimension_numbers<[1], [0], [0], [1], [0, 0, 1, 1], [], []>} : vector<64x256xbf16>, vector<256x32xbf16>, vector<64x32xf32> -> vector<64x32xf32>
    %c0_4 = arith.constant 0 : index
    %c0_5 = arith.constant 0 : index
    %4 = vector.load %arg3[%c0_4, %c0_5] : memref<1x32xf32, #tpu.memory_space<vmem>>, vector<1x32xf32>
    %5 = vector.broadcast %4 : vector<1x32xf32> to vector<64x32xf32>
    %6 = arith.addf %3, %5 : vector<64x32xf32>
    %cst_6 = arith.constant 0.000000e+00 : f32
    %7 = vector.broadcast %cst_6 : f32 to vector<64x32xf32>
    %8 = arith.cmpf oge, %6, %7 : vector<64x32xf32>
    %cst_7 = arith.constant 1.000000e-01 : f32
    %9 = vector.broadcast %cst_7 : f32 to vector<64x32xf32>
    %10 = arith.mulf %9, %6 : vector<64x32xf32>
    %11 = arith.select %8, %6, %10 : vector<64x32xi1>, vector<64x32xf32>
    %12 = arith.truncf %11 : vector<64x32xf32> to vector<64x32xbf16>
    %c0_8 = arith.constant 0 : index
    %c0_9 = arith.constant 0 : index
    %13 = vector.load %arg4[%c0_8, %c0_9] : memref<32x4xbf16, #tpu.memory_space<vmem>>, vector<32x4xbf16>
    %cst_10 = arith.constant dense<0.000000e+00> : vector<64x4xf32>
    %14 = tpu.matmul %12, %13, %cst_10 {dimension_numbers = #tpu.dot_dimension_numbers<[1], [0], [0], [1], [0, 0, 1, 1], [], []>} : vector<64x32xbf16>, vector<32x4xbf16>, vector<64x4xf32> -> vector<64x4xf32>
    %c0_11 = arith.constant 0 : index
    %c0_12 = arith.constant 0 : index
    %15 = vector.load %arg7[%c0_11, %c0_12] : memref<1x4xf32, #tpu.memory_space<vmem>>, vector<1x4xf32>
    %16 = vector.broadcast %15 : vector<1x4xf32> to vector<64x4xf32>
    %17 = arith.addf %14, %16 : vector<64x4xf32>
    %c0_13 = arith.constant 0 : index
    %c0_14 = arith.constant 0 : index
    %18 = vector.load %arg5[%c0_13, %c0_14] : memref<32x4xbf16, #tpu.memory_space<vmem>>, vector<32x4xbf16>
    %cst_15 = arith.constant dense<0.000000e+00> : vector<64x4xf32>
    %19 = tpu.matmul %12, %18, %cst_15 {dimension_numbers = #tpu.dot_dimension_numbers<[1], [0], [0], [1], [0, 0, 1, 1], [], []>} : vector<64x32xbf16>, vector<32x4xbf16>, vector<64x4xf32> -> vector<64x4xf32>
    %c0_16 = arith.constant 0 : index
    %c0_17 = arith.constant 0 : index
    %20 = vector.load %arg8[%c0_16, %c0_17] : memref<1x4xf32, #tpu.memory_space<vmem>>, vector<1x4xf32>
    %21 = vector.broadcast %20 : vector<1x4xf32> to vector<64x4xf32>
    %22 = arith.addf %19, %21 : vector<64x4xf32>
    %c0_18 = arith.constant 0 : index
    %c0_19 = arith.constant 0 : index
    %23 = vector.load %arg6[%c0_18, %c0_19] : memref<32x32xbf16, #tpu.memory_space<vmem>>, vector<32x32xbf16>
    %cst_20 = arith.constant dense<0.000000e+00> : vector<64x32xf32>
    %24 = tpu.matmul %12, %23, %cst_20 {dimension_numbers = #tpu.dot_dimension_numbers<[1], [0], [0], [1], [0, 0, 1, 1], [], []>} : vector<64x32xbf16>, vector<32x32xbf16>, vector<64x32xf32> -> vector<64x32xf32>
    %c0_21 = arith.constant 0 : index
    %c0_22 = arith.constant 0 : index
    %25 = vector.load %arg9[%c0_21, %c0_22] : memref<1x32xf32, #tpu.memory_space<vmem>>, vector<1x32xf32>
    %26 = vector.broadcast %25 : vector<1x32xf32> to vector<64x32xf32>
    %27 = arith.addf %24, %26 : vector<64x32xf32>
    %28 = tpu.transpose %22, [1, 0] : vector<64x4xf32> -> vector<4x64xf32>
    %cst_23 = arith.constant dense<0.000000e+00> : vector<64x64xf32>
    %29 = tpu.matmul %17, %28, %cst_23 {dimension_numbers = #tpu.dot_dimension_numbers<[1], [0], [0], [1], [0, 0, 1, 1], [], []>} : vector<64x4xf32>, vector<4x64xf32>, vector<64x64xf32> -> vector<64x64xf32>
    %cst_24 = arith.constant dense<0xFF800000> : vector<64xf32>
    %30 = vector.multi_reduction <maximumf>, %29, %cst_24 [1] : vector<64x64xf32> to vector<64xf32>
    %31 = vector.shape_cast %30 : vector<64xf32> to vector<64x1xf32>
    %32 = vector.broadcast %31 : vector<64x1xf32> to vector<64x64xf32>
    %33 = arith.subf %29, %32 : vector<64x64xf32>
    %34 = math.exp %33 : vector<64x64xf32>
    %cst_25 = arith.constant dense<0.000000e+00> : vector<64xf32>
    %35 = vector.multi_reduction <add>, %34, %cst_25 [1] : vector<64x64xf32> to vector<64xf32>
    %36 = vector.shape_cast %35 : vector<64xf32> to vector<64x1xf32>
    %37 = tpu.reciprocal %36 {approx = true} : vector<64x1xf32> -> vector<64x1xf32>
    %38 = vector.broadcast %37 : vector<64x1xf32> to vector<64x64xf32>
    %39 = arith.mulf %34, %38 : vector<64x64xf32>
    %cst_26 = arith.constant dense<0.000000e+00> : vector<64x32xf32>
    %40 = tpu.matmul %39, %27, %cst_26 {dimension_numbers = #tpu.dot_dimension_numbers<[1], [0], [0], [1], [0, 0, 1, 1], [], []>} : vector<64x64xf32>, vector<64x32xf32>, vector<64x32xf32> -> vector<64x32xf32>
    %c0_27 = arith.constant 0 : index
    %c0_28 = arith.constant 0 : index
    %41 = memref.load %arg10[%c0_27, %c0_28] : memref<1x1xf32, #tpu.memory_space<smem>>
    %42 = vector.broadcast %41 : f32 to vector<64x32xf32>
    %43 = arith.mulf %42, %40 : vector<64x32xf32>
    %44 = arith.addf %43, %11 : vector<64x32xf32>
    %45 = arith.truncf %44 : vector<64x32xf32> to vector<64x32xbf16>
    %c0_29 = arith.constant 0 : index
    %c0_30 = arith.constant 0 : index
    %c0_31 = arith.constant 0 : index
    %46 = vector.load %arg11[%c0_29, %c0_30, %c0_31] : memref<1x64x32xbf16, #tpu.memory_space<vmem>>, vector<1x64x32xbf16>
    %47 = vector.shape_cast %46 : vector<1x64x32xbf16> to vector<64x32xbf16>
    %48 = vector.shape_cast %45 : vector<64x32xbf16> to vector<1x64x32xbf16>
    tpu.vector_store %arg11[%c0_29, %c0_30, %c0_31], %48 {strides = array<i32>} : memref<1x64x32xbf16, #tpu.memory_space<vmem>>, vector<1x64x32xbf16>,
    %c0_32 = arith.constant 0 : index
    %c0_33 = arith.constant 0 : index
    %c0_34 = arith.constant 0 : index
    %49 = vector.load %arg12[%c0_32, %c0_33, %c0_34] : memref<1x64x64xf32, #tpu.memory_space<vmem>>, vector<1x64x64xf32>
    %50 = vector.shape_cast %49 : vector<1x64x64xf32> to vector<64x64xf32>
    %51 = vector.shape_cast %39 : vector<64x64xf32> to vector<1x64x64xf32>
    tpu.vector_store %arg12[%c0_32, %c0_33, %c0_34], %51 {strides = array<i32>} : memref<1x64x64xf32, #tpu.memory_space<vmem>>, vector<1x64x64xf32>,
    return
  }
  func.func @transform_0(%arg0: i32) -> (i32, i32, i32) {
    %c0_i32 = arith.constant 0 : i32
    %c0_i32_0 = arith.constant 0 : i32
    %c0_i32_1 = arith.constant 0 : i32
    return %arg0, %c0_i32, %c0_i32_0 : i32, i32, i32
  }
  func.func @transform_1(%arg0: i32) -> (i32, i32) {
    %c0_i32 = arith.constant 0 : i32
    %c0_i32_0 = arith.constant 0 : i32
    %c0_i32_1 = arith.constant 0 : i32
    return %c0_i32, %c0_i32_0 : i32, i32
  }
  func.func @transform_2(%arg0: i32) -> (i32, i32) {
    %c0_i32 = arith.constant 0 : i32
    %c0_i32_0 = arith.constant 0 : i32
    %c0_i32_1 = arith.constant 0 : i32
    return %c0_i32, %c0_i32_0 : i32, i32
  }
  func.func @transform_3(%arg0: i32) -> (i32, i32) {
    %c0_i32 = arith.constant 0 : i32
    %c0_i32_0 = arith.constant 0 : i32
    %c0_i32_1 = arith.constant 0 : i32
    return %c0_i32, %c0_i32_0 : i32, i32
  }
  func.func @transform_4(%arg0: i32) -> (i32, i32) {
    %c0_i32 = arith.constant 0 : i32
    %c0_i32_0 = arith.constant 0 : i32
    %c0_i32_1 = arith.constant 0 : i32
    return %c0_i32, %c0_i32_0 : i32, i32
  }
  func.func @transform_5(%arg0: i32) -> (i32, i32) {
    %c0_i32 = arith.constant 0 : i32
    %c0_i32_0 = arith.constant 0 : i32
    %c0_i32_1 = arith.constant 0 : i32
    return %c0_i32, %c0_i32_0 : i32, i32
  }
  func.func @transform_6(%arg0: i32) -> (i32, i32) {
    %c0_i32 = arith.constant 0 : i32
    %c0_i32_0 = arith.constant 0 : i32
    %c0_i32_1 = arith.constant 0 : i32
    return %c0_i32, %c0_i32_0 : i32, i32
  }
  func.func @transform_7(%arg0: i32) -> (i32, i32) {
    %c0_i32 = arith.constant 0 : i32
    %c0_i32_0 = arith.constant 0 : i32
    %c0_i32_1 = arith.constant 0 : i32
    return %c0_i32, %c0_i32_0 : i32, i32
  }
  func.func @transform_8(%arg0: i32) -> (i32, i32) {
    %c0_i32 = arith.constant 0 : i32
    %c0_i32_0 = arith.constant 0 : i32
    %c0_i32_1 = arith.constant 0 : i32
    return %c0_i32, %c0_i32_0 : i32, i32
  }
  func.func @transform_9(%arg0: i32) -> (i32, i32) {
    %c0_i32 = arith.constant 0 : i32
    %c0_i32_0 = arith.constant 0 : i32
    %c0_i32_1 = arith.constant 0 : i32
    return %c0_i32, %c0_i32_0 : i32, i32
  }
  func.func @transform_10(%arg0: i32) -> (i32, i32, i32) {
    %c0_i32 = arith.constant 0 : i32
    %c0_i32_0 = arith.constant 0 : i32
    %c0_i32_1 = arith.constant 0 : i32
    return %arg0, %c0_i32, %c0_i32_0 : i32, i32, i32
  }
  func.func @transform_11(%arg0: i32) -> (i32, i32, i32) {
    %c0_i32 = arith.constant 0 : i32
    %c0_i32_0 = arith.constant 0 : i32
    %c0_i32_1 = arith.constant 0 : i32
    return %arg0, %c0_i32, %c0_i32_0 : i32, i32, i32
  }
}

module attributes {stable_mosaic.version = 11 : i64} {
  func.func @_conv_attn_head_kernel(%arg0: i32, %arg1: memref<1x16x512xbf16, #tpu.memory_space<vmem>>, %arg2: memref<512x64xbf16, #tpu.memory_space<vmem>>, %arg3: memref<1x64xf32, #tpu.memory_space<vmem>>, %arg4: memref<64x8xbf16, #tpu.memory_space<vmem>>, %arg5: memref<64x8xbf16, #tpu.memory_space<vmem>>, %arg6: memref<64x64xbf16, #tpu.memory_space<vmem>>, %arg7: memref<1x8xf32, #tpu.memory_space<vmem>>, %arg8: memref<1x8xf32, #tpu.memory_space<vmem>>, %arg9: memref<1x64xf32, #tpu.memory_space<vmem>>, %arg10: memref<1x1xf32, #tpu.memory_space<smem>>, %arg11: memref<16x64xf32, #tpu.memory_space<vmem>>, %arg12: memref<1x1xf32, #tpu.memory_space<vmem>>, %arg13: memref<1x1x1xf32, #tpu.memory_space<vmem>>, %arg14: memref<1x16x16xf32, #tpu.memory_space<vmem>>) attributes {dimension_semantics = [#tpu.dimension_semantics<parallel>], iteration_bounds = array<i64: 2>, scalar_prefetch = 0 : i64, scratch_operands = 0 : i64, tpu.core_type = #tpu.core_type<tc>, window_params = [{transform_indices = @transform_0, window_bounds = array<i64: 1, 16, 512>}, {pipeline_mode = #tpu.pipeline_mode<synchronous>, transform_indices = @transform_1, window_bounds = array<i64: 512, 64>}, {pipeline_mode = #tpu.pipeline_mode<synchronous>, transform_indices = @transform_2, window_bounds = array<i64: 1, 64>}, {pipeline_mode = #tpu.pipeline_mode<synchronous>, transform_indices = @transform_3, window_bounds = array<i64: 64, 8>}, {pipeline_mode = #tpu.pipeline_mode<synchronous>, transform_indices = @transform_4, window_bounds = array<i64: 64, 8>}, {pipeline_mode = #tpu.pipeline_mode<synchronous>, transform_indices = @transform_5, window_bounds = array<i64: 64, 64>}, {pipeline_mode = #tpu.pipeline_mode<synchronous>, transform_indices = @transform_6, window_bounds = array<i64: 1, 8>}, {pipeline_mode = #tpu.pipeline_mode<synchronous>, transform_indices = @transform_7, window_bounds = array<i64: 1, 8>}, {pipeline_mode = #tpu.pipeline_mode<synchronous>, transform_indices = @transform_8, window_bounds = array<i64: 1, 64>}, {transform_indices = @transform_9, window_bounds = array<i64: 1, 1>}, {pipeline_mode = #tpu.pipeline_mode<synchronous>, transform_indices = @transform_10, window_bounds = array<i64: 16, 64>}, {pipeline_mode = #tpu.pipeline_mode<synchronous>, transform_indices = @transform_11, window_bounds = array<i64: 1, 1>}, {transform_indices = @transform_12, window_bounds = array<i64: 1, 1, 1>}, {transform_indices = @transform_13, window_bounds = array<i64: 1, 16, 16>}]} {
    %c0 = arith.constant 0 : index
    %c0_0 = arith.constant 0 : index
    %c0_1 = arith.constant 0 : index
    %0 = vector.load %arg1[%c0, %c0_0, %c0_1] : memref<1x16x512xbf16, #tpu.memory_space<vmem>>, vector<1x16x512xbf16>
    %1 = vector.shape_cast %0 : vector<1x16x512xbf16> to vector<16x512xbf16>
    %c0_2 = arith.constant 0 : index
    %c0_3 = arith.constant 0 : index
    %2 = vector.load %arg2[%c0_2, %c0_3] : memref<512x64xbf16, #tpu.memory_space<vmem>>, vector<512x64xbf16>
    %cst = arith.constant dense<0.000000e+00> : vector<16x64xf32>
    %3 = tpu.matmul %1, %2, %cst {dimension_numbers = #tpu.dot_dimension_numbers<[1], [0], [0], [1], [0, 0, 1, 1], [], []>} : vector<16x512xbf16>, vector<512x64xbf16>, vector<16x64xf32> -> vector<16x64xf32>
    %c0_4 = arith.constant 0 : index
    %c0_5 = arith.constant 0 : index
    %4 = vector.load %arg3[%c0_4, %c0_5] : memref<1x64xf32, #tpu.memory_space<vmem>>, vector<1x64xf32>
    %5 = vector.broadcast %4 : vector<1x64xf32> to vector<16x64xf32>
    %6 = arith.addf %3, %5 : vector<16x64xf32>
    %cst_6 = arith.constant 0.000000e+00 : f32
    %7 = vector.broadcast %cst_6 : f32 to vector<16x64xf32>
    %8 = arith.cmpf oge, %6, %7 : vector<16x64xf32>
    %cst_7 = arith.constant 1.000000e-01 : f32
    %9 = vector.broadcast %cst_7 : f32 to vector<16x64xf32>
    %10 = arith.mulf %9, %6 : vector<16x64xf32>
    %11 = arith.select %8, %6, %10 : vector<16x64xi1>, vector<16x64xf32>
    %12 = arith.truncf %11 : vector<16x64xf32> to vector<16x64xbf16>
    %c0_8 = arith.constant 0 : index
    %c0_9 = arith.constant 0 : index
    %13 = vector.load %arg4[%c0_8, %c0_9] : memref<64x8xbf16, #tpu.memory_space<vmem>>, vector<64x8xbf16>
    %cst_10 = arith.constant dense<0.000000e+00> : vector<16x8xf32>
    %14 = tpu.matmul %12, %13, %cst_10 {dimension_numbers = #tpu.dot_dimension_numbers<[1], [0], [0], [1], [0, 0, 1, 1], [], []>} : vector<16x64xbf16>, vector<64x8xbf16>, vector<16x8xf32> -> vector<16x8xf32>
    %c0_11 = arith.constant 0 : index
    %c0_12 = arith.constant 0 : index
    %15 = vector.load %arg7[%c0_11, %c0_12] : memref<1x8xf32, #tpu.memory_space<vmem>>, vector<1x8xf32>
    %16 = vector.broadcast %15 : vector<1x8xf32> to vector<16x8xf32>
    %17 = arith.addf %14, %16 : vector<16x8xf32>
    %c0_13 = arith.constant 0 : index
    %c0_14 = arith.constant 0 : index
    %18 = vector.load %arg5[%c0_13, %c0_14] : memref<64x8xbf16, #tpu.memory_space<vmem>>, vector<64x8xbf16>
    %cst_15 = arith.constant dense<0.000000e+00> : vector<16x8xf32>
    %19 = tpu.matmul %12, %18, %cst_15 {dimension_numbers = #tpu.dot_dimension_numbers<[1], [0], [0], [1], [0, 0, 1, 1], [], []>} : vector<16x64xbf16>, vector<64x8xbf16>, vector<16x8xf32> -> vector<16x8xf32>
    %c0_16 = arith.constant 0 : index
    %c0_17 = arith.constant 0 : index
    %20 = vector.load %arg8[%c0_16, %c0_17] : memref<1x8xf32, #tpu.memory_space<vmem>>, vector<1x8xf32>
    %21 = vector.broadcast %20 : vector<1x8xf32> to vector<16x8xf32>
    %22 = arith.addf %19, %21 : vector<16x8xf32>
    %c0_18 = arith.constant 0 : index
    %c0_19 = arith.constant 0 : index
    %23 = vector.load %arg6[%c0_18, %c0_19] : memref<64x64xbf16, #tpu.memory_space<vmem>>, vector<64x64xbf16>
    %cst_20 = arith.constant dense<0.000000e+00> : vector<16x64xf32>
    %24 = tpu.matmul %12, %23, %cst_20 {dimension_numbers = #tpu.dot_dimension_numbers<[1], [0], [0], [1], [0, 0, 1, 1], [], []>} : vector<16x64xbf16>, vector<64x64xbf16>, vector<16x64xf32> -> vector<16x64xf32>
    %c0_21 = arith.constant 0 : index
    %c0_22 = arith.constant 0 : index
    %25 = vector.load %arg9[%c0_21, %c0_22] : memref<1x64xf32, #tpu.memory_space<vmem>>, vector<1x64xf32>
    %26 = vector.broadcast %25 : vector<1x64xf32> to vector<16x64xf32>
    %27 = arith.addf %24, %26 : vector<16x64xf32>
    %28 = tpu.transpose %22, [1, 0] : vector<16x8xf32> -> vector<8x16xf32>
    %cst_23 = arith.constant dense<0.000000e+00> : vector<16x16xf32>
    %29 = tpu.matmul %17, %28, %cst_23 {dimension_numbers = #tpu.dot_dimension_numbers<[1], [0], [0], [1], [0, 0, 1, 1], [], []>} : vector<16x8xf32>, vector<8x16xf32>, vector<16x16xf32> -> vector<16x16xf32>
    %cst_24 = arith.constant dense<0xFF800000> : vector<16xf32>
    %30 = vector.multi_reduction <maximumf>, %29, %cst_24 [1] : vector<16x16xf32> to vector<16xf32>
    %31 = vector.shape_cast %30 : vector<16xf32> to vector<16x1xf32>
    %32 = vector.broadcast %31 : vector<16x1xf32> to vector<16x16xf32>
    %33 = arith.subf %29, %32 : vector<16x16xf32>
    %34 = math.exp %33 : vector<16x16xf32>
    %cst_25 = arith.constant dense<0.000000e+00> : vector<16xf32>
    %35 = vector.multi_reduction <add>, %34, %cst_25 [1] : vector<16x16xf32> to vector<16xf32>
    %36 = vector.shape_cast %35 : vector<16xf32> to vector<16x1xf32>
    %37 = tpu.reciprocal %36 {approx = true} : vector<16x1xf32> -> vector<16x1xf32>
    %38 = vector.broadcast %37 : vector<16x1xf32> to vector<16x16xf32>
    %39 = arith.mulf %34, %38 : vector<16x16xf32>
    %cst_26 = arith.constant dense<0.000000e+00> : vector<16x64xf32>
    %40 = tpu.matmul %39, %27, %cst_26 {dimension_numbers = #tpu.dot_dimension_numbers<[1], [0], [0], [1], [0, 0, 1, 1], [], []>} : vector<16x16xf32>, vector<16x64xf32>, vector<16x64xf32> -> vector<16x64xf32>
    %c0_27 = arith.constant 0 : index
    %c0_28 = arith.constant 0 : index
    %41 = memref.load %arg10[%c0_27, %c0_28] : memref<1x1xf32, #tpu.memory_space<smem>>
    %42 = vector.broadcast %41 : f32 to vector<16x64xf32>
    %43 = arith.mulf %42, %40 : vector<16x64xf32>
    %44 = arith.addf %43, %11 : vector<16x64xf32>
    %c0_29 = arith.constant 0 : index
    %c0_30 = arith.constant 0 : index
    %45 = vector.load %arg11[%c0_29, %c0_30] : memref<16x64xf32, #tpu.memory_space<vmem>>, vector<16x64xf32>
    %46 = arith.mulf %44, %45 : vector<16x64xf32>
    %cst_31 = arith.constant dense<0.000000e+00> : vector<16xf32>
    %47 = vector.multi_reduction <add>, %46, %cst_31 [1] : vector<16x64xf32> to vector<16xf32>
    %48 = vector.shape_cast %47 : vector<16xf32> to vector<16x1xf32>
    %cst_32 = arith.constant dense<0.000000e+00> : vector<1xf32>
    %49 = vector.multi_reduction <add>, %48, %cst_32 [0] : vector<16x1xf32> to vector<1xf32>
    %50 = vector.shape_cast %49 : vector<1xf32> to vector<1x1xf32>
    %c0_33 = arith.constant 0 : index
    %c0_34 = arith.constant 0 : index
    %51 = vector.load %arg12[%c0_33, %c0_34] : memref<1x1xf32, #tpu.memory_space<vmem>>, vector<1x1xf32>
    %52 = arith.addf %50, %51 : vector<1x1xf32>
    %c0_35 = arith.constant 0 : index
    %c0_36 = arith.constant 0 : index
    %c0_37 = arith.constant 0 : index
    %53 = vector.load %arg13[%c0_35, %c0_36, %c0_37] : memref<1x1x1xf32, #tpu.memory_space<vmem>>, vector<1x1x1xf32>
    %54 = vector.shape_cast %53 : vector<1x1x1xf32> to vector<1x1xf32>
    %55 = vector.shape_cast %52 : vector<1x1xf32> to vector<1x1x1xf32>
    tpu.vector_store %arg13[%c0_35, %c0_36, %c0_37], %55 {strides = array<i32>} : memref<1x1x1xf32, #tpu.memory_space<vmem>>, vector<1x1x1xf32>,
    %c0_38 = arith.constant 0 : index
    %c0_39 = arith.constant 0 : index
    %c0_40 = arith.constant 0 : index
    %56 = vector.load %arg14[%c0_38, %c0_39, %c0_40] : memref<1x16x16xf32, #tpu.memory_space<vmem>>, vector<1x16x16xf32>
    %57 = vector.shape_cast %56 : vector<1x16x16xf32> to vector<16x16xf32>
    %58 = vector.shape_cast %39 : vector<16x16xf32> to vector<1x16x16xf32>
    tpu.vector_store %arg14[%c0_38, %c0_39, %c0_40], %58 {strides = array<i32>} : memref<1x16x16xf32, #tpu.memory_space<vmem>>, vector<1x16x16xf32>,
    return
  }
  func.func @transform_0(%arg0: i32) -> (i32, i32, i32) {
    %c0_i32 = arith.constant 0 : i32
    %c0_i32_0 = arith.constant 0 : i32
    %c0_i32_1 = arith.constant 0 : i32
    return %arg0, %c0_i32, %c0_i32_0 : i32, i32, i32
  }
  func.func @transform_1(%arg0: i32) -> (i32, i32) {
    %c0_i32 = arith.constant 0 : i32
    %c0_i32_0 = arith.constant 0 : i32
    %c0_i32_1 = arith.constant 0 : i32
    return %c0_i32, %c0_i32_0 : i32, i32
  }
  func.func @transform_2(%arg0: i32) -> (i32, i32) {
    %c0_i32 = arith.constant 0 : i32
    %c0_i32_0 = arith.constant 0 : i32
    %c0_i32_1 = arith.constant 0 : i32
    return %c0_i32, %c0_i32_0 : i32, i32
  }
  func.func @transform_3(%arg0: i32) -> (i32, i32) {
    %c0_i32 = arith.constant 0 : i32
    %c0_i32_0 = arith.constant 0 : i32
    %c0_i32_1 = arith.constant 0 : i32
    return %c0_i32, %c0_i32_0 : i32, i32
  }
  func.func @transform_4(%arg0: i32) -> (i32, i32) {
    %c0_i32 = arith.constant 0 : i32
    %c0_i32_0 = arith.constant 0 : i32
    %c0_i32_1 = arith.constant 0 : i32
    return %c0_i32, %c0_i32_0 : i32, i32
  }
  func.func @transform_5(%arg0: i32) -> (i32, i32) {
    %c0_i32 = arith.constant 0 : i32
    %c0_i32_0 = arith.constant 0 : i32
    %c0_i32_1 = arith.constant 0 : i32
    return %c0_i32, %c0_i32_0 : i32, i32
  }
  func.func @transform_6(%arg0: i32) -> (i32, i32) {
    %c0_i32 = arith.constant 0 : i32
    %c0_i32_0 = arith.constant 0 : i32
    %c0_i32_1 = arith.constant 0 : i32
    return %c0_i32, %c0_i32_0 : i32, i32
  }
  func.func @transform_7(%arg0: i32) -> (i32, i32) {
    %c0_i32 = arith.constant 0 : i32
    %c0_i32_0 = arith.constant 0 : i32
    %c0_i32_1 = arith.constant 0 : i32
    return %c0_i32, %c0_i32_0 : i32, i32
  }
  func.func @transform_8(%arg0: i32) -> (i32, i32) {
    %c0_i32 = arith.constant 0 : i32
    %c0_i32_0 = arith.constant 0 : i32
    %c0_i32_1 = arith.constant 0 : i32
    return %c0_i32, %c0_i32_0 : i32, i32
  }
  func.func @transform_9(%arg0: i32) -> (i32, i32) {
    %c0_i32 = arith.constant 0 : i32
    %c0_i32_0 = arith.constant 0 : i32
    %c0_i32_1 = arith.constant 0 : i32
    return %c0_i32, %c0_i32_0 : i32, i32
  }
  func.func @transform_10(%arg0: i32) -> (i32, i32) {
    %c0_i32 = arith.constant 0 : i32
    %c0_i32_0 = arith.constant 0 : i32
    %c0_i32_1 = arith.constant 0 : i32
    return %c0_i32, %c0_i32_0 : i32, i32
  }
  func.func @transform_11(%arg0: i32) -> (i32, i32) {
    %c0_i32 = arith.constant 0 : i32
    %c0_i32_0 = arith.constant 0 : i32
    %c0_i32_1 = arith.constant 0 : i32
    return %c0_i32, %c0_i32_0 : i32, i32
  }
  func.func @transform_12(%arg0: i32) -> (i32, i32, i32) {
    %c0_i32 = arith.constant 0 : i32
    %c0_i32_0 = arith.constant 0 : i32
    %c0_i32_1 = arith.constant 0 : i32
    return %arg0, %c0_i32, %c0_i32_0 : i32, i32, i32
  }
  func.func @transform_13(%arg0: i32) -> (i32, i32, i32) {
    %c0_i32 = arith.constant 0 : i32
    %c0_i32_0 = arith.constant 0 : i32
    %c0_i32_1 = arith.constant 0 : i32
    return %arg0, %c0_i32, %c0_i32_0 : i32, i32, i32
  }
}

</mosaic_0001>

<bundles_post_ra>
// kernel: discriminator_forward.4
= control target key start
LH: loop header
LB: loop body
LE: loop exit
PB: predicated region body
PF: predicated region fallthrough
CT: control target
= control target key end

     0   :  { %s3153_s12 = smov 0   ;;  %s3969_s0 = inlined_call_operand.vmem [shape: bf16[2048,16], index: 0, kind: input, shape index: {}]   ;;  %s3970_s1 = inlined_call_operand.vmem [shape: bf16[16,8], index: 1, kind: input, shape index: {}]   ;;  %s3971_s2 = inlined_call_operand.vmem [shape: f32[1,8], index: 2, kind: input, shape index: {}]   ;;  %s3972_s3 = inlined_call_operand.vmem [shape: bf16[2048,8], index: 3, kind: output, shape index: {}]  }
   0x1 LB: > { %s2457_s13 = sadd.s32 4294967295, %s3131_s12   ;;  %p2461_p0 = scmp.ge.s32.totalorder %s3131_s12, 1  ;;  %s3131_s12 = sphi %s3153_s12, %s13_s12  }
   0x2   : > { %p138_p1 = scmp.lt.s32.totalorder %s3131_s12, 3 }
   0x4   : > { %p139_p2 = pnand %p2461_p0, %p138_p1 }
   0x5   : > { %v3059_v0 = vld [vmem:[%s3970_s1] sm:$0xff] (!%p139_p2)   ;;  %s2462_s16 = sshll.u32 (!%p139_p2), %s2457_s13, 7  ;;  %vm638_vm0 = vcmask (!%p139_p2), 130048   ;;  %vm2272_vm1 = vcmask (!%p139_p2), 60416  }
   0x6   : > { %142 = sbr.rel (%p139_p2) target bundleno = 397 (0x18d), region = 32  ;;  %p163_p3 = scmp.lt.s32.totalorder (!%p139_p2), %s2462_s16, 255  ;;  %2919 = vmatprep.subr.bf16.mxu0 (!%p139_p2), %v3059_v0  ;;  %3049 = vmatprep.subr.bf16.mxu1 (!%p139_p2), %v3059_v0 }
   0x7   : > { %2920 = vmatpush3.bf16.msra.mxu0 (!%p139_p2), %v3059_v0  ;;  %3050 = vmatpush3.bf16.msra.mxu1 (!%p139_p2), %v3059_v0 }
   0xd   : > { %s3974_s16 = smov (!%p163_p3, %s2462_s16), 255 }
   0xe   : > { %s2463_s17 = sshll.u32 %s3974_s16, 2 }
   0xf   : > { %s3172_s20 = scalar_lea.vmem %s3969_s0, %s2463_s17  ;;  %s3317_s25 = scalar_lea.vmem %s3972_s3, %s2463_s17 }
  0x10   : > { %v3060_v1 = vld [vmem:[%s3172_s20] sm:$0xff]   ;;  %v3062_v3 = vld [vmem:[%s3172_s20 + $0x8] sm:$0xff]   ;;  %v3064_v5 = vld [vmem:[%s3172_s20 + $0x10] sm:$0xff]  }
  0x11   : > { %v3061_v2 = vld [vmem:[%s3172_s20 + $0x100] sm:$0xff]   ;;  %2921 = vmatprep.mubr.msk.bf16.mxu0 %vm638_vm0, %v3060_v1  ;;  %v3063_v4 = vld [vmem:[%s3172_s20 + $0x108] sm:$0xff]   ;;  %v3065_v6 = vld [vmem:[%s3172_s20 + $0x110] sm:$0xff]  }
  0x12   : > { %2985 = vmatprep.mubr.msk.bf16.mxu1 %vm638_vm0, %v3061_v2  ;;  %2922 = vmatmul.mubr.msk.bf16.vlgmr.msra.gmra.mrb[0].mxu0 %vm638_vm0, %v3062_v3  ;;  %v3066_v7 = vld [vmem:[%s3172_s20 + $0x18] sm:$0xff]   ;;  %v3068_v9 = vld [vmem:[%s3172_s20 + $0x20] sm:$0xff]   ;;  %v3070_v11 = vld [vmem:[%s3172_s20 + $0x28] sm:$0xff]  }
  0x13   : > { %2986 = vmatmul.mubr.msk.bf16.vlgmr.msra.gmra.mrb[0].mxu1 %vm638_vm0, %v3063_v4  ;;  %2925 = vmatprep.mubr.msk.bf16.mxu0 %vm638_vm0, %v3064_v5  ;;  %v3067_v8 = vld [vmem:[%s3172_s20 + $0x118] sm:$0xff]   ;;  %v3069_v10 = vld [vmem:[%s3172_s20 + $0x120] sm:$0xff]   ;;  %v3071_v12 = vld [vmem:[%s3172_s20 + $0x128] sm:$0xff]  }
  0x14   : > { %2989 = vmatprep.mubr.msk.bf16.mxu1 %vm638_vm0, %v3065_v6  ;;  %v3072_v13 = vld [vmem:[%s3172_s20 + $0x30] sm:$0xff]   ;;  %v3074_v15 = vld [vmem:[%s3172_s20 + $0x38] sm:$0xff]   ;;  %v3076_v17 = vld [vmem:[%s3172_s20 + $0x40] sm:$0xff]  }
  0x15   : > { %v3073_v14 = vld [vmem:[%s3172_s20 + $0x130] sm:$0xff]   ;;  %v3075_v16 = vld [vmem:[%s3172_s20 + $0x138] sm:$0xff]   ;;  %v3077_v18 = vld [vmem:[%s3172_s20 + $0x140] sm:$0xff]  }
  0x16   : > { %v3078_v19 = vld [vmem:[%s3172_s20 + $0x48] sm:$0xff]   ;;  %v3080_v21 = vld [vmem:[%s3172_s20 + $0x50] sm:$0xff]   ;;  %v3082_v23 = vld [vmem:[%s3172_s20 + $0x58] sm:$0xff]  }
  0x17   : > { %v3079_v20 = vld [vmem:[%s3172_s20 + $0x148] sm:$0xff]   ;;  %v3081_v22 = vld [vmem:[%s3172_s20 + $0x150] sm:$0xff]   ;;  %v3083_v24 = vld [vmem:[%s3172_s20 + $0x158] sm:$0xff]  }
  0x18   : > { %v3084_v25 = vld [vmem:[%s3172_s20 + $0x60] sm:$0xff]   ;;  %v3086_v27 = vld [vmem:[%s3172_s20 + $0x68] sm:$0xff]   ;;  %v3088_v29 = vld [vmem:[%s3172_s20 + $0x70] sm:$0xff]  }
  0x19   : > { %v3085_v26 = vld [vmem:[%s3172_s20 + $0x160] sm:$0xff]   ;;  %v3087_v28 = vld [vmem:[%s3172_s20 + $0x168] sm:$0xff]   ;;  %v3089_v30 = vld [vmem:[%s3172_s20 + $0x170] sm:$0xff]  }
  0x1a   : > { %2926 = vmatmul.mubr.msk.bf16.gmra.mrb[4].mxu0 %vm638_vm0, %v3066_v7  ;;  %v3090_v31 = vld [vmem:[%s3172_s20 + $0x78] sm:$0xff]   ;;  %v3092_v33 = vld [vmem:[%s3172_s20 + $0x80] sm:$0xff]   ;;  %v3094_v35 = vld [vmem:[%s3172_s20 + $0x88] sm:$0xff]  }
  0x1b   : > { %2990 = vmatmul.mubr.msk.bf16.gmra.mrb[4].mxu1 %vm638_vm0, %v3067_v8  ;;  %2929 = vmatprep.mubr.msk.bf16.mxu0 %vm638_vm0, %v3068_v9  ;;  %v3091_v32 = vld [vmem:[%s3172_s20 + $0x178] sm:$0xff]   ;;  %v3093_v34 = vld [vmem:[%s3172_s20 + $0x180] sm:$0xff]   ;;  %v3095_v36 = vld [vmem:[%s3172_s20 + $0x188] sm:$0xff]  }
  0x1c   : > { %2993 = vmatprep.mubr.msk.bf16.mxu1 %vm638_vm0, %v3069_v10  ;;  %v3096_v37 = vld [vmem:[%s3172_s20 + $0x90] sm:$0xff]   ;;  %v3098_v39 = vld [vmem:[%s3172_s20 + $0x98] sm:$0xff]   ;;  %v3100_v41 = vld [vmem:[%s3172_s20 + $0xa0] sm:$0xff]  }
  0x1d   : > { %v3097_v38 = vld [vmem:[%s3172_s20 + $0x190] sm:$0xff]   ;;  %v3099_v40 = vld [vmem:[%s3172_s20 + $0x198] sm:$0xff]   ;;  %v3101_v42 = vld [vmem:[%s3172_s20 + $0x1a0] sm:$0xff]  }
  0x1e   : > { %v3102_v43 = vld [vmem:[%s3172_s20 + $0xa8] sm:$0xff]   ;;  %v3104_v45 = vld [vmem:[%s3172_s20 + $0xb0] sm:$0xff]   ;;  %v3106_v47 = vld [vmem:[%s3172_s20 + $0xb8] sm:$0xff]  }
  0x1f   : > { %v3103_v44 = vld [vmem:[%s3172_s20 + $0x1a8] sm:$0xff]   ;;  %v3105_v46 = vld [vmem:[%s3172_s20 + $0x1b0] sm:$0xff]   ;;  %v3107_v48 = vld [vmem:[%s3172_s20 + $0x1b8] sm:$0xff]  }
  0x20   : > { %v3108_v49 = vld [vmem:[%s3172_s20 + $0xc0] sm:$0xff]   ;;  %v3110_v51 = vld [vmem:[%s3172_s20 + $0xc8] sm:$0xff]   ;;  %v3112_v53 = vld [vmem:[%s3172_s20 + $0xd0] sm:$0xff]  }
  0x21   : > { %v3109_v50 = vld [vmem:[%s3172_s20 + $0x1c0] sm:$0xff]   ;;  %v3111_v52 = vld [vmem:[%s3172_s20 + $0x1c8] sm:$0xff]   ;;  %v3113_v54 = vld [vmem:[%s3172_s20 + $0x1d0] sm:$0xff]  }
  0x22   : > { %2930 = vmatmul.mubr.msk.bf16.gmra.mrb[8].mxu0 %vm638_vm0, %v3070_v11  ;;  %v3114_v55 = vld [vmem:[%s3172_s20 + $0xd8] sm:$0xff]   ;;  %v3116_v57 = vld [vmem:[%s3172_s20 + $0xe0] sm:$0xff]   ;;  %v3118_v59 = vld [vmem:[%s3172_s20 + $0xe8] sm:$0xff]  }
  0x23   : > { %2994 = vmatmul.mubr.msk.bf16.gmra.mrb[8].mxu1 %vm638_vm0, %v3071_v12  ;;  %2933 = vmatprep.mubr.msk.bf16.mxu0 %vm638_vm0, %v3072_v13  ;;  %v3115_v56 = vld [vmem:[%s3172_s20 + $0x1d8] sm:$0xff]   ;;  %v3117_v58 = vld [vmem:[%s3172_s20 + $0x1e0] sm:$0xff]   ;;  %v3119_v60 = vld [vmem:[%s3172_s20 + $0x1e8] sm:$0xff]  }
  0x24   : > { %2997 = vmatprep.mubr.msk.bf16.mxu1 %vm638_vm0, %v3073_v14  ;;  %v3120_v61 = vld [vmem:[%s3172_s20 + $0xf0] sm:$0xff]   ;;  %v3122_v63 = vld [vmem:[%s3172_s20 + $0xf8] sm:$0xff]   ;;  %v3305_v1 = vld [vmem:[%s3971_s2] ss:$0 sm:$0xff] }
  0x25   : > { %v3121_v62 = vld [vmem:[%s3172_s20 + $0x1f0] sm:$0xff]   ;;  %v3123_v0 = vld [vmem:[%s3172_s20 + $0x1f8] sm:$0xff]  }
  0x2a   : > { %2934 = vmatmul.mubr.msk.bf16.gmra.mrb[12].mxu0 %vm638_vm0, %v3074_v15 }
  0x2b   : > { %2998 = vmatmul.mubr.msk.bf16.gmra.mrb[12].mxu1 %vm638_vm0, %v3075_v16  ;;  %2937 = vmatprep.mubr.msk.bf16.mxu0 %vm638_vm0, %v3076_v17 }
  0x2c   : > { %3001 = vmatprep.mubr.msk.bf16.mxu1 %vm638_vm0, %v3077_v18 }
  0x32   : > { %2938 = vmatmul.mubr.msk.bf16.gmra.mrb[16].mxu0 %vm638_vm0, %v3078_v19 }
  0x33   : > { %3002 = vmatmul.mubr.msk.bf16.gmra.mrb[16].mxu1 %vm638_vm0, %v3079_v20  ;;  %2941 = vmatprep.mubr.msk.bf16.mxu0 %vm638_vm0, %v3080_v21 }
  0x34   : > { %3005 = vmatprep.mubr.msk.bf16.mxu1 %vm638_vm0, %v3081_v22 }
  0x3a   : > { %2942 = vmatmul.mubr.msk.bf16.gmra.mrb[20].mxu0 %vm638_vm0, %v3082_v23 }
  0x3b   : > { %3006 = vmatmul.mubr.msk.bf16.gmra.mrb[20].mxu1 %vm638_vm0, %v3083_v24  ;;  %2945 = vmatprep.mubr.msk.bf16.mxu0 %vm638_vm0, %v3084_v25 }
  0x3c   : > { %3009 = vmatprep.mubr.msk.bf16.mxu1 %vm638_vm0, %v3085_v26 }
  0x42   : > { %2946 = vmatmul.mubr.msk.bf16.gmra.mrb[24].mxu0 %vm638_vm0, %v3086_v27 }
  0x43   : > { %3010 = vmatmul.mubr.msk.bf16.gmra.mrb[24].mxu1 %vm638_vm0, %v3087_v28  ;;  %2949 = vmatprep.mubr.msk.bf16.mxu0 %vm638_vm0, %v3088_v29 }
  0x44   : > { %3013 = vmatprep.mubr.msk.bf16.mxu1 %vm638_vm0, %v3089_v30 }
  0x4a   : > { %2950 = vmatmul.mubr.msk.bf16.gmra.mrb[28].mxu0 %vm638_vm0, %v3090_v31 }
  0x4b   : > { %3014 = vmatmul.mubr.msk.bf16.gmra.mrb[28].mxu1 %vm638_vm0, %v3091_v32  ;;  %2953 = vmatprep.mubr.msk.bf16.mxu0 %vm638_vm0, %v3092_v33 }
  0x4c   : > { %3017 = vmatprep.mubr.msk.bf16.mxu1 %vm638_vm0, %v3093_v34 }
  0x52   : > { %2954 = vmatmul.mubr.msk.bf16.gmra.mrb[32].mxu0 %vm638_vm0, %v3094_v35 }
  0x53   : > { %3018 = vmatmul.mubr.msk.bf16.gmra.mrb[32].mxu1 %vm638_vm0, %v3095_v36  ;;  %2957 = vmatprep.mubr.msk.bf16.mxu0 %vm638_vm0, %v3096_v37 }
  0x54   : > { %3021 = vmatprep.mubr.msk.bf16.mxu1 %vm638_vm0, %v3097_v38 }
  0x5a   : > { %2958 = vmatmul.mubr.msk.bf16.gmra.mrb[36].mxu0 %vm638_vm0, %v3098_v39 }
  0x5b   : > { %3022 = vmatmul.mubr.msk.bf16.gmra.mrb[36].mxu1 %vm638_vm0, %v3099_v40  ;;  %2961 = vmatprep.mubr.msk.bf16.mxu0 %vm638_vm0, %v3100_v41 }
  0x5c   : > { %3025 = vmatprep.mubr.msk.bf16.mxu1 %vm638_vm0, %v3101_v42 }
  0x62   : > { %2962 = vmatmul.mubr.msk.bf16.gmra.mrb[40].mxu0 %vm638_vm0, %v3102_v43 }
  0x63   : > { %3026 = vmatmul.mubr.msk.bf16.gmra.mrb[40].mxu1 %vm638_vm0, %v3103_v44  ;;  %2965 = vmatprep.mubr.msk.bf16.mxu0 %vm638_vm0, %v3104_v45 }
  0x64   : > { %3029 = vmatprep.mubr.msk.bf16.mxu1 %vm638_vm0, %v3105_v46 }
  0x6a   : > { %2966 = vmatmul.mubr.msk.bf16.gmra.mrb[44].mxu0 %vm638_vm0, %v3106_v47 }
  0x6b   : > { %3030 = vmatmul.mubr.msk.bf16.gmra.mrb[44].mxu1 %vm638_vm0, %v3107_v48  ;;  %2969 = vmatprep.mubr.msk.bf16.mxu0 %vm638_vm0, %v3108_v49 }
  0x6c   : > { %3033 = vmatprep.mubr.msk.bf16.mxu1 %vm638_vm0, %v3109_v50 }
  0x72   : > { %2970 = vmatmul.mubr.msk.bf16.gmra.mrb[48].mxu0 %vm638_vm0, %v3110_v51 }
  0x73   : > { %3034 = vmatmul.mubr.msk.bf16.gmra.mrb[48].mxu1 %vm638_vm0, %v3111_v52  ;;  %2973 = vmatprep.mubr.msk.bf16.mxu0 %vm638_vm0, %v3112_v53 }
  0x74   : > { %3037 = vmatprep.mubr.msk.bf16.mxu1 %vm638_vm0, %v3113_v54 }
  0x7a   : > { %2974 = vmatmul.mubr.msk.bf16.gmra.mrb[52].mxu0 %vm638_vm0, %v3114_v55 }
  0x7b   : > { %3038 = vmatmul.mubr.msk.bf16.gmra.mrb[52].mxu1 %vm638_vm0, %v3115_v56  ;;  %2977 = vmatprep.mubr.msk.bf16.mxu0 %vm638_vm0, %v3116_v57 }
  0x7c   : > { %3041 = vmatprep.mubr.msk.bf16.mxu1 %vm638_vm0, %v3117_v58 }
  0x82   : > { %2978 = vmatmul.mubr.msk.bf16.gmra.mrb[56].mxu0 %vm638_vm0, %v3118_v59 }
  0x83   : > { %3042 = vmatmul.mubr.msk.bf16.gmra.mrb[56].mxu1 %vm638_vm0, %v3119_v60  ;;  %2981 = vmatprep.mubr.msk.bf16.mxu0 %vm638_vm0, %v3120_v61 }
  0x84   : > { %3045 = vmatprep.mubr.msk.bf16.mxu1 %vm638_vm0, %v3121_v62 }
  0x8a   : > { %2982 = vmatmul.mubr.msk.bf16.gmra.mrb[60].mxu0 %vm638_vm0, %v3122_v63 }
  0x8b   : > { %3046 = vmatmul.mubr.msk.bf16.gmra.mrb[60].mxu1 %vm638_vm0, %v3123_v0 }
  0xe5   : > { %v2923_v2 = vpop.f32.mrb[0].mxu0 }
  0xe6   : > { %v874_v3 = vadd.f32 %v2923_v2, %v3305_v1  ;;  %v2987_v4 = vpop.f32.mrb[0].mxu1  ;;  %v865_v5 = vpop.f32.mrb[1].mxu0 }
  0xe7   : > { %v1130_v6 = vadd.f32 %v2987_v4, %v3305_v1  ;;  %v866_v7 = vadd.f32 %v3305_v1, %v865_v5  ;;  %v1121_v8 = vpop.f32.mrb[1].mxu1  ;;  %v2924_v9 = vpop.f32.mrb[2].mxu0 }
  0xe8   : > { %vm1378_vm2 = vcmp.ge.f32.partialorder %v874_v3, 0.0  ;;  %v1506_v10 = vmul.f32 0.1, %v874_v3  ;;  %v1122_v11 = vadd.f32 %v3305_v1, %v1121_v8  ;;  %v877_v12 = vadd.f32 %v2924_v9, %v3305_v1  ;;  %v2988_v13 = vpop.f32.mrb[2].mxu1  ;;  %v868_v14 = vpop.f32.mrb[3].mxu0 }
  0xe9   : > { %vm1442_vm3 = vcmp.ge.f32.partialorder %v1130_v6, 0.0  ;;  %v1570_v15 = vmul.f32 0.1, %v1130_v6  ;;  %vm1376_vm4 = vcmp.ge.f32.partialorder %v866_v7, 0.0  ;;  %v1504_v16 = vmul.f32 0.1, %v866_v7 }
  0xea   : > { %v1634_v17 = vsel %vm1378_vm2, %v874_v3, %v1506_v10  ;;  %vm1440_vm5 = vcmp.ge.f32.partialorder %v1122_v11, 0.0  ;;  %v1568_v18 = vmul.f32 0.1, %v1122_v11  ;;  %vm1379_vm6 = vcmp.ge.f32.partialorder %v877_v12, 0.0  ;;  %v1124_v19 = vpop.f32.mrb[3].mxu1 }
  0xeb   : > { %v2728_v20 = vpack.c.bf16 %v1634_v17, %v1634_v17  ;;  %v1698_v21 = vsel %vm1442_vm3, %v1130_v6, %v1570_v15  ;;  %v1632_v22 = vsel %vm1376_vm4, %v866_v7, %v1504_v16  ;;  %v1507_v23 = vmul.f32 0.1, %v877_v12 }
  0xec   : > { %v2792_v24 = vpack.c.bf16 %v1698_v21, %v1698_v21  ;;  %v2726_v25 = vpack.c.bf16 %v1632_v22, %v1632_v22  ;;  %v1696_v26 = vsel %vm1440_vm5, %v1122_v11, %v1568_v18  ;;  %v1133_v27 = vadd.f32 %v2988_v13, %v3305_v1 }
  0xed   : > { %2275 = vst.msk [vmem:[%s3317_s25 + $0x8] sm:$0xf] %vm2272_vm1, %v2728_v20  ;;  %v2790_v28 = vpack.c.bf16 %v1696_v26, %v1696_v26  ;;  %v1635_v29 = vsel %vm1379_vm6, %v877_v12, %v1507_v23  ;;  %v869_v30 = vadd.f32 %v3305_v1, %v868_v14  ;;  %v1125_v31 = vadd.f32 %v3305_v1, %v1124_v19  ;;  %v2927_v32 = vpop.f32.mrb[4].mxu0 }
  0xee   : > { %2339 = vst.msk [vmem:[%s3317_s25 + $0x108] sm:$0xf] %vm2272_vm1, %v2792_v24  ;;  %2273 = vst.msk [vmem:[%s3317_s25] sm:$0xf] %vm2272_vm1, %v2726_v25  ;;  %v2729_v33 = vpack.c.bf16 %v1635_v29, %v1635_v29  ;;  %vm1443_vm7 = vcmp.ge.f32.partialorder %v1133_v27, 0.0  ;;  %v890_v35 = vadd.f32 %v2927_v32, %v3305_v1  ;;  %v2991_v36 = vpop.f32.mrb[4].mxu1 }
  0xef   : > { %v1571_v34 = vmul.f32 0.1, %v1133_v27  ;;  %v881_v37 = vpop.f32.mrb[5].mxu0  ;;  %2337 = vst.msk [vmem:[%s3317_s25 + $0x100] sm:$0xf] %vm2272_vm1, %v2790_v28  ;;  %vm1377_vm8 = vcmp.ge.f32.partialorder %v869_v30, 0.0  ;;  %v1146_v42 = vadd.f32 %v2991_v36, %v3305_v1 }
  0xf0   : > { %v1505_v38 = vmul.f32 0.1, %v869_v30  ;;  %vm1441_vm9 = vcmp.ge.f32.partialorder %v1125_v31, 0.0  ;;  %v1569_v39 = vmul.f32 0.1, %v1125_v31  ;;  %vm1382_vm10 = vcmp.ge.f32.partialorder %v890_v35, 0.0 }
  0xf1   : > { %2276 = vst.msk [vmem:[%s3317_s25 + $0xc] sm:$0xf] %vm2272_vm1, %v2729_v33  ;;  %v1699_v40 = vsel %vm1443_vm7, %v1133_v27, %v1571_v34  ;;  %v1510_v41 = vmul.f32 0.1, %v890_v35  ;;  %v1137_v43 = vpop.f32.mrb[5].mxu1  ;;  %v2928_v44 = vpop.f32.mrb[6].mxu0  ;;  %v882_v48 = vadd.f32 %v3305_v1, %v881_v37 }
  0xf2   : > { %v2793_v45 = vpack.c.bf16 %v1699_v40, %v1699_v40  ;;  %v1633_v46 = vsel %vm1377_vm8, %v869_v30, %v1505_v38  ;;  %v1697_v47 = vsel %vm1441_vm9, %v1125_v31, %v1569_v39  ;;  %v2992_v49 = vpop.f32.mrb[6].mxu1  ;;  %v884_v50 = vpop.f32.mrb[7].mxu0  ;;  %vm1446_vm11 = vcmp.ge.f32.partialorder %v1146_v42, 0.0 }
  0xf3   : > { %v2727_v51 = vpack.c.bf16 %v1633_v46, %v1633_v46  ;;  %v2791_v52 = vpack.c.bf16 %v1697_v47, %v1697_v47  ;;  %v1638_v53 = vsel %vm1382_vm10, %v890_v35, %v1510_v41  ;;  %v1140_v54 = vpop.f32.mrb[7].mxu1  ;;  %v1574_v56 = vmul.f32 0.1, %v1146_v42 }
  0xf4   : > { %2340 = vst.msk [vmem:[%s3317_s25 + $0x10c] sm:$0xf] %vm2272_vm1, %v2793_v45  ;;  %v2732_v55 = vpack.c.bf16 %v1638_v53, %v1638_v53  ;;  %vm1380_vm12 = vcmp.ge.f32.partialorder %v882_v48, 0.0  ;;  %v1508_v57 = vmul.f32 0.1, %v882_v48  ;;  %v1138_v58 = vadd.f32 %v3305_v1, %v1137_v43 }
  0xf5   : > { %2274 = vst.msk [vmem:[%s3317_s25 + $0x4] sm:$0xf] %vm2272_vm1, %v2727_v51  ;;  %2338 = vst.msk [vmem:[%s3317_s25 + $0x104] sm:$0xf] %vm2272_vm1, %v2791_v52  ;;  %v893_v59 = vadd.f32 %v2928_v44, %v3305_v1  ;;  %v1149_v60 = vadd.f32 %v2992_v49, %v3305_v1  ;;  %v885_v61 = vadd.f32 %v3305_v1, %v884_v50  ;;  %v2931_v2 = vpop.f32.mrb[8].mxu0 }
  0xf6   : > { %2279 = vst.msk [vmem:[%s3317_s25 + $0x18] sm:$0xf] %vm2272_vm1, %v2732_v55  ;;  %v1702_v62 = vsel %vm1446_vm11, %v1146_v42, %v1574_v56  ;;  %v1636_v63 = vsel %vm1380_vm12, %v882_v48, %v1508_v57  ;;  %v1141_v0 = vadd.f32 %v3305_v1, %v1140_v54  ;;  %vm1444_vm13 = vcmp.ge.f32.partialorder %v1138_v58, 0.0  ;;  %v2995_v6 = vpop.f32.mrb[8].mxu1  ;;  %v897_v7 = vpop.f32.mrb[9].mxu0 }
  0xf7   : > { %v2796_v3 = vpack.c.bf16 %v1702_v62, %v1702_v62  ;;  %v2730_v4 = vpack.c.bf16 %v1636_v63, %v1636_v63  ;;  %v1572_v5 = vmul.f32 0.1, %v1138_v58  ;;  %vm1383_vm14 = vcmp.ge.f32.partialorder %v893_v59, 0.0  ;;  %v1153_v12 = vpop.f32.mrb[9].mxu1  ;;  %v2932_v13 = vpop.f32.mrb[10].mxu0 }
  0xf8   : > { %v1511_v8 = vmul.f32 0.1, %v893_v59  ;;  %vm1447_vm15 = vcmp.ge.f32.partialorder %v1149_v60, 0.0  ;;  %v1575_v9 = vmul.f32 0.1, %v1149_v60  ;;  %vm1381_vm0 = vcmp.ge.f32.partialorder %v885_v61, 0.0 }
  0xf9   : > { %2343 = vst.msk [vmem:[%s3317_s25 + $0x118] sm:$0xf] %vm2272_vm1, %v2796_v3  ;;  %2277 = vst.msk [vmem:[%s3317_s25 + $0x10] sm:$0xf] %vm2272_vm1, %v2730_v4  ;;  %v1700_v10 = vsel %vm1444_vm13, %v1138_v58, %v1572_v5  ;;  %v1509_v11 = vmul.f32 0.1, %v885_v61  ;;  %v906_v23 = vadd.f32 %v2931_v2, %v3305_v1  ;;  %v1162_v27 = vadd.f32 %v2995_v6, %v3305_v1 }
  0xfa   : > { %vm1445_vm2 = vcmp.ge.f32.partialorder %v1141_v0, 0.0  ;;  %v2794_v14 = vpack.c.bf16 %v1700_v10, %v1700_v10  ;;  %v1639_v15 = vsel %vm1383_vm14, %v893_v59, %v1511_v8  ;;  %v1703_v16 = vsel %vm1447_vm15, %v1149_v60, %v1575_v9  ;;  %v2996_v18 = vpop.f32.mrb[10].mxu1  ;;  %v900_v19 = vpop.f32.mrb[11].mxu0 }
  0xfb   : > { %v1573_v17 = vmul.f32 0.1, %v1141_v0  ;;  %v2733_v20 = vpack.c.bf16 %v1639_v15, %v1639_v15  ;;  %v2797_v21 = vpack.c.bf16 %v1703_v16, %v1703_v16  ;;  %v1637_v22 = vsel %vm1381_vm0, %v885_v61, %v1509_v11  ;;  %v1156_v24 = vpop.f32.mrb[11].mxu1 }
  0xfc   : > { %2341 = vst.msk [vmem:[%s3317_s25 + $0x110] sm:$0xf] %vm2272_vm1, %v2794_v14  ;;  %v2731_v25 = vpack.c.bf16 %v1637_v22, %v1637_v22  ;;  %v898_v28 = vadd.f32 %v3305_v1, %v897_v7  ;;  %vm1386_vm3 = vcmp.ge.f32.partialorder %v906_v23, 0.0  ;;  %v1514_v30 = vmul.f32 0.1, %v906_v23 }
  0xfd   : > { %v1701_v26 = vsel %vm1445_vm2, %v1141_v0, %v1573_v17  ;;  %2280 = vst.msk [vmem:[%s3317_s25 + $0x1c] sm:$0xf] %vm2272_vm1, %v2733_v20  ;;  %2344 = vst.msk [vmem:[%s3317_s25 + $0x11c] sm:$0xf] %vm2272_vm1, %v2797_v21  ;;  %v1154_v31 = vadd.f32 %v3305_v1, %v1153_v12  ;;  %vm1450_vm4 = vcmp.ge.f32.partialorder %v1162_v27, 0.0  ;;  %v909_v36 = vadd.f32 %v2932_v13, %v3305_v1  ;;  %v2935_v37 = vpop.f32.mrb[12].mxu0 }
  0xfe   : > { %v2795_v29 = vpack.c.bf16 %v1701_v26, %v1701_v26  ;;  %2278 = vst.msk [vmem:[%s3317_s25 + $0x14] sm:$0xf] %vm2272_vm1, %v2731_v25  ;;  %v1578_v32 = vmul.f32 0.1, %v1162_v27  ;;  %vm1384_vm5 = vcmp.ge.f32.partialorder %v898_v28, 0.0  ;;  %v1642_v34 = vsel %vm1386_vm3, %v906_v23, %v1514_v30  ;;  %v2999_v38 = vpop.f32.mrb[12].mxu1 }
  0xff   : > { %v1512_v33 = vmul.f32 0.1, %v898_v28  ;;  %vm1448_vm6 = vcmp.ge.f32.partialorder %v1154_v31, 0.0  ;;  %v1576_v35 = vmul.f32 0.1, %v1154_v31  ;;  %v2736_v39 = vpack.c.bf16 %v1642_v34, %v1642_v34  ;;  %v913_v43 = vpop.f32.mrb[13].mxu0 }
 0x100   : > { %2342 = vst.msk [vmem:[%s3317_s25 + $0x114] sm:$0xf] %vm2272_vm1, %v2795_v29  ;;  %v1706_v40 = vsel %vm1450_vm4, %v1162_v27, %v1578_v32  ;;  %v1165_v42 = vadd.f32 %v2996_v18, %v3305_v1  ;;  %v1169_v44 = vpop.f32.mrb[13].mxu1  ;;  %vm1387_vm7 = vcmp.ge.f32.partialorder %v909_v36, 0.0  ;;  %v2936_v48 = vpop.f32.mrb[14].mxu0  ;;  %v901_v54 = vadd.f32 %v3305_v1, %v900_v19 }
 0x101   : > { %v1640_v41 = vsel %vm1384_vm5, %v898_v28, %v1512_v33  ;;  %v2800_v45 = vpack.c.bf16 %v1706_v40, %v1706_v40  ;;  %v1704_v47 = vsel %vm1448_vm6, %v1154_v31, %v1576_v35  ;;  %v3000_v49 = vpop.f32.mrb[14].mxu1  ;;  %2283 = vst.msk [vmem:[%s3317_s25 + $0x28] sm:$0xf] %vm2272_vm1, %v2736_v39  ;;  %v1515_v51 = vmul.f32 0.1, %v909_v36  ;;  %v916_v53 = vpop.f32.mrb[15].mxu0 }
 0x102   : > { %v2734_v46 = vpack.c.bf16 %v1640_v41, %v1640_v41  ;;  %v2798_v50 = vpack.c.bf16 %v1704_v47, %v1704_v47  ;;  %vm1451_vm8 = vcmp.ge.f32.partialorder %v1165_v42, 0.0  ;;  %v1579_v52 = vmul.f32 0.1, %v1165_v42  ;;  %v1172_v58 = vpop.f32.mrb[15].mxu1 }
 0x103   : > { %2347 = vst.msk [vmem:[%s3317_s25 + $0x128] sm:$0xf] %vm2272_vm1, %v2800_v45  ;;  %v1157_v55 = vadd.f32 %v3305_v1, %v1156_v24  ;;  %v922_v56 = vadd.f32 %v2935_v37, %v3305_v1  ;;  %v1178_v57 = vadd.f32 %v2999_v38, %v3305_v1  ;;  %v1643_v59 = vsel %vm1387_vm7, %v909_v36, %v1515_v51 }
 0x104   : > { %2281 = vst.msk [vmem:[%s3317_s25 + $0x20] sm:$0xf] %vm2272_vm1, %v2734_v46  ;;  %2345 = vst.msk [vmem:[%s3317_s25 + $0x120] sm:$0xf] %vm2272_vm1, %v2798_v50  ;;  %v1707_v60 = vsel %vm1451_vm8, %v1165_v42, %v1579_v52  ;;  %v914_v61 = vadd.f32 %v3305_v1, %v913_v43  ;;  %v1170_v62 = vadd.f32 %v3305_v1, %v1169_v44  ;;  %vm1385_vm9 = vcmp.ge.f32.partialorder %v901_v54, 0.0 }
 0x105   : > { %v2737_v63 = vpack.c.bf16 %v1643_v59, %v1643_v59  ;;  %v2801_v0 = vpack.c.bf16 %v1707_v60, %v1707_v60  ;;  %v1513_v2 = vmul.f32 0.1, %v901_v54  ;;  %vm1449_vm10 = vcmp.ge.f32.partialorder %v1157_v55, 0.0  ;;  %v2939_v7 = vpop.f32.mrb[16].mxu0 }
 0x106   : > { %v1577_v3 = vmul.f32 0.1, %v1157_v55  ;;  %vm1390_vm11 = vcmp.ge.f32.partialorder %v922_v56, 0.0  ;;  %v1518_v4 = vmul.f32 0.1, %v922_v56  ;;  %vm1454_vm12 = vcmp.ge.f32.partialorder %v1178_v57, 0.0 }
 0x107   : > { %2284 = vst.msk [vmem:[%s3317_s25 + $0x2c] sm:$0xf] %vm2272_vm1, %v2737_v63  ;;  %2348 = vst.msk [vmem:[%s3317_s25 + $0x12c] sm:$0xf] %vm2272_vm1, %v2801_v0  ;;  %v1641_v5 = vsel %vm1385_vm9, %v901_v54, %v1513_v2  ;;  %v1582_v6 = vmul.f32 0.1, %v1178_v57  ;;  %v925_v23 = vadd.f32 %v2936_v48, %v3305_v1  ;;  %v1181_v27 = vadd.f32 %v3000_v49, %v3305_v1 }
 0x108   : > { %vm1388_vm13 = vcmp.ge.f32.partialorder %v914_v61, 0.0  ;;  %v3003_v8 = vpop.f32.mrb[16].mxu1  ;;  %v2735_v9 = vpack.c.bf16 %v1641_v5, %v1641_v5  ;;  %v1705_v10 = vsel %vm1449_vm10, %v1157_v55, %v1577_v3  ;;  %v1646_v11 = vsel %vm1390_vm11, %v922_v56, %v1518_v4  ;;  %v929_v13 = vpop.f32.mrb[17].mxu0 }
 0x109   : > { %v1516_v12 = vmul.f32 0.1, %v914_v61  ;;  %v1185_v14 = vpop.f32.mrb[17].mxu1  ;;  %v2799_v15 = vpack.c.bf16 %v1705_v10, %v1705_v10  ;;  %v2740_v16 = vpack.c.bf16 %v1646_v11, %v1646_v11  ;;  %v1710_v17 = vsel %vm1454_vm12, %v1178_v57, %v1582_v6  ;;  %v2940_v18 = vpop.f32.mrb[18].mxu0 }
 0x10a   : > { %vm1452_vm14 = vcmp.ge.f32.partialorder %v1170_v62, 0.0  ;;  %v3004_v19 = vpop.f32.mrb[18].mxu1  ;;  %2282 = vst.msk [vmem:[%s3317_s25 + $0x24] sm:$0xf] %vm2272_vm1, %v2735_v9  ;;  %v2804_v20 = vpack.c.bf16 %v1710_v17, %v1710_v17  ;;  %v1580_v22 = vmul.f32 0.1, %v1170_v62  ;;  %v917_v28 = vadd.f32 %v3305_v1, %v916_v53 }
 0x10b   : > { %v1644_v21 = vsel %vm1388_vm13, %v914_v61, %v1516_v12  ;;  %v932_v24 = vpop.f32.mrb[19].mxu0  ;;  %v3392_v25 = vpop.f32.mrb[19].mxu1  ;;  %2346 = vst.msk [vmem:[%s3317_s25 + $0x124] sm:$0xf] %vm2272_vm1, %v2799_v15  ;;  %2287 = vst.msk [vmem:[%s3317_s25 + $0x38] sm:$0xf] %vm2272_vm1, %v2740_v16  ;;  %v1173_v29 = vadd.f32 %v3305_v1, %v1172_v58  ;;  %v938_v32 = vadd.f32 %v2939_v7, %v3305_v1 }
 0x10c   : > { %v2738_v26 = vpack.c.bf16 %v1644_v21, %v1644_v21  ;;  %2351 = vst.msk [vmem:[%s3317_s25 + $0x138] sm:$0xf] %vm2272_vm1, %v2804_v20  ;;  %v1708_v30 = vsel %vm1452_vm14, %v1170_v62, %v1580_v22  ;;  %vm1391_vm15 = vcmp.ge.f32.partialorder %v925_v23, 0.0  ;;  %v1519_v31 = vmul.f32 0.1, %v925_v23 }
 0x10d   : > { %v2802_v33 = vpack.c.bf16 %v1708_v30, %v1708_v30  ;;  %vm1455_vm0 = vcmp.ge.f32.partialorder %v1181_v27, 0.0  ;;  %v1583_v34 = vmul.f32 0.1, %v1181_v27  ;;  %vm1389_vm2 = vcmp.ge.f32.partialorder %v917_v28, 0.0  ;;  %v2943_v38 = vpop.f32.mrb[20].mxu0 }
 0x10e   : > { %2285 = vst.msk [vmem:[%s3317_s25 + $0x30] sm:$0xf] %vm2272_vm1, %v2738_v26  ;;  %v1647_v35 = vsel %vm1391_vm15, %v925_v23, %v1519_v31  ;;  %v1517_v36 = vmul.f32 0.1, %v917_v28  ;;  %vm1453_vm3 = vcmp.ge.f32.partialorder %v1173_v29, 0.0  ;;  %vm1394_vm4 = vcmp.ge.f32.partialorder %v938_v32, 0.0 }
 0x10f   : > { %v1581_v37 = vmul.f32 0.1, %v1173_v29  ;;  %2349 = vst.msk [vmem:[%s3317_s25 + $0x130] sm:$0xf] %vm2272_vm1, %v2802_v33  ;;  %v2741_v39 = vpack.c.bf16 %v1647_v35, %v1647_v35  ;;  %v1711_v40 = vsel %vm1455_vm0, %v1181_v27, %v1583_v34  ;;  %v1522_v41 = vmul.f32 0.1, %v938_v32 }
 0x110   : > { %v3007_v42 = vpop.f32.mrb[20].mxu1  ;;  %v945_v43 = vpop.f32.mrb[21].mxu0  ;;  %v2805_v44 = vpack.c.bf16 %v1711_v40, %v1711_v40  ;;  %v1645_v45 = vsel %vm1389_vm2, %v917_v28, %v1517_v36  ;;  %v1194_v47 = vadd.f32 %v3003_v8, %v3305_v1  ;;  %v930_v53 = vadd.f32 %v3305_v1, %v929_v13 }
 0x111   : > { %v1709_v46 = vsel %vm1453_vm3, %v1173_v29, %v1581_v37  ;;  %v3410_v48 = vpop.f32.mrb[21].mxu1  ;;  %v3412_v49 = vpop.f32.mrb[22].mxu0  ;;  %2288 = vst.msk [vmem:[%s3317_s25 + $0x3c] sm:$0xf] %vm2272_vm1, %v2741_v39  ;;  %v2739_v50 = vpack.c.bf16 %v1645_v45, %v1645_v45  ;;  %v1650_v52 = vsel %vm1394_vm4, %v938_v32, %v1522_v41  ;;  %v1186_v58 = vadd.f32 %v3305_v1, %v1185_v14 }
 0x112   : > { %v2803_v51 = vpack.c.bf16 %v1709_v46, %v1709_v46  ;;  %v3417_v54 = vpop.f32.mrb[22].mxu1  ;;  %v3419_v55 = vpop.f32.mrb[23].mxu0  ;;  %2352 = vst.msk [vmem:[%s3317_s25 + $0x13c] sm:$0xf] %vm2272_vm1, %v2805_v44  ;;  %v2744_v56 = vpack.c.bf16 %v1650_v52, %v1650_v52  ;;  %vm1458_vm5 = vcmp.ge.f32.partialorder %v1194_v47, 0.0  ;;  %vm1392_vm6 = vcmp.ge.f32.partialorder %v930_v53, 0.0 }
 0x113   : > { %v1586_v57 = vmul.f32 0.1, %v1194_v47  ;;  %v3424_v59 = vpop.f32.mrb[23].mxu1  ;;  %2286 = vst.msk [vmem:[%s3317_s25 + $0x34] sm:$0xf] %vm2272_vm1, %v2739_v50  ;;  %v941_v61 = vadd.f32 %v2940_v18, %v3305_v1  ;;  %v1197_v62 = vadd.f32 %v3004_v19, %v3305_v1  ;;  %vm1456_vm7 = vcmp.ge.f32.partialorder %v1186_v58, 0.0 }
 0x114   : > { %2350 = vst.msk [vmem:[%s3317_s25 + $0x134] sm:$0xf] %vm2272_vm1, %v2803_v51  ;;  %v1520_v60 = vmul.f32 0.1, %v930_v53  ;;  %2291 = vst.msk [vmem:[%s3317_s25 + $0x48] sm:$0xf] %vm2272_vm1, %v2744_v56  ;;  %v933_v2 = vadd.f32 %v3305_v1, %v932_v24  ;;  %v1189_v17 = vadd.f32 %v3305_v1, %v3392_v25  ;;  %v954_v18 = vadd.f32 %v2943_v38, %v3305_v1 }
 0x115   : > { %v1714_v63 = vsel %vm1458_vm5, %v1194_v47, %v1586_v57  ;;  %v1584_v0 = vmul.f32 0.1, %v1186_v58  ;;  %vm1395_vm8 = vcmp.ge.f32.partialorder %v941_v61, 0.0  ;;  %v1523_v5 = vmul.f32 0.1, %v941_v61  ;;  %v3435_v9 = vpop.f32.mrb[24].mxu0 }
 0x116   : > { %v2808_v3 = vpack.c.bf16 %v1714_v63, %v1714_v63  ;;  %v1648_v4 = vsel %vm1392_vm6, %v930_v53, %v1520_v60  ;;  %vm1459_vm9 = vcmp.ge.f32.partialorder %v1197_v62, 0.0  ;;  %v1587_v8 = vmul.f32 0.1, %v1197_v62  ;;  %v3011_v13 = vpop.f32.mrb[24].mxu1  ;;  %v3439_v14 = vpop.f32.mrb[25].mxu0 }
 0x117   : > { %v2742_v6 = vpack.c.bf16 %v1648_v4, %v1648_v4  ;;  %v1712_v7 = vsel %vm1456_vm7, %v1186_v58, %v1584_v0  ;;  %v1651_v11 = vsel %vm1395_vm8, %v941_v61, %v1523_v5  ;;  %vm1393_vm10 = vcmp.ge.f32.partialorder %v933_v2, 0.0  ;;  %v3446_v19 = vpop.f32.mrb[25].mxu1  ;;  %v3448_v20 = vpop.f32.mrb[26].mxu0 }
 0x118   : > { %2355 = vst.msk [vmem:[%s3317_s25 + $0x148] sm:$0xf] %vm2272_vm1, %v2808_v3  ;;  %v2806_v10 = vpack.c.bf16 %v1712_v7, %v1712_v7  ;;  %v1521_v12 = vmul.f32 0.1, %v933_v2  ;;  %v2745_v15 = vpack.c.bf16 %v1651_v11, %v1651_v11  ;;  %v1715_v16 = vsel %vm1459_vm9, %v1197_v62, %v1587_v8  ;;  %v3454_v26 = vpop.f32.mrb[26].mxu1  ;;  %v3456_v27 = vpop.f32.mrb[27].mxu0 }
 0x119   : > { %2289 = vst.msk [vmem:[%s3317_s25 + $0x40] sm:$0xf] %vm2272_vm1, %v2742_v6  ;;  %v2809_v21 = vpack.c.bf16 %v1715_v16, %v1715_v16  ;;  %v1210_v23 = vadd.f32 %v3007_v42, %v3305_v1  ;;  %v946_v24 = vadd.f32 %v3305_v1, %v945_v43  ;;  %vm1457_vm11 = vcmp.ge.f32.partialorder %v1189_v17, 0.0  ;;  %v3460_v29 = vpop.f32.mrb[27].mxu1 }
 0x11a   : > { %2353 = vst.msk [vmem:[%s3317_s25 + $0x140] sm:$0xf] %vm2272_vm1, %v2806_v10  ;;  %v1649_v22 = vsel %vm1393_vm10, %v933_v2, %v1521_v12  ;;  %2292 = vst.msk [vmem:[%s3317_s25 + $0x4c] sm:$0xf] %vm2272_vm1, %v2745_v15  ;;  %v1585_v28 = vmul.f32 0.1, %v1189_v17  ;;  %v1202_v34 = vadd.f32 %v3305_v1, %v3410_v48  ;;  %v957_v35 = vadd.f32 %v3412_v49, %v3305_v1 }
 0x11b   : > { %v2743_v25 = vpack.c.bf16 %v1649_v22, %v1649_v22  ;;  %vm1398_vm12 = vcmp.ge.f32.partialorder %v954_v18, 0.0  ;;  %2356 = vst.msk [vmem:[%s3317_s25 + $0x14c] sm:$0xf] %vm2272_vm1, %v2809_v21  ;;  %v1526_v30 = vmul.f32 0.1, %v954_v18  ;;  %vm1462_vm13 = vcmp.ge.f32.partialorder %v1210_v23, 0.0 }
 0x11c   : > { %v1590_v31 = vmul.f32 0.1, %v1210_v23  ;;  %vm1396_vm14 = vcmp.ge.f32.partialorder %v946_v24, 0.0  ;;  %v1713_v32 = vsel %vm1457_vm11, %v1189_v17, %v1585_v28  ;;  %v1524_v33 = vmul.f32 0.1, %v946_v24 }
 0x11d   : > { %2290 = vst.msk [vmem:[%s3317_s25 + $0x44] sm:$0xf] %vm2272_vm1, %v2743_v25  ;;  %v2807_v36 = vpack.c.bf16 %v1713_v32, %v1713_v32  ;;  %v1654_v37 = vsel %vm1398_vm12, %v954_v18, %v1526_v30  ;;  %v1213_v39 = vadd.f32 %v3417_v54, %v3305_v1  ;;  %vm1460_vm15 = vcmp.ge.f32.partialorder %v1202_v34, 0.0  ;;  %v3472_v43 = vpop.f32.mrb[28].mxu0 }
 0x11e   : > { %v1718_v38 = vsel %vm1462_vm13, %v1210_v23, %v1590_v31  ;;  %v2748_v40 = vpack.c.bf16 %v1654_v37, %v1654_v37  ;;  %v1652_v42 = vsel %vm1396_vm14, %v946_v24, %v1524_v33  ;;  %v1588_v45 = vmul.f32 0.1, %v1202_v34  ;;  %v3476_v47 = vpop.f32.mrb[28].mxu1  ;;  %v3486_v51 = vpop.f32.mrb[29].mxu0 }
 0x11f   : > { %v2812_v41 = vpack.c.bf16 %v1718_v38, %v1718_v38  ;;  %2354 = vst.msk [vmem:[%s3317_s25 + $0x144] sm:$0xf] %vm2272_vm1, %v2807_v36  ;;  %v2746_v44 = vpack.c.bf16 %v1652_v42, %v1652_v42  ;;  %vm1399_vm0 = vcmp.ge.f32.partialorder %v957_v35, 0.0  ;;  %v1527_v46 = vmul.f32 0.1, %v957_v35  ;;  %v3488_v52 = vpop.f32.mrb[29].mxu1 }
 0x120   : > { %2295 = vst.msk [vmem:[%s3317_s25 + $0x58] sm:$0xf] %vm2272_vm1, %v2748_v40  ;;  %vm1463_vm2 = vcmp.ge.f32.partialorder %v1213_v39, 0.0  ;;  %v1591_v48 = vmul.f32 0.1, %v1213_v39  ;;  %v949_v49 = vadd.f32 %v3305_v1, %v3419_v55  ;;  %v1205_v50 = vadd.f32 %v3305_v1, %v3424_v59  ;;  %v3496_v55 = vpop.f32.mrb[30].mxu0 }
 0x121   : > { %2359 = vst.msk [vmem:[%s3317_s25 + $0x158] sm:$0xf] %vm2272_vm1, %v2812_v41  ;;  %2293 = vst.msk [vmem:[%s3317_s25 + $0x50] sm:$0xf] %vm2272_vm1, %v2746_v44  ;;  %v1716_v53 = vsel %vm1460_vm15, %v1202_v34, %v1588_v45  ;;  %v1655_v54 = vsel %vm1399_vm0, %v957_v35, %v1527_v46  ;;  %v970_v56 = vadd.f32 %v3435_v9, %v3305_v1  ;;  %v3498_v58 = vpop.f32.mrb[30].mxu1  ;;  %v3500_v62 = vpop.f32.mrb[31].mxu0 }
 0x122   : > { %v1226_v57 = vadd.f32 %v3011_v13, %v3305_v1  ;;  %v2810_v59 = vpack.c.bf16 %v1716_v53, %v1716_v53  ;;  %v2749_v60 = vpack.c.bf16 %v1655_v54, %v1655_v54  ;;  %v1719_v61 = vsel %vm1463_vm2, %v1213_v39, %v1591_v48  ;;  %v3502_v63 = vpop.f32.mrb[31].mxu1 }
 0x123   : > { %vm1397_vm3 = vcmp.ge.f32.partialorder %v949_v49, 0.0  ;;  %v2813_v0 = vpack.c.bf16 %v1719_v61, %v1719_v61  ;;  %v1525_v2 = vmul.f32 0.1, %v949_v49  ;;  %vm1461_vm4 = vcmp.ge.f32.partialorder %v1205_v50, 0.0 }
 0x124   : > { %v1589_v3 = vmul.f32 0.1, %v1205_v50  ;;  %2357 = vst.msk [vmem:[%s3317_s25 + $0x150] sm:$0xf] %vm2272_vm1, %v2810_v59  ;;  %2296 = vst.msk [vmem:[%s3317_s25 + $0x5c] sm:$0xf] %vm2272_vm1, %v2749_v60  ;;  %v962_v8 = vadd.f32 %v3305_v1, %v3439_v14  ;;  %v1218_v9 = vadd.f32 %v3305_v1, %v3446_v19  ;;  %v973_v19 = vadd.f32 %v3448_v20, %v3305_v1 }
 0x125   : > { %vm1402_vm5 = vcmp.ge.f32.partialorder %v970_v56, 0.0  ;;  %v1530_v4 = vmul.f32 0.1, %v970_v56  ;;  %vm1466_vm6 = vcmp.ge.f32.partialorder %v1226_v57, 0.0  ;;  %v1594_v5 = vmul.f32 0.1, %v1226_v57 }
 0x126   : > { %2360 = vst.msk [vmem:[%s3317_s25 + $0x15c] sm:$0xf] %vm2272_vm1, %v2813_v0  ;;  %v1653_v6 = vsel %vm1397_vm3, %v949_v49, %v1525_v2  ;;  %v1717_v7 = vsel %vm1461_vm4, %v1205_v50, %v1589_v3  ;;  %v3514_v15 = vpop.f32.mrb[32].mxu0  ;;  %vm1400_vm7 = vcmp.ge.f32.partialorder %v962_v8, 0.0  ;;  %v1528_v18 = vmul.f32 0.1, %v962_v8 }
 0x127   : > { %v2747_v10 = vpack.c.bf16 %v1653_v6, %v1653_v6  ;;  %v2811_v11 = vpack.c.bf16 %v1717_v7, %v1717_v7  ;;  %v1658_v12 = vsel %vm1402_vm5, %v970_v56, %v1530_v4  ;;  %v1722_v13 = vsel %vm1466_vm6, %v1226_v57, %v1594_v5  ;;  %v3516_v21 = vpop.f32.mrb[32].mxu1  ;;  %v3518_v22 = vpop.f32.mrb[33].mxu0 }
 0x128   : > { %v2752_v16 = vpack.c.bf16 %v1658_v12, %v1658_v12  ;;  %v2816_v17 = vpack.c.bf16 %v1722_v13, %v1722_v13  ;;  %vm1464_vm8 = vcmp.ge.f32.partialorder %v1218_v9, 0.0  ;;  %v1592_v14 = vmul.f32 0.1, %v1218_v9  ;;  %v3528_v24 = vpop.f32.mrb[33].mxu1  ;;  %v3530_v25 = vpop.f32.mrb[34].mxu0 }
 0x129   : > { %2294 = vst.msk [vmem:[%s3317_s25 + $0x54] sm:$0xf] %vm2272_vm1, %v2747_v10  ;;  %2358 = vst.msk [vmem:[%s3317_s25 + $0x154] sm:$0xf] %vm2272_vm1, %v2811_v11  ;;  %v1229_v23 = vadd.f32 %v3454_v26, %v3305_v1  ;;  %v1656_v28 = vsel %vm1400_vm7, %v962_v8, %v1528_v18  ;;  %v965_v30 = vadd.f32 %v3305_v1, %v3456_v27  ;;  %v3542_v26 = vpop.f32.mrb[34].mxu1  ;;  %v3544_v32 = vpop.f32.mrb[35].mxu0 }
 0x12a   : > { %2299 = vst.msk [vmem:[%s3317_s25 + $0x68] sm:$0xf] %vm2272_vm1, %v2752_v16  ;;  %2363 = vst.msk [vmem:[%s3317_s25 + $0x168] sm:$0xf] %vm2272_vm1, %v2816_v17  ;;  %v1221_v31 = vadd.f32 %v3305_v1, %v3460_v29  ;;  %v986_v20 = vadd.f32 %v3472_v43, %v3305_v1  ;;  %v2750_v33 = vpack.c.bf16 %v1656_v28, %v1656_v28  ;;  %vm1403_vm9 = vcmp.ge.f32.partialorder %v973_v19, 0.0  ;;  %v3546_v36 = vpop.f32.mrb[35].mxu1 }
 0x12b   : > { %v1720_v34 = vsel %vm1464_vm8, %v1218_v9, %v1592_v14  ;;  %v1531_v35 = vmul.f32 0.1, %v973_v19  ;;  %vm1467_vm10 = vcmp.ge.f32.partialorder %v1229_v23, 0.0  ;;  %v1595_v27 = vmul.f32 0.1, %v1229_v23 }
 0x12c   : > { %v2814_v37 = vpack.c.bf16 %v1720_v34, %v1720_v34  ;;  %vm1401_vm11 = vcmp.ge.f32.partialorder %v965_v30, 0.0  ;;  %2297 = vst.msk [vmem:[%s3317_s25 + $0x60] sm:$0xf] %vm2272_vm1, %v2750_v33  ;;  %v1529_v38 = vmul.f32 0.1, %v965_v30  ;;  %vm1465_vm12 = vcmp.ge.f32.partialorder %v1221_v31, 0.0 }
 0x12d   : > { %v1659_v29 = vsel %vm1403_vm9, %v973_v19, %v1531_v35  ;;  %v1593_v39 = vmul.f32 0.1, %v1221_v31  ;;  %v1723_v41 = vsel %vm1467_vm10, %v1229_v23, %v1595_v27  ;;  %vm1406_vm13 = vcmp.ge.f32.partialorder %v986_v20, 0.0  ;;  %v3554_v48 = vpop.f32.mrb[36].mxu0 }
 0x12e   : > { %2361 = vst.msk [vmem:[%s3317_s25 + $0x160] sm:$0xf] %vm2272_vm1, %v2814_v37  ;;  %v2753_v40 = vpack.c.bf16 %v1659_v29, %v1659_v29  ;;  %v1534_v42 = vmul.f32 0.1, %v986_v20  ;;  %v2817_v43 = vpack.c.bf16 %v1723_v41, %v1723_v41  ;;  %v1657_v44 = vsel %vm1401_vm11, %v965_v30, %v1529_v38  ;;  %v3560_v56 = vpop.f32.mrb[36].mxu1  ;;  %v3562_v57 = vpop.f32.mrb[37].mxu0 }
 0x12f   : > { %v1721_v45 = vsel %vm1465_vm12, %v1221_v31, %v1593_v39  ;;  %v1242_v46 = vadd.f32 %v3476_v47, %v3305_v1  ;;  %v2751_v49 = vpack.c.bf16 %v1657_v44, %v1657_v44  ;;  %v978_v54 = vadd.f32 %v3305_v1, %v3486_v51  ;;  %v3568_v61 = vpop.f32.mrb[37].mxu1  ;;  %v3570_v0 = vpop.f32.mrb[38].mxu0 }
 0x130   : > { %2300 = vst.msk [vmem:[%s3317_s25 + $0x6c] sm:$0xf] %vm2272_vm1, %v2753_v40  ;;  %v2815_v50 = vpack.c.bf16 %v1721_v45, %v1721_v45  ;;  %v1662_v53 = vsel %vm1406_vm13, %v986_v20, %v1534_v42  ;;  %2364 = vst.msk [vmem:[%s3317_s25 + $0x16c] sm:$0xf] %vm2272_vm1, %v2817_v43  ;;  %v1234_v60 = vadd.f32 %v3305_v1, %v3488_v52  ;;  %v3580_v4 = vpop.f32.mrb[38].mxu1  ;;  %v3582_v52 = vpop.f32.mrb[39].mxu0 }
 0x131   : > { %v2756_v47 = vpack.c.bf16 %v1662_v53, %v1662_v53  ;;  %vm1470_vm14 = vcmp.ge.f32.partialorder %v1242_v46, 0.0  ;;  %v1598_v59 = vmul.f32 0.1, %v1242_v46  ;;  %2298 = vst.msk [vmem:[%s3317_s25 + $0x64] sm:$0xf] %vm2272_vm1, %v2751_v49  ;;  %vm1404_vm15 = vcmp.ge.f32.partialorder %v978_v54, 0.0 }
 0x132   : > { %2362 = vst.msk [vmem:[%s3317_s25 + $0x164] sm:$0xf] %vm2272_vm1, %v2815_v50  ;;  %v1532_v51 = vmul.f32 0.1, %v978_v54  ;;  %v989_v2 = vadd.f32 %v3496_v55, %v3305_v1  ;;  %v1245_v3 = vadd.f32 %v3498_v58, %v3305_v1  ;;  %vm1468_vm0 = vcmp.ge.f32.partialorder %v1234_v60, 0.0  ;;  %v3588_v8 = vpop.f32.mrb[39].mxu1 }
 0x133   : > { %2303 = vst.msk [vmem:[%s3317_s25 + $0x78] sm:$0xf] %vm2272_vm1, %v2756_v47  ;;  %v1726_v5 = vsel %vm1470_vm14, %v1242_v46, %v1598_v59  ;;  %v1596_v6 = vmul.f32 0.1, %v1234_v60  ;;  %v981_v7 = vadd.f32 %v3305_v1, %v3500_v62  ;;  %v1237_v14 = vadd.f32 %v3305_v1, %v3502_v63 }
 0x134   : > { %v2820_v55 = vpack.c.bf16 %v1726_v5, %v1726_v5  ;;  %v1660_v9 = vsel %vm1404_vm15, %v978_v54, %v1532_v51  ;;  %vm1407_vm2 = vcmp.ge.f32.partialorder %v989_v2, 0.0  ;;  %v1535_v58 = vmul.f32 0.1, %v989_v2 }
 0x135   : > { %v2754_v10 = vpack.c.bf16 %v1660_v9, %v1660_v9  ;;  %v1724_v11 = vsel %vm1468_vm0, %v1234_v60, %v1596_v6  ;;  %vm1471_vm3 = vcmp.ge.f32.partialorder %v1245_v3, 0.0  ;;  %v1599_v12 = vmul.f32 0.1, %v1245_v3  ;;  %v3598_v23 = vpop.f32.mrb[40].mxu0 }
 0x136   : > { %2367 = vst.msk [vmem:[%s3317_s25 + $0x178] sm:$0xf] %vm2272_vm1, %v2820_v55  ;;  %v2818_v13 = vpack.c.bf16 %v1724_v11, %v1724_v11  ;;  %v1663_v16 = vsel %vm1407_vm2, %v989_v2, %v1535_v58  ;;  %vm1405_vm4 = vcmp.ge.f32.partialorder %v981_v7, 0.0  ;;  %v1533_v17 = vmul.f32 0.1, %v981_v7  ;;  %v3606_v33 = vpop.f32.mrb[40].mxu1 }
 0x137   : > { %2301 = vst.msk [vmem:[%s3317_s25 + $0x70] sm:$0xf] %vm2272_vm1, %v2754_v10  ;;  %v2757_v62 = vpack.c.bf16 %v1663_v16, %v1663_v16  ;;  %v1727_v18 = vsel %vm1471_vm3, %v1245_v3, %v1599_v12  ;;  %v1002_v19 = vadd.f32 %v3514_v15, %v3305_v1  ;;  %v1258_v31 = vadd.f32 %v3516_v21, %v3305_v1  ;;  %v3608_v63 = vpop.f32.mrb[41].mxu0  ;;  %v3612_v35 = vpop.f32.mrb[41].mxu1 }
 0x138   : > { %2365 = vst.msk [vmem:[%s3317_s25 + $0x170] sm:$0xf] %vm2272_vm1, %v2818_v13  ;;  %v2821_v28 = vpack.c.bf16 %v1727_v18, %v1727_v18  ;;  %v1661_v30 = vsel %vm1405_vm4, %v981_v7, %v1533_v17  ;;  %v994_v20 = vadd.f32 %v3305_v1, %v3518_v22  ;;  %vm1469_vm5 = vcmp.ge.f32.partialorder %v1237_v14, 0.0  ;;  %v3614_v37 = vpop.f32.mrb[42].mxu0  ;;  %v3624_v40 = vpop.f32.mrb[42].mxu1 }
 0x139   : > { %2304 = vst.msk [vmem:[%s3317_s25 + $0x7c] sm:$0xf] %vm2272_vm1, %v2757_v62  ;;  %v2755_v15 = vpack.c.bf16 %v1661_v30, %v1661_v30  ;;  %v1597_v34 = vmul.f32 0.1, %v1237_v14  ;;  %vm1410_vm6 = vcmp.ge.f32.partialorder %v1002_v19, 0.0  ;;  %vm1474_vm7 = vcmp.ge.f32.partialorder %v1258_v31, 0.0 }
 0x13a   : > { %2368 = vst.msk [vmem:[%s3317_s25 + $0x17c] sm:$0xf] %vm2272_vm1, %v2821_v28  ;;  %v1538_v21 = vmul.f32 0.1, %v1002_v19  ;;  %v1602_v27 = vmul.f32 0.1, %v1258_v31  ;;  %v1250_v38 = vadd.f32 %v3305_v1, %v3528_v24  ;;  %v1005_v39 = vadd.f32 %v3530_v25, %v3305_v1 }
 0x13b   : > { %vm1408_vm8 = vcmp.ge.f32.partialorder %v994_v20, 0.0  ;;  %2302 = vst.msk [vmem:[%s3317_s25 + $0x74] sm:$0xf] %vm2272_vm1, %v2755_v15  ;;  %v1725_v22 = vsel %vm1469_vm5, %v1237_v14, %v1597_v34  ;;  %v1536_v29 = vmul.f32 0.1, %v994_v20  ;;  %v3626_v41 = vpop.f32.mrb[43].mxu0  ;;  %v1261_v45 = vadd.f32 %v3542_v26, %v3305_v1 }
 0x13c   : > { %v2819_v42 = vpack.c.bf16 %v1725_v22, %v1725_v22  ;;  %v1666_v43 = vsel %vm1410_vm6, %v1002_v19, %v1538_v21  ;;  %v1730_v44 = vsel %vm1474_vm7, %v1258_v31, %v1602_v27  ;;  %v3631_v46 = vpop.f32.mrb[43].mxu1  ;;  %vm1472_vm9 = vcmp.ge.f32.partialorder %v1250_v38, 0.0  ;;  %v3670_v17 = vld [vmem:[%s3971_s2] ss:$0 sm:$0xff] }
 0x13d   : > { %v2760_v49 = vpack.c.bf16 %v1666_v43, %v1666_v43  ;;  %v2824_v24 = vpack.c.bf16 %v1730_v44, %v1730_v44  ;;  %v1664_v50 = vsel %vm1408_vm8, %v994_v20, %v1536_v29  ;;  %v1600_v53 = vmul.f32 0.1, %v1250_v38  ;;  %v3643_v60 = vpop.f32.mrb[44].mxu0 }
 0x13e   : > { %2366 = vst.msk [vmem:[%s3317_s25 + $0x174] sm:$0xf] %vm2272_vm1, %v2819_v42  ;;  %v2758_v25 = vpack.c.bf16 %v1664_v50, %v1664_v50  ;;  %vm1411_vm10 = vcmp.ge.f32.partialorder %v1005_v39, 0.0  ;;  %v1539_v54 = vmul.f32 0.1, %v1005_v39  ;;  %vm1475_vm11 = vcmp.ge.f32.partialorder %v1261_v45, 0.0 }
 0x13f   : > { %2307 = vst.msk [vmem:[%s3317_s25 + $0x88] sm:$0xf] %vm2272_vm1, %v2760_v49  ;;  %2371 = vst.msk [vmem:[%s3317_s25 + $0x188] sm:$0xf] %vm2272_vm1, %v2824_v24  ;;  %v1603_v47 = vmul.f32 0.1, %v1261_v45  ;;  %v997_v26 = vadd.f32 %v3305_v1, %v3544_v32  ;;  %v1253_v59 = vadd.f32 %v3305_v1, %v3546_v36  ;;  %v1728_v51 = vsel %vm1472_vm9, %v1250_v38, %v1600_v53 }
 0x140   : > { %2305 = vst.msk [vmem:[%s3317_s25 + $0x80] sm:$0xf] %vm2272_vm1, %v2758_v25  ;;  %v1667_v2 = vsel %vm1411_vm10, %v1005_v39, %v1539_v54  ;;  %v1018_v3 = vadd.f32 %v3554_v48, %v3305_v1  ;;  %v1274_v5 = vadd.f32 %v3560_v56, %v3305_v1  ;;  %v3651_v6 = vpop.f32.mrb[44].mxu1  ;;  %v3653_v32 = vpop.f32.mrb[45].mxu0  ;;  %v2822_v7 = vpack.c.bf16 %v1728_v51, %v1728_v51 }
 0x141   : > { %v2761_v36 = vpack.c.bf16 %v1667_v2, %v1667_v2  ;;  %v1731_v55 = vsel %vm1475_vm11, %v1261_v45, %v1603_v47  ;;  %vm1409_vm12 = vcmp.ge.f32.partialorder %v997_v26, 0.0  ;;  %v3655_v9 = vpop.f32.mrb[45].mxu1  ;;  %v3657_v58 = vpop.f32.mrb[46].mxu0  ;;  %v1537_v11 = vmul.f32 0.1, %v997_v26 }
 0x142   : > { %v2825_v10 = vpack.c.bf16 %v1731_v55, %v1731_v55  ;;  %vm1473_vm13 = vcmp.ge.f32.partialorder %v1253_v59, 0.0  ;;  %v1601_v48 = vmul.f32 0.1, %v1253_v59  ;;  %v3659_v12 = vpop.f32.mrb[46].mxu1  ;;  %2369 = vst.msk [vmem:[%s3317_s25 + $0x180] sm:$0xf] %vm2272_vm1, %v2822_v7  ;;  %v1010_v62 = vadd.f32 %v3670_v17, %v3562_v57 }
 0x143   : > { %2308 = vst.msk [vmem:[%s3317_s25 + $0x8c] sm:$0xf] %vm2272_vm1, %v2761_v36  ;;  %vm1414_vm14 = vcmp.ge.f32.partialorder %v1018_v3, 0.0  ;;  %v1542_v1 = vmul.f32 0.1, %v1018_v3  ;;  %vm1478_vm15 = vcmp.ge.f32.partialorder %v1274_v5, 0.0  ;;  %v1665_v13 = vsel %vm1409_vm12, %v997_v26, %v1537_v11 }
 0x144   : > { %v1606_v56 = vmul.f32 0.1, %v1274_v5  ;;  %2372 = vst.msk [vmem:[%s3317_s25 + $0x18c] sm:$0xf] %vm2272_vm1, %v2825_v10  ;;  %v1729_v16 = vsel %vm1473_vm13, %v1253_v59, %v1601_v48  ;;  %v1266_v18 = vadd.f32 %v3670_v17, %v3568_v61  ;;  %v3676_v14 = vpop.f32.mrb[47].mxu0  ;;  %v3678_v19 = vpop.f32.mrb[47].mxu1  ;;  %v2759_v28 = vpack.c.bf16 %v1665_v13, %v1665_v13 }
 0x145   : > { %v2823_v30 = vpack.c.bf16 %v1729_v16, %v1729_v16  ;;  %v1670_v31 = vsel %vm1414_vm14, %v1018_v3, %v1542_v1  ;;  %vm1412_vm0 = vcmp.ge.f32.partialorder %v1010_v62, 0.0  ;;  %v1540_v21 = vmul.f32 0.1, %v1010_v62  ;;  %v3688_v22 = vpop.f32.mrb[48].mxu0 }
 0x146   : > { %v1734_v20 = vsel %vm1478_vm15, %v1274_v5, %v1606_v56  ;;  %v2764_v15 = vpack.c.bf16 %v1670_v31, %v1670_v31  ;;  %2306 = vst.msk [vmem:[%s3317_s25 + $0x84] sm:$0xf] %vm2272_vm1, %v2759_v28  ;;  %vm1476_vm2 = vcmp.ge.f32.partialorder %v1266_v18, 0.0  ;;  %v1604_v57 = vmul.f32 0.1, %v1266_v18  ;;  %v3700_v42 = vpop.f32.mrb[48].mxu1 }
 0x147   : > { %v2828_v34 = vpack.c.bf16 %v1734_v20, %v1734_v20  ;;  %2370 = vst.msk [vmem:[%s3317_s25 + $0x184] sm:$0xf] %vm2272_vm1, %v2823_v30  ;;  %v1021_v61 = vadd.f32 %v3670_v17, %v3570_v0  ;;  %v1277_v27 = vadd.f32 %v3670_v17, %v3580_v4  ;;  %v1668_v29 = vsel %vm1412_vm0, %v1010_v62, %v1540_v21  ;;  %v3702_v4 = vpop.f32.mrb[49].mxu0  ;;  %v3704_v49 = vpop.f32.mrb[49].mxu1 }
 0x148   : > { %2311 = vst.msk [vmem:[%s3317_s25 + $0x98] sm:$0xf] %vm2272_vm1, %v2764_v15  ;;  %v1013_v38 = vadd.f32 %v3670_v17, %v3582_v52  ;;  %v1269_v39 = vadd.f32 %v3670_v17, %v3588_v8  ;;  %v1034_v0 = vadd.f32 %v3670_v17, %v3598_v23  ;;  %v2762_v43 = vpack.c.bf16 %v1668_v29, %v1668_v29  ;;  %v3706_v24 = vpop.f32.mrb[50].mxu0  ;;  %v3708_v50 = vpop.f32.mrb[50].mxu1 }
 0x149   : > { %2375 = vst.msk [vmem:[%s3317_s25 + $0x198] sm:$0xf] %vm2272_vm1, %v2828_v34  ;;  %v1732_v44 = vsel %vm1476_vm2, %v1266_v18, %v1604_v57  ;;  %vm1415_vm3 = vcmp.ge.f32.partialorder %v1021_v61, 0.0  ;;  %v1543_v45 = vmul.f32 0.1, %v1021_v61  ;;  %vm1479_vm4 = vcmp.ge.f32.partialorder %v1277_v27, 0.0 }
 0x14a   : > { %v2826_v52 = vpack.c.bf16 %v1732_v44, %v1732_v44  ;;  %v1607_v8 = vmul.f32 0.1, %v1277_v27  ;;  %vm1413_vm5 = vcmp.ge.f32.partialorder %v1013_v38, 0.0  ;;  %v3710_v23 = vpop.f32.mrb[51].mxu0  ;;  %2309 = vst.msk [vmem:[%s3317_s25 + $0x90] sm:$0xf] %vm2272_vm1, %v2762_v43  ;;  %v1290_v7 = vadd.f32 %v3670_v17, %v3606_v33 }
 0x14b   : > { %v1671_v25 = vsel %vm1415_vm3, %v1021_v61, %v1543_v45  ;;  %v1541_v53 = vmul.f32 0.1, %v1013_v38  ;;  %vm1477_vm6 = vcmp.ge.f32.partialorder %v1269_v39, 0.0  ;;  %v1605_v54 = vmul.f32 0.1, %v1269_v39  ;;  %v3714_v47 = vpop.f32.mrb[51].mxu1 }
 0x14c   : > { %2373 = vst.msk [vmem:[%s3317_s25 + $0x190] sm:$0xf] %vm2272_vm1, %v2826_v52  ;;  %v2765_v26 = vpack.c.bf16 %v1671_v25, %v1671_v25  ;;  %v1735_v59 = vsel %vm1479_vm4, %v1277_v27, %v1607_v8  ;;  %vm1418_vm7 = vcmp.ge.f32.partialorder %v1034_v0, 0.0  ;;  %v1546_v51 = vmul.f32 0.1, %v1034_v0 }
 0x14d   : > { %v2829_v2 = vpack.c.bf16 %v1735_v59, %v1735_v59  ;;  %v1669_v3 = vsel %vm1413_vm5, %v1013_v38, %v1541_v53  ;;  %v1733_v5 = vsel %vm1477_vm6, %v1269_v39, %v1605_v54  ;;  %v1026_v11 = vadd.f32 %v3670_v17, %v3608_v63  ;;  %v3728_v13 = vpop.f32.mrb[52].mxu0 }
 0x14e   : > { %2312 = vst.msk [vmem:[%s3317_s25 + $0x9c] sm:$0xf] %vm2272_vm1, %v2765_v26  ;;  %v2763_v36 = vpack.c.bf16 %v1669_v3, %v1669_v3  ;;  %v2827_v55 = vpack.c.bf16 %v1733_v5, %v1733_v5  ;;  %v1674_v10 = vsel %vm1418_vm7, %v1034_v0, %v1546_v51  ;;  %vm1482_vm8 = vcmp.ge.f32.partialorder %v1290_v7, 0.0  ;;  %v3738_v62 = vpop.f32.mrb[52].mxu1  ;;  %v3740_v18 = vpop.f32.mrb[53].mxu0 }
 0x14f   : > { %2376 = vst.msk [vmem:[%s3317_s25 + $0x19c] sm:$0xf] %vm2272_vm1, %v2829_v2  ;;  %v2768_v48 = vpack.c.bf16 %v1674_v10, %v1674_v10  ;;  %v1610_v1 = vmul.f32 0.1, %v1290_v7  ;;  %v1282_v56 = vadd.f32 %v3670_v17, %v3612_v35  ;;  %vm1416_vm9 = vcmp.ge.f32.partialorder %v1026_v11, 0.0  ;;  %v3746_v31 = vpop.f32.mrb[53].mxu1 }
 0x150   : > { %2310 = vst.msk [vmem:[%s3317_s25 + $0x94] sm:$0xf] %vm2272_vm1, %v2763_v36  ;;  %2374 = vst.msk [vmem:[%s3317_s25 + $0x194] sm:$0xf] %vm2272_vm1, %v2827_v55  ;;  %v1544_v33 = vmul.f32 0.1, %v1026_v11  ;;  %v1037_v16 = vadd.f32 %v3670_v17, %v3614_v37  ;;  %v1293_v63 = vadd.f32 %v3670_v17, %v3624_v40  ;;  %v1029_v30 = vadd.f32 %v3670_v17, %v3626_v41 }
 0x151   : > { %2315 = vst.msk [vmem:[%s3317_s25 + $0xa8] sm:$0xf] %vm2272_vm1, %v2768_v48  ;;  %v1738_v35 = vsel %vm1482_vm8, %v1290_v7, %v1610_v1  ;;  %vm1480_vm10 = vcmp.ge.f32.partialorder %v1282_v56, 0.0  ;;  %v1608_v28 = vmul.f32 0.1, %v1282_v56  ;;  %v3748_v20 = vpop.f32.mrb[54].mxu0  ;;  %v1285_v44 = vadd.f32 %v3670_v17, %v3631_v46 }
 0x152   : > { %v2832_v37 = vpack.c.bf16 %v1738_v35, %v1738_v35  ;;  %v1672_v40 = vsel %vm1416_vm9, %v1026_v11, %v1544_v33  ;;  %vm1419_vm11 = vcmp.ge.f32.partialorder %v1037_v16, 0.0  ;;  %v1547_v15 = vmul.f32 0.1, %v1037_v16  ;;  %v3750_v34 = vpop.f32.mrb[54].mxu1  ;;  %v3752_v21 = vpop.f32.mrb[55].mxu0 }
 0x153   : > { %v2766_v57 = vpack.c.bf16 %v1672_v40, %v1672_v40  ;;  %v1736_v61 = vsel %vm1480_vm10, %v1282_v56, %v1608_v28  ;;  %vm1483_vm12 = vcmp.ge.f32.partialorder %v1293_v63, 0.0  ;;  %v1611_v27 = vmul.f32 0.1, %v1293_v63  ;;  %v3754_v29 = vpop.f32.mrb[55].mxu1 }
 0x154   : > { %2379 = vst.msk [vmem:[%s3317_s25 + $0x1a8] sm:$0xf] %vm2272_vm1, %v2832_v37  ;;  %v2830_v41 = vpack.c.bf16 %v1736_v61, %v1736_v61  ;;  %v1675_v38 = vsel %vm1419_vm11, %v1037_v16, %v1547_v15  ;;  %vm1417_vm13 = vcmp.ge.f32.partialorder %v1029_v30, 0.0  ;;  %v1545_v39 = vmul.f32 0.1, %v1029_v30 }
 0x155   : > { %2313 = vst.msk [vmem:[%s3317_s25 + $0xa0] sm:$0xf] %vm2272_vm1, %v2766_v57  ;;  %v2769_v0 = vpack.c.bf16 %v1675_v38, %v1675_v38  ;;  %v1739_v43 = vsel %vm1483_vm12, %v1293_v63, %v1611_v27  ;;  %v1050_v45 = vadd.f32 %v3670_v17, %v3643_v60  ;;  %v1306_v25 = vadd.f32 %v3670_v17, %v3651_v6  ;;  %v3772_v46 = vpop.f32.mrb[56].mxu0 }
 0x156   : > { %2377 = vst.msk [vmem:[%s3317_s25 + $0x1a0] sm:$0xf] %vm2272_vm1, %v2830_v41  ;;  %v2833_v52 = vpack.c.bf16 %v1739_v43, %v1739_v43  ;;  %v1673_v8 = vsel %vm1417_vm13, %v1029_v30, %v1545_v39  ;;  %v1042_v53 = vadd.f32 %v3670_v17, %v3653_v32  ;;  %vm1481_vm14 = vcmp.ge.f32.partialorder %v1285_v44, 0.0  ;;  %v3782_v3 = vpop.f32.mrb[56].mxu1  ;;  %v3784_v5 = vpop.f32.mrb[57].mxu0 }
 0x157   : > { %2316 = vst.msk [vmem:[%s3317_s25 + $0xac] sm:$0xf] %vm2272_vm1, %v2769_v0  ;;  %v2767_v54 = vpack.c.bf16 %v1673_v8, %v1673_v8  ;;  %v1609_v26 = vmul.f32 0.1, %v1285_v44  ;;  %vm1422_vm15 = vcmp.ge.f32.partialorder %v1050_v45, 0.0  ;;  %vm1486_vm0 = vcmp.ge.f32.partialorder %v1306_v25, 0.0 }
 0x158   : > { %2380 = vst.msk [vmem:[%s3317_s25 + $0x1ac] sm:$0xf] %vm2272_vm1, %v2833_v52  ;;  %v1550_v60 = vmul.f32 0.1, %v1050_v45  ;;  %v1614_v59 = vmul.f32 0.1, %v1306_v25  ;;  %v1298_v32 = vadd.f32 %v3670_v17, %v3655_v9  ;;  %v1053_v2 = vadd.f32 %v3670_v17, %v3657_v58 }
 0x159   : > { %vm1420_vm2 = vcmp.ge.f32.partialorder %v1042_v53, 0.0  ;;  %2314 = vst.msk [vmem:[%s3317_s25 + $0xa4] sm:$0xf] %vm2272_vm1, %v2767_v54  ;;  %v1737_v6 = vsel %vm1481_vm14, %v1285_v44, %v1609_v26  ;;  %v1548_v51 = vmul.f32 0.1, %v1042_v53  ;;  %v1309_v10 = vadd.f32 %v3670_v17, %v3659_v12  ;;  %v3788_v11 = vpop.f32.mrb[57].mxu1 }
 0x15a   : > { %v2831_v7 = vpack.c.bf16 %v1737_v6, %v1737_v6  ;;  %v1678_v36 = vsel %vm1422_vm15, %v1050_v45, %v1550_v60  ;;  %v1742_v55 = vsel %vm1486_vm0, %v1306_v25, %v1614_v59  ;;  %v3790_v48 = vpop.f32.mrb[58].mxu0  ;;  %vm1484_vm3 = vcmp.ge.f32.partialorder %v1298_v32, 0.0  ;;  %v3793_v56 = vpop.f32.mrb[58].mxu1 }
 0x15b   : > { %v2772_v9 = vpack.c.bf16 %v1678_v36, %v1678_v36  ;;  %v2836_v1 = vpack.c.bf16 %v1742_v55, %v1742_v55  ;;  %v1676_v58 = vsel %vm1420_vm2, %v1042_v53, %v1548_v51  ;;  %v3795_v33 = vpop.f32.mrb[59].mxu0  ;;  %v1612_v63 = vmul.f32 0.1, %v1298_v32  ;;  %v3799_v35 = vpop.f32.mrb[59].mxu1 }
 0x15c   : > { %2378 = vst.msk [vmem:[%s3317_s25 + $0x1a4] sm:$0xf] %vm2272_vm1, %v2831_v7  ;;  %v2770_v16 = vpack.c.bf16 %v1676_v58, %v1676_v58  ;;  %vm1423_vm4 = vcmp.ge.f32.partialorder %v1053_v2, 0.0  ;;  %v1551_v12 = vmul.f32 0.1, %v1053_v2  ;;  %vm1487_vm5 = vcmp.ge.f32.partialorder %v1309_v10, 0.0 }
 0x15d   : > { %2319 = vst.msk [vmem:[%s3317_s25 + $0xb8] sm:$0xf] %vm2272_vm1, %v2772_v9  ;;  %2383 = vst.msk [vmem:[%s3317_s25 + $0x1b8] sm:$0xf] %vm2272_vm1, %v2836_v1  ;;  %v1615_v28 = vmul.f32 0.1, %v1309_v10  ;;  %v1045_v30 = vadd.f32 %v3670_v17, %v3676_v14  ;;  %v1301_v37 = vadd.f32 %v3670_v17, %v3678_v19  ;;  %v1740_v40 = vsel %vm1484_vm3, %v1298_v32, %v1612_v63 }
 0x15e   : > { %2317 = vst.msk [vmem:[%s3317_s25 + $0xb0] sm:$0xf] %vm2272_vm1, %v2770_v16  ;;  %v1679_v15 = vsel %vm1423_vm4, %v1053_v2, %v1551_v12  ;;  %v1066_v57 = vadd.f32 %v3670_v17, %v3688_v22  ;;  %v1322_v61 = vadd.f32 %v3670_v17, %v3700_v42  ;;  %v2834_v27 = vpack.c.bf16 %v1740_v40, %v1740_v40  ;;  %v3816_v38 = vpop.f32.mrb[60].mxu0  ;;  %v3818_v43 = vpop.f32.mrb[60].mxu1 }
 0x15f   : > { %v2773_v41 = vpack.c.bf16 %v1679_v15, %v1679_v15  ;;  %v1743_v14 = vsel %vm1487_vm5, %v1309_v10, %v1615_v28  ;;  %vm1421_vm6 = vcmp.ge.f32.partialorder %v1045_v30, 0.0  ;;  %v1549_v39 = vmul.f32 0.1, %v1045_v30  ;;  %v3830_v25 = vpop.f32.mrb[61].mxu0  ;;  %v3832_v53 = vpop.f32.mrb[61].mxu1 }
 0x160   : > { %v2837_v19 = vpack.c.bf16 %v1743_v14, %v1743_v14  ;;  %vm1485_vm7 = vcmp.ge.f32.partialorder %v1301_v37, 0.0  ;;  %v1613_v0 = vmul.f32 0.1, %v1301_v37  ;;  %2381 = vst.msk [vmem:[%s3317_s25 + $0x1b0] sm:$0xf] %vm2272_vm1, %v2834_v27  ;;  %vm1426_vm8 = vcmp.ge.f32.partialorder %v1066_v57, 0.0 }
 0x161   : > { %2320 = vst.msk [vmem:[%s3317_s25 + $0xbc] sm:$0xf] %vm2272_vm1, %v2773_v41  ;;  %v1554_v22 = vmul.f32 0.1, %v1066_v57  ;;  %vm1490_vm9 = vcmp.ge.f32.partialorder %v1322_v61, 0.0  ;;  %v1677_v44 = vsel %vm1421_vm6, %v1045_v30, %v1549_v39  ;;  %v1058_v52 = vadd.f32 %v3670_v17, %v3702_v4  ;;  %v3834_v6 = vpop.f32.mrb[62].mxu0 }
 0x162   : > { %v1618_v42 = vmul.f32 0.1, %v1322_v61  ;;  %2384 = vst.msk [vmem:[%s3317_s25 + $0x1bc] sm:$0xf] %vm2272_vm1, %v2837_v19  ;;  %v1741_v45 = vsel %vm1485_vm7, %v1301_v37, %v1613_v0  ;;  %v1314_v8 = vadd.f32 %v3670_v17, %v3704_v49  ;;  %v2771_v54 = vpack.c.bf16 %v1677_v44, %v1677_v44  ;;  %v3836_v51 = vpop.f32.mrb[62].mxu1  ;;  %v3838_v49 = vpop.f32.mrb[63].mxu0 }
 0x163   : > { %v2835_v26 = vpack.c.bf16 %v1741_v45, %v1741_v45  ;;  %v1682_v60 = vsel %vm1426_vm8, %v1066_v57, %v1554_v22  ;;  %vm1424_vm10 = vcmp.ge.f32.partialorder %v1058_v52, 0.0  ;;  %v1552_v2 = vmul.f32 0.1, %v1058_v52  ;;  %v3840_v7 = vpop.f32.mrb[63].mxu1 }
 0x164   : > { %v1746_v59 = vsel %vm1490_vm9, %v1322_v61, %v1618_v42  ;;  %v2776_v4 = vpack.c.bf16 %v1682_v60, %v1682_v60  ;;  %2318 = vst.msk [vmem:[%s3317_s25 + $0xb4] sm:$0xf] %vm2272_vm1, %v2771_v54  ;;  %vm1488_vm11 = vcmp.ge.f32.partialorder %v1314_v8, 0.0  ;;  %v1616_v36 = vmul.f32 0.1, %v1314_v8 }
 0x165   : > { %v2840_v32 = vpack.c.bf16 %v1746_v59, %v1746_v59  ;;  %2382 = vst.msk [vmem:[%s3317_s25 + $0x1b4] sm:$0xf] %vm2272_vm1, %v2835_v26  ;;  %v1069_v55 = vadd.f32 %v3670_v17, %v3706_v24  ;;  %v1325_v10 = vadd.f32 %v3670_v17, %v3708_v50  ;;  %v1680_v9 = vsel %vm1424_vm10, %v1058_v52, %v1552_v2 }
 0x166   : > { %2323 = vst.msk [vmem:[%s3317_s25 + $0xc8] sm:$0xf] %vm2272_vm1, %v2776_v4  ;;  %v1061_v1 = vadd.f32 %v3670_v17, %v3710_v23  ;;  %v1317_v58 = vadd.f32 %v3670_v17, %v3714_v47  ;;  %v1082_v16 = vadd.f32 %v3670_v17, %v3728_v13  ;;  %v2774_v24 = vpack.c.bf16 %v1680_v9, %v1680_v9 }
 0x167   : > { %2387 = vst.msk [vmem:[%s3317_s25 + $0x1c8] sm:$0xf] %vm2272_vm1, %v2840_v32  ;;  %v1744_v63 = vsel %vm1488_vm11, %v1314_v8, %v1616_v36  ;;  %vm1427_vm12 = vcmp.ge.f32.partialorder %v1069_v55, 0.0  ;;  %v1555_v12 = vmul.f32 0.1, %v1069_v55  ;;  %vm1491_vm13 = vcmp.ge.f32.partialorder %v1325_v10, 0.0 }
 0x168   : > { %v2838_v50 = vpack.c.bf16 %v1744_v63, %v1744_v63  ;;  %v1619_v28 = vmul.f32 0.1, %v1325_v10  ;;  %vm1425_vm14 = vcmp.ge.f32.partialorder %v1061_v1, 0.0  ;;  %2321 = vst.msk [vmem:[%s3317_s25 + $0xc0] sm:$0xf] %vm2272_vm1, %v2774_v24  ;;  %vm1489_vm15 = vcmp.ge.f32.partialorder %v1317_v58, 0.0 }
 0x169   : > { %v1683_v30 = vsel %vm1427_vm12, %v1069_v55, %v1555_v12  ;;  %v1553_v23 = vmul.f32 0.1, %v1061_v1  ;;  %v1617_v37 = vmul.f32 0.1, %v1317_v58  ;;  %vm1430_vm0 = vcmp.ge.f32.partialorder %v1082_v16, 0.0 }
 0x16a   : > { %2385 = vst.msk [vmem:[%s3317_s25 + $0x1c0] sm:$0xf] %vm2272_vm1, %v2838_v50  ;;  %v2777_v47 = vpack.c.bf16 %v1683_v30, %v1683_v30  ;;  %v1747_v13 = vsel %vm1491_vm13, %v1325_v10, %v1619_v28  ;;  %v1558_v40 = vmul.f32 0.1, %v1082_v16  ;;  %v1338_v27 = vadd.f32 %v3670_v17, %v3738_v62 }
 0x16b   : > { %v2841_v15 = vpack.c.bf16 %v1747_v13, %v1747_v13  ;;  %v1681_v57 = vsel %vm1425_vm14, %v1061_v1, %v1553_v23  ;;  %v1745_v61 = vsel %vm1489_vm15, %v1317_v58, %v1617_v37  ;;  %v1074_v39 = vadd.f32 %v3670_v17, %v3740_v18 }
 0x16c   : > { %2324 = vst.msk [vmem:[%s3317_s25 + $0xcc] sm:$0xf] %vm2272_vm1, %v2777_v47  ;;  %v2775_v41 = vpack.c.bf16 %v1681_v57, %v1681_v57  ;;  %v2839_v14 = vpack.c.bf16 %v1745_v61, %v1745_v61  ;;  %v1686_v19 = vsel %vm1430_vm0, %v1082_v16, %v1558_v40  ;;  %vm1494_vm2 = vcmp.ge.f32.partialorder %v1338_v27, 0.0 }
 0x16d   : > { %2388 = vst.msk [vmem:[%s3317_s25 + $0x1cc] sm:$0xf] %vm2272_vm1, %v2841_v15  ;;  %v2780_v0 = vpack.c.bf16 %v1686_v19, %v1686_v19  ;;  %v1622_v22 = vmul.f32 0.1, %v1338_v27  ;;  %v1330_v42 = vadd.f32 %v3670_v17, %v3746_v31  ;;  %vm1428_vm3 = vcmp.ge.f32.partialorder %v1074_v39, 0.0 }
 0x16e   : > { %2322 = vst.msk [vmem:[%s3317_s25 + $0xc4] sm:$0xf] %vm2272_vm1, %v2775_v41  ;;  %2386 = vst.msk [vmem:[%s3317_s25 + $0x1c4] sm:$0xf] %vm2272_vm1, %v2839_v14  ;;  %v1556_v62 = vmul.f32 0.1, %v1074_v39  ;;  %v1085_v44 = vadd.f32 %v3670_v17, %v3748_v20  ;;  %v1341_v18 = vadd.f32 %v3670_v17, %v3750_v34  ;;  %v1077_v31 = vadd.f32 %v3670_v17, %v3752_v21 }
 0x16f   : > { %2327 = vst.msk [vmem:[%s3317_s25 + $0xd8] sm:$0xf] %vm2272_vm1, %v2780_v0  ;;  %v1750_v45 = vsel %vm1494_vm2, %v1338_v27, %v1622_v22  ;;  %vm1492_vm4 = vcmp.ge.f32.partialorder %v1330_v42, 0.0  ;;  %v1620_v52 = vmul.f32 0.1, %v1330_v42  ;;  %v1333_v36 = vadd.f32 %v3670_v17, %v3754_v29 }
 0x170   : > { %v2844_v8 = vpack.c.bf16 %v1750_v45, %v1750_v45  ;;  %v1684_v54 = vsel %vm1428_vm3, %v1074_v39, %v1556_v62  ;;  %vm1431_vm5 = vcmp.ge.f32.partialorder %v1085_v44, 0.0  ;;  %v1559_v26 = vmul.f32 0.1, %v1085_v44 }
 0x171   : > { %v2778_v60 = vpack.c.bf16 %v1684_v54, %v1684_v54  ;;  %v1748_v59 = vsel %vm1492_vm4, %v1330_v42, %v1620_v52  ;;  %vm1495_vm6 = vcmp.ge.f32.partialorder %v1341_v18, 0.0  ;;  %v1623_v20 = vmul.f32 0.1, %v1341_v18 }
 0x172   : > { %2391 = vst.msk [vmem:[%s3317_s25 + $0x1d8] sm:$0xf] %vm2272_vm1, %v2844_v8  ;;  %v2842_v34 = vpack.c.bf16 %v1748_v59, %v1748_v59  ;;  %v1687_v4 = vsel %vm1431_vm5, %v1085_v44, %v1559_v26  ;;  %vm1429_vm7 = vcmp.ge.f32.partialorder %v1077_v31, 0.0  ;;  %v1557_v32 = vmul.f32 0.1, %v1077_v31 }
 0x173   : > { %2325 = vst.msk [vmem:[%s3317_s25 + $0xd0] sm:$0xf] %vm2272_vm1, %v2778_v60  ;;  %v2781_v21 = vpack.c.bf16 %v1687_v4, %v1687_v4  ;;  %v1751_v2 = vsel %vm1495_vm6, %v1341_v18, %v1623_v20  ;;  %v1098_v55 = vadd.f32 %v3670_v17, %v3772_v46  ;;  %v1354_v1 = vadd.f32 %v3670_v17, %v3782_v3 }
 0x174   : > { %2389 = vst.msk [vmem:[%s3317_s25 + $0x1d0] sm:$0xf] %vm2272_vm1, %v2842_v34  ;;  %v2845_v10 = vpack.c.bf16 %v1751_v2, %v1751_v2  ;;  %v1685_v9 = vsel %vm1429_vm7, %v1077_v31, %v1557_v32  ;;  %v1090_v58 = vadd.f32 %v3670_v17, %v3784_v5  ;;  %vm1493_vm8 = vcmp.ge.f32.partialorder %v1333_v36, 0.0 }
 0x175   : > { %2328 = vst.msk [vmem:[%s3317_s25 + $0xdc] sm:$0xf] %vm2272_vm1, %v2781_v21  ;;  %v2779_v16 = vpack.c.bf16 %v1685_v9, %v1685_v9  ;;  %v1621_v24 = vmul.f32 0.1, %v1333_v36  ;;  %vm1434_vm9 = vcmp.ge.f32.partialorder %v1098_v55, 0.0  ;;  %vm1498_vm10 = vcmp.ge.f32.partialorder %v1354_v1, 0.0 }
 0x176   : > { %2392 = vst.msk [vmem:[%s3317_s25 + $0x1dc] sm:$0xf] %vm2272_vm1, %v2845_v10  ;;  %v1562_v29 = vmul.f32 0.1, %v1098_v55  ;;  %v1626_v46 = vmul.f32 0.1, %v1354_v1  ;;  %v1346_v5 = vadd.f32 %v3670_v17, %v3788_v11  ;;  %v1101_v12 = vadd.f32 %v3670_v17, %v3790_v48 }
 0x177   : > { %vm1432_vm11 = vcmp.ge.f32.partialorder %v1090_v58, 0.0  ;;  %2326 = vst.msk [vmem:[%s3317_s25 + $0xd4] sm:$0xf] %vm2272_vm1, %v2779_v16  ;;  %v1749_v63 = vsel %vm1493_vm8, %v1333_v36, %v1621_v24  ;;  %v1560_v3 = vmul.f32 0.1, %v1090_v58  ;;  %v1357_v23 = vadd.f32 %v3670_v17, %v3793_v56 }
 0x178   : > { %v2843_v50 = vpack.c.bf16 %v1749_v63, %v1749_v63  ;;  %v1690_v28 = vsel %vm1434_vm9, %v1098_v55, %v1562_v29  ;;  %v1754_v30 = vsel %vm1498_vm10, %v1354_v1, %v1626_v46  ;;  %vm1496_vm12 = vcmp.ge.f32.partialorder %v1346_v5, 0.0 }
 0x179   : > { %v2784_v37 = vpack.c.bf16 %v1690_v28, %v1690_v28  ;;  %v2848_v47 = vpack.c.bf16 %v1754_v30, %v1754_v30  ;;  %v1688_v13 = vsel %vm1432_vm11, %v1090_v58, %v1560_v3  ;;  %v1624_v15 = vmul.f32 0.1, %v1346_v5 }
 0x17a   : > { %2390 = vst.msk [vmem:[%s3317_s25 + $0x1d4] sm:$0xf] %vm2272_vm1, %v2843_v50  ;;  %v2782_v40 = vpack.c.bf16 %v1688_v13, %v1688_v13  ;;  %vm1435_vm13 = vcmp.ge.f32.partialorder %v1101_v12, 0.0  ;;  %v1563_v11 = vmul.f32 0.1, %v1101_v12  ;;  %vm1499_vm14 = vcmp.ge.f32.partialorder %v1357_v23, 0.0 }
 0x17b   : > { %2331 = vst.msk [vmem:[%s3317_s25 + $0xe8] sm:$0xf] %vm2272_vm1, %v2784_v37  ;;  %2395 = vst.msk [vmem:[%s3317_s25 + $0x1e8] sm:$0xf] %vm2272_vm1, %v2848_v47  ;;  %v1627_v48 = vmul.f32 0.1, %v1357_v23  ;;  %v1093_v56 = vadd.f32 %v3670_v17, %v3795_v33  ;;  %v1349_v57 = vadd.f32 %v3670_v17, %v3799_v35  ;;  %v1752_v61 = vsel %vm1496_vm12, %v1346_v5, %v1624_v15 }
 0x17c   : > { %2329 = vst.msk [vmem:[%s3317_s25 + $0xe0] sm:$0xf] %vm2272_vm1, %v2782_v40  ;;  %v1691_v27 = vsel %vm1435_vm13, %v1101_v12, %v1563_v11  ;;  %v1114_v41 = vadd.f32 %v3670_v17, %v3816_v38  ;;  %v1370_v14 = vadd.f32 %v3670_v17, %v3818_v43  ;;  %v2846_v19 = vpack.c.bf16 %v1752_v61, %v1752_v61 }
 0x17d   : > { %v2785_v39 = vpack.c.bf16 %v1691_v27, %v1691_v27  ;;  %v1755_v0 = vsel %vm1499_vm14, %v1357_v23, %v1627_v48  ;;  %vm1433_vm15 = vcmp.ge.f32.partialorder %v1093_v56, 0.0  ;;  %v1561_v22 = vmul.f32 0.1, %v1093_v56 }
 0x17e   : > { %v2849_v33 = vpack.c.bf16 %v1755_v0, %v1755_v0  ;;  %vm1497_vm0 = vcmp.ge.f32.partialorder %v1349_v57, 0.0  ;;  %v1625_v42 = vmul.f32 0.1, %v1349_v57  ;;  %2393 = vst.msk [vmem:[%s3317_s25 + $0x1e0] sm:$0xf] %vm2272_vm1, %v2846_v19  ;;  %vm1438_vm2 = vcmp.ge.f32.partialorder %v1114_v41, 0.0 }
 0x17f   : > { %2332 = vst.msk [vmem:[%s3317_s25 + $0xec] sm:$0xf] %vm2272_vm1, %v2785_v39  ;;  %v1566_v35 = vmul.f32 0.1, %v1114_v41  ;;  %vm1502_vm3 = vcmp.ge.f32.partialorder %v1370_v14, 0.0  ;;  %v1689_v43 = vsel %vm1433_vm15, %v1093_v56, %v1561_v22  ;;  %v1106_v44 = vadd.f32 %v3670_v17, %v3830_v25 }
 0x180   : > { %v1630_v38 = vmul.f32 0.1, %v1370_v14  ;;  %2396 = vst.msk [vmem:[%s3317_s25 + $0x1ec] sm:$0xf] %vm2272_vm1, %v2849_v33  ;;  %v1753_v62 = vsel %vm1497_vm0, %v1349_v57, %v1625_v42  ;;  %v1362_v18 = vadd.f32 %v3670_v17, %v3832_v53  ;;  %v2783_v45 = vpack.c.bf16 %v1689_v43, %v1689_v43 }
 0x181   : > { %v2847_v52 = vpack.c.bf16 %v1753_v62, %v1753_v62  ;;  %v1694_v31 = vsel %vm1438_vm2, %v1114_v41, %v1566_v35  ;;  %vm1436_vm4 = vcmp.ge.f32.partialorder %v1106_v44, 0.0  ;;  %v1564_v60 = vmul.f32 0.1, %v1106_v44 }
 0x182   : > { %v1758_v8 = vsel %vm1502_vm3, %v1370_v14, %v1630_v38  ;;  %v2788_v54 = vpack.c.bf16 %v1694_v31, %v1694_v31  ;;  %2330 = vst.msk [vmem:[%s3317_s25 + $0xe4] sm:$0xf] %vm2272_vm1, %v2783_v45  ;;  %vm1500_vm5 = vcmp.ge.f32.partialorder %v1362_v18, 0.0  ;;  %v1628_v59 = vmul.f32 0.1, %v1362_v18 }
 0x183   : > { %v2852_v26 = vpack.c.bf16 %v1758_v8, %v1758_v8  ;;  %2394 = vst.msk [vmem:[%s3317_s25 + $0x1e4] sm:$0xf] %vm2272_vm1, %v2847_v52  ;;  %v1117_v25 = vadd.f32 %v3670_v17, %v3834_v6  ;;  %v1373_v53 = vadd.f32 %v3670_v17, %v3836_v51  ;;  %v1692_v20 = vsel %vm1436_vm4, %v1106_v44, %v1564_v60 }
 0x184   : > { %2335 = vst.msk [vmem:[%s3317_s25 + $0xf8] sm:$0xf] %vm2272_vm1, %v2788_v54  ;;  %v1109_v34 = vadd.f32 %v3670_v17, %v3838_v49  ;;  %v1365_v4 = vadd.f32 %v3670_v17, %v3840_v7  ;;  %v2786_v32 = vpack.c.bf16 %v1692_v20, %v1692_v20  ;;  %v1756_v21 = vsel %vm1500_vm5, %v1362_v18, %v1628_v59 }
 0x185   : > { %2399 = vst.msk [vmem:[%s3317_s25 + $0x1f8] sm:$0xf] %vm2272_vm1, %v2852_v26  ;;  %vm1439_vm6 = vcmp.ge.f32.partialorder %v1117_v25, 0.0  ;;  %v1567_v2 = vmul.f32 0.1, %v1117_v25  ;;  %v2850_v6 = vpack.c.bf16 %v1756_v21, %v1756_v21  ;;  %vm1503_vm7 = vcmp.ge.f32.partialorder %v1373_v53, 0.0 }
 0x186   : > { %v1631_v51 = vmul.f32 0.1, %v1373_v53  ;;  %vm1437_vm8 = vcmp.ge.f32.partialorder %v1109_v34, 0.0  ;;  %2333 = vst.msk [vmem:[%s3317_s25 + $0xf0] sm:$0xf] %vm2272_vm1, %v2786_v32  ;;  %vm1501_vm9 = vcmp.ge.f32.partialorder %v1365_v4, 0.0 }
 0x187   : > { %v1695_v36 = vsel %vm1439_vm6, %v1117_v25, %v1567_v2  ;;  %v1565_v55 = vmul.f32 0.1, %v1109_v34  ;;  %v1629_v49 = vmul.f32 0.1, %v1365_v4  ;;  %2397 = vst.msk [vmem:[%s3317_s25 + $0x1f0] sm:$0xf] %vm2272_vm1, %v2850_v6 }
 0x188   : > { %v2789_v17 = vpack.c.bf16 %v1695_v36, %v1695_v36  ;;  %v1759_v7 = vsel %vm1503_vm7, %v1373_v53, %v1631_v51 }
 0x189   : > { %v2853_v10 = vpack.c.bf16 %v1759_v7, %v1759_v7  ;;  %v1693_v9 = vsel %vm1437_vm8, %v1109_v34, %v1565_v55  ;;  %v1757_v1 = vsel %vm1501_vm9, %v1365_v4, %v1629_v49 }
 0x18a   : > { %2336 = vst.msk [vmem:[%s3317_s25 + $0xfc] sm:$0xf] %vm2272_vm1, %v2789_v17  ;;  %v2787_v58 = vpack.c.bf16 %v1693_v9, %v1693_v9  ;;  %v2851_v16 = vpack.c.bf16 %v1757_v1, %v1757_v1 }
 0x18b   : > { %2400 = vst.msk [vmem:[%s3317_s25 + $0x1fc] sm:$0xf] %vm2272_vm1, %v2853_v10 }
 0x18c   : > { %2334 = vst.msk [vmem:[%s3317_s25 + $0xf4] sm:$0xf] %vm2272_vm1, %v2787_v58  ;;  %2398 = vst.msk [vmem:[%s3317_s25 + $0x1f4] sm:$0xf] %vm2272_vm1, %v2851_v16 }
 0x18d PF: > { %s13_s12 = sadd.s32 1, %s3131_s12  }
 0x18e   : > { %p10_p4 = scmp.ge.s32.totalorder %s13_s12, 4  }
 0x190   :  { %12 = sbr.rel (!%p10_p4) target bundleno = 1 (0x1), region = 62 }

// kernel: discriminator_forward.5
= control target key start
LH: loop header
LB: loop body
LE: loop exit
PB: predicated region body
PF: predicated region fallthrough
CT: control target
= control target key end

     0   :  { %vm1079_vm0 = vcmask 125952   ;;  %s2037_s1 = inlined_call_operand.vmem [shape: bf16[128,16], index: 1, kind: input, shape index: {}]   ;;  %s2038_s0 = inlined_call_operand.vmem [shape: bf16[512,128], index: 0, kind: input, shape index: {}]   ;;  %s2039_s2 = inlined_call_operand.vmem [shape: f32[1,16], index: 2, kind: input, shape index: {}]   ;;  %s2040_s3 = inlined_call_operand.vmem [shape: bf16[512,16], index: 3, kind: output, shape index: {}]  }
   0x1   :  { %v1453_v0 = vld [vmem:[%s2037_s1] sm:$0xff]   ;;  %v1454_v1 = vld [vmem:[%s2037_s1 + $0x8] sm:$0xff]   ;;  %v1455_v2 = vld [vmem:[%s2037_s1 + $0x10] sm:$0xff]  }
   0x2   :  { %1357 = vmatprep.subr.bf16.mxu0 %v1453_v0  ;;  %1437 = vmatprep.subr.bf16.mxu1 %v1453_v0  ;;  %v1456_v3 = vld [vmem:[%s2037_s1 + $0x18] sm:$0xff]   ;;  %v1461_v4 = vld [vmem:[%s2038_s0] sm:$0xff]   ;;  %v1458_v7 = vld [vmem:[%s2037_s1 + $0x28] sm:$0xff]  }
   0x3   :  { %1358 = vmatpush3.bf16.msra.mxu0 %v1453_v0  ;;  %1445 = vmatpush3.bf16.msra.mxu1 %v1453_v0  ;;  %v1462_v5 = vld [vmem:[%s2038_s0 + $0x80] sm:$0xff]   ;;  %v1459_v8 = vld [vmem:[%s2037_s1 + $0x30] sm:$0xff]   ;;  %v1460_v9 = vld [vmem:[%s2037_s1 + $0x38] sm:$0xff]  }
   0x4   :  { %1359 = vmatprep.subr.bf16.mxu0 %v1454_v1  ;;  %1438 = vmatprep.subr.bf16.mxu1 %v1454_v1  ;;  %v1457_v6 = vld [vmem:[%s2037_s1 + $0x20] sm:$0xff]   ;;  %v1463_v10 = vld [vmem:[%s2038_s0 + $0x8] sm:$0xff]   ;;  %v1465_v12 = vld [vmem:[%s2038_s0 + $0x10] sm:$0xff]  }
   0x5   :  { %1373 = vmatprep.mubr.bf16.mxu0 %v1461_v4  ;;  %1405 = vmatprep.mubr.bf16.mxu1 %v1462_v5  ;;  %v1464_v11 = vld [vmem:[%s2038_s0 + $0x88] sm:$0xff]   ;;  %v1466_v13 = vld [vmem:[%s2038_s0 + $0x90] sm:$0xff]   ;;  %v1467_v14 = vld [vmem:[%s2038_s0 + $0x18] sm:$0xff]  }
   0x6   :  { %v1468_v15 = vld [vmem:[%s2038_s0 + $0x98] sm:$0xff]   ;;  %v1469_v16 = vld [vmem:[%s2038_s0 + $0x20] sm:$0xff]   ;;  %v1471_v18 = vld [vmem:[%s2038_s0 + $0x28] sm:$0xff]  }
   0x7   :  { %1360 = vmatpush3.bf16.msra.mxu0 %v1454_v1  ;;  %1446 = vmatpush3.bf16.msra.mxu1 %v1454_v1  ;;  %v1470_v17 = vld [vmem:[%s2038_s0 + $0xa0] sm:$0xff]   ;;  %v1472_v19 = vld [vmem:[%s2038_s0 + $0xa8] sm:$0xff]   ;;  %v1473_v20 = vld [vmem:[%s2038_s0 + $0x30] sm:$0xff]  }
   0x8   :  { %1361 = vmatprep.subr.bf16.mxu0 %v1455_v2  ;;  %1439 = vmatprep.subr.bf16.mxu1 %v1455_v2  ;;  %v1474_v21 = vld [vmem:[%s2038_s0 + $0xb0] sm:$0xff]   ;;  %v1475_v22 = vld [vmem:[%s2038_s0 + $0x38] sm:$0xff]   ;;  %v1477_v24 = vld [vmem:[%s2038_s0 + $0x40] sm:$0xff]  }
   0x9   :  { %v1476_v23 = vld [vmem:[%s2038_s0 + $0xb8] sm:$0xff]   ;;  %v1478_v25 = vld [vmem:[%s2038_s0 + $0xc0] sm:$0xff]   ;;  %v1479_v26 = vld [vmem:[%s2038_s0 + $0x48] sm:$0xff]  }
   0xa   :  { %v1480_v27 = vld [vmem:[%s2038_s0 + $0xc8] sm:$0xff]   ;;  %v1481_v28 = vld [vmem:[%s2038_s0 + $0x50] sm:$0xff]   ;;  %v1483_v30 = vld [vmem:[%s2038_s0 + $0x58] sm:$0xff]  }
   0xb   :  { %1362 = vmatpush3.bf16.msra.mxu0 %v1455_v2  ;;  %1447 = vmatpush3.bf16.msra.mxu1 %v1455_v2  ;;  %v1482_v29 = vld [vmem:[%s2038_s0 + $0xd0] sm:$0xff]   ;;  %v1484_v31 = vld [vmem:[%s2038_s0 + $0xd8] sm:$0xff]   ;;  %v1485_v32 = vld [vmem:[%s2038_s0 + $0x60] sm:$0xff]  }
   0xc   :  { %1363 = vmatprep.subr.bf16.mxu0 %v1456_v3  ;;  %1440 = vmatprep.subr.bf16.mxu1 %v1456_v3  ;;  %v1486_v33 = vld [vmem:[%s2038_s0 + $0xe0] sm:$0xff]   ;;  %v1487_v34 = vld [vmem:[%s2038_s0 + $0x68] sm:$0xff]   ;;  %v1489_v36 = vld [vmem:[%s2038_s0 + $0x70] sm:$0xff]  }
   0xd   :  { %v1488_v35 = vld [vmem:[%s2038_s0 + $0xe8] sm:$0xff]   ;;  %v1490_v37 = vld [vmem:[%s2038_s0 + $0xf0] sm:$0xff]   ;;  %v1491_v38 = vld [vmem:[%s2038_s0 + $0x78] sm:$0xff]  }
   0xe   :  { %v1492_v39 = vld [vmem:[%s2038_s0 + $0xf8] sm:$0xff]   ;;  %v1636_v40 = vld [vmem:[%s2039_s2] ss:$0 sm:$0xff] }
   0xf   :  { %1364 = vmatpush3.bf16.msra.mxu0 %v1456_v3  ;;  %1448 = vmatpush3.bf16.msra.mxu1 %v1456_v3 }
  0x10   :  { %1365 = vmatprep.subr.bf16.mxu0 %v1457_v6  ;;  %1441 = vmatprep.subr.bf16.mxu1 %v1457_v6 }
  0x13   :  { %1366 = vmatpush3.bf16.msra.mxu0 %v1457_v6  ;;  %1449 = vmatpush3.bf16.msra.mxu1 %v1457_v6 }
  0x14   :  { %1367 = vmatprep.subr.bf16.mxu0 %v1458_v7  ;;  %1442 = vmatprep.subr.bf16.mxu1 %v1458_v7 }
  0x17   :  { %1368 = vmatpush3.bf16.msra.mxu0 %v1458_v7  ;;  %1450 = vmatpush3.bf16.msra.mxu1 %v1458_v7 }
  0x18   :  { %1369 = vmatprep.subr.bf16.mxu0 %v1459_v8  ;;  %1443 = vmatprep.subr.bf16.mxu1 %v1459_v8 }
  0x1b   :  { %1370 = vmatpush3.bf16.msra.mxu0 %v1459_v8  ;;  %1451 = vmatpush3.bf16.msra.mxu1 %v1459_v8 }
  0x1c   :  { %1371 = vmatprep.subr.bf16.mxu0 %v1460_v9  ;;  %1444 = vmatprep.subr.bf16.mxu1 %v1460_v9 }
  0x1f   :  { %1372 = vmatpush3.bf16.msra.mxu0 %v1460_v9  ;;  %1452 = vmatpush3.bf16.msra.mxu1 %v1460_v9 }
  0x22   :  { %1374 = vmatmul.mubr.bf16.vlgmr.msra.gmra.mrb[0].mxu0 %v1463_v10  ;;  %1406 = vmatmul.mubr.bf16.vlgmr.msra.gmra.mrb[0].mxu1 %v1464_v11 }
  0x23   :  { %1377 = vmatprep.mubr.bf16.mxu0 %v1465_v12  ;;  %1409 = vmatprep.mubr.bf16.mxu1 %v1466_v13 }
  0x2a   :  { %1378 = vmatmul.mubr.bf16.gmra.mrb[4].mxu0 %v1467_v14  ;;  %1410 = vmatmul.mubr.bf16.gmra.mrb[4].mxu1 %v1468_v15 }
  0x2b   :  { %1381 = vmatprep.mubr.bf16.mxu0 %v1469_v16  ;;  %1413 = vmatprep.mubr.bf16.mxu1 %v1470_v17 }
  0x32   :  { %1382 = vmatmul.mubr.bf16.gmra.mrb[8].mxu0 %v1471_v18  ;;  %1414 = vmatmul.mubr.bf16.gmra.mrb[8].mxu1 %v1472_v19 }
  0x33   :  { %1385 = vmatprep.mubr.bf16.mxu0 %v1473_v20  ;;  %1417 = vmatprep.mubr.bf16.mxu1 %v1474_v21 }
  0x3a   :  { %1386 = vmatmul.mubr.bf16.gmra.mrb[12].mxu0 %v1475_v22  ;;  %1418 = vmatmul.mubr.bf16.gmra.mrb[12].mxu1 %v1476_v23 }
  0x3b   :  { %1389 = vmatprep.mubr.bf16.mxu0 %v1477_v24  ;;  %1421 = vmatprep.mubr.bf16.mxu1 %v1478_v25 }
  0x42   :  { %1390 = vmatmul.mubr.bf16.gmra.mrb[16].mxu0 %v1479_v26  ;;  %1422 = vmatmul.mubr.bf16.gmra.mrb[16].mxu1 %v1480_v27 }
  0x43   :  { %1393 = vmatprep.mubr.bf16.mxu0 %v1481_v28  ;;  %1425 = vmatprep.mubr.bf16.mxu1 %v1482_v29 }
  0x4a   :  { %1394 = vmatmul.mubr.bf16.gmra.mrb[20].mxu0 %v1483_v30  ;;  %1426 = vmatmul.mubr.bf16.gmra.mrb[20].mxu1 %v1484_v31 }
  0x4b   :  { %1397 = vmatprep.mubr.bf16.mxu0 %v1485_v32  ;;  %1429 = vmatprep.mubr.bf16.mxu1 %v1486_v33 }
  0x52   :  { %1398 = vmatmul.mubr.bf16.gmra.mrb[24].mxu0 %v1487_v34  ;;  %1430 = vmatmul.mubr.bf16.gmra.mrb[24].mxu1 %v1488_v35 }
  0x53   :  { %1401 = vmatprep.mubr.bf16.mxu0 %v1489_v36  ;;  %1433 = vmatprep.mubr.bf16.mxu1 %v1490_v37 }
  0x5a   :  { %1402 = vmatmul.mubr.bf16.gmra.mrb[28].mxu0 %v1491_v38  ;;  %1434 = vmatmul.mubr.bf16.gmra.mrb[28].mxu1 %v1492_v39 }
  0xf5   :  { %v1375_v41 = vpop.f32.mrb[0].mxu0  ;;  %v1407_v42 = vpop.f32.mrb[0].mxu1 }
  0xf6   :  { %v385_v43 = vadd.f32 %v1375_v41, %v1636_v40  ;;  %v513_v44 = vadd.f32 %v1407_v42, %v1636_v40  ;;  %v376_v45 = vpop.f32.mrb[1].mxu0  ;;  %v504_v46 = vpop.f32.mrb[1].mxu1 }
  0xf7   :  { %v377_v47 = vadd.f32 %v1636_v40, %v376_v45  ;;  %v505_v48 = vadd.f32 %v1636_v40, %v504_v46  ;;  %v1376_v49 = vpop.f32.mrb[2].mxu0  ;;  %v1408_v50 = vpop.f32.mrb[2].mxu1 }
  0xf8   :  { %vm633_vm1 = vcmp.ge.f32.partialorder %v385_v43, 0.0  ;;  %v697_v51 = vmul.f32 0.1, %v385_v43  ;;  %vm665_vm2 = vcmp.ge.f32.partialorder %v513_v44, 0.0  ;;  %v729_v52 = vmul.f32 0.1, %v513_v44 }
  0xf9   :  { %vm631_vm3 = vcmp.ge.f32.partialorder %v377_v47, 0.0  ;;  %v695_v53 = vmul.f32 0.1, %v377_v47  ;;  %vm663_vm4 = vcmp.ge.f32.partialorder %v505_v48, 0.0  ;;  %v727_v54 = vmul.f32 0.1, %v505_v48 }
  0xfa   :  { %v761_v55 = vsel %vm633_vm1, %v385_v43, %v697_v51  ;;  %v793_v56 = vsel %vm665_vm2, %v513_v44, %v729_v52  ;;  %v388_v57 = vadd.f32 %v1376_v49, %v1636_v40  ;;  %v516_v58 = vadd.f32 %v1408_v50, %v1636_v40  ;;  %v379_v59 = vpop.f32.mrb[3].mxu0  ;;  %v507_v60 = vpop.f32.mrb[3].mxu1 }
  0xfb   :  { %v1255_v61 = vpack.c.bf16 %v761_v55, %v761_v55  ;;  %v1287_v62 = vpack.c.bf16 %v793_v56, %v793_v56  ;;  %v759_v63 = vsel %vm631_vm3, %v377_v47, %v695_v53  ;;  %v791_v0 = vsel %vm663_vm4, %v505_v48, %v727_v54 }
  0xfc   :  { %v1253_v1 = vpack.c.bf16 %v759_v63, %v759_v63  ;;  %v1285_v2 = vpack.c.bf16 %v791_v0, %v791_v0  ;;  %vm634_vm5 = vcmp.ge.f32.partialorder %v388_v57, 0.0  ;;  %v698_v3 = vmul.f32 0.1, %v388_v57 }
  0xfd   :  { %1082 = vst.msk [vmem:[%s2040_s3 + $0x8] sm:$0xf] %vm1079_vm0, %v1255_v61  ;;  %1114 = vst.msk [vmem:[%s2040_s3 + $0x88] sm:$0xf] %vm1079_vm0, %v1287_v62  ;;  %vm666_vm6 = vcmp.ge.f32.partialorder %v516_v58, 0.0  ;;  %v380_v5 = vadd.f32 %v1636_v40, %v379_v59  ;;  %v508_v6 = vadd.f32 %v1636_v40, %v507_v60  ;;  %v1379_v7 = vpop.f32.mrb[4].mxu0 }
  0xfe   :  { %v730_v4 = vmul.f32 0.1, %v516_v58  ;;  %v1411_v8 = vpop.f32.mrb[4].mxu1  ;;  %1080 = vst.msk [vmem:[%s2040_s3] sm:$0xf] %vm1079_vm0, %v1253_v1  ;;  %v762_v9 = vsel %vm634_vm5, %v388_v57, %v698_v3  ;;  %v401_v10 = vadd.f32 %v1379_v7, %v1636_v40  ;;  %v392_v12 = vpop.f32.mrb[5].mxu0 }
  0xff   :  { %1112 = vst.msk [vmem:[%s2040_s3 + $0x80] sm:$0xf] %vm1079_vm0, %v1285_v2  ;;  %v529_v11 = vadd.f32 %v1411_v8, %v1636_v40  ;;  %v520_v13 = vpop.f32.mrb[5].mxu1  ;;  %v1256_v14 = vpack.c.bf16 %v762_v9, %v762_v9  ;;  %vm632_vm7 = vcmp.ge.f32.partialorder %v380_v5, 0.0  ;;  %v696_v16 = vmul.f32 0.1, %v380_v5 }
 0x100   :  { %v794_v15 = vsel %vm666_vm6, %v516_v58, %v730_v4  ;;  %v1380_v17 = vpop.f32.mrb[6].mxu0  ;;  %v1412_v18 = vpop.f32.mrb[6].mxu1  ;;  %vm664_vm8 = vcmp.ge.f32.partialorder %v508_v6, 0.0  ;;  %v728_v20 = vmul.f32 0.1, %v508_v6  ;;  %vm637_vm9 = vcmp.ge.f32.partialorder %v401_v10, 0.0 }
 0x101   :  { %v1288_v19 = vpack.c.bf16 %v794_v15, %v794_v15  ;;  %v395_v21 = vpop.f32.mrb[7].mxu0  ;;  %v523_v22 = vpop.f32.mrb[7].mxu1  ;;  %1083 = vst.msk [vmem:[%s2040_s3 + $0xc] sm:$0xf] %vm1079_vm0, %v1256_v14  ;;  %v760_v23 = vsel %vm632_vm7, %v380_v5, %v696_v16  ;;  %v701_v24 = vmul.f32 0.1, %v401_v10  ;;  %v393_v28 = vadd.f32 %v1636_v40, %v392_v12 }
 0x102   :  { %vm669_vm10 = vcmp.ge.f32.partialorder %v529_v11, 0.0  ;;  %v733_v25 = vmul.f32 0.1, %v529_v11  ;;  %v1254_v26 = vpack.c.bf16 %v760_v23, %v760_v23  ;;  %v792_v27 = vsel %vm664_vm8, %v508_v6, %v728_v20 }
 0x103   :  { %1115 = vst.msk [vmem:[%s2040_s3 + $0x8c] sm:$0xf] %vm1079_vm0, %v1288_v19  ;;  %v521_v29 = vadd.f32 %v1636_v40, %v520_v13  ;;  %v1286_v30 = vpack.c.bf16 %v792_v27, %v792_v27  ;;  %v765_v31 = vsel %vm637_vm9, %v401_v10, %v701_v24  ;;  %v404_v33 = vadd.f32 %v1380_v17, %v1636_v40 }
 0x104   :  { %v797_v32 = vsel %vm669_vm10, %v529_v11, %v733_v25  ;;  %1081 = vst.msk [vmem:[%s2040_s3 + $0x4] sm:$0xf] %vm1079_vm0, %v1254_v26  ;;  %v1259_v34 = vpack.c.bf16 %v765_v31, %v765_v31  ;;  %vm635_vm11 = vcmp.ge.f32.partialorder %v393_v28, 0.0  ;;  %v699_v36 = vmul.f32 0.1, %v393_v28 }
 0x105   :  { %v1291_v35 = vpack.c.bf16 %v797_v32, %v797_v32  ;;  %1113 = vst.msk [vmem:[%s2040_s3 + $0x84] sm:$0xf] %vm1079_vm0, %v1286_v30  ;;  %vm667_vm12 = vcmp.ge.f32.partialorder %v521_v29, 0.0  ;;  %v731_v37 = vmul.f32 0.1, %v521_v29  ;;  %vm638_vm13 = vcmp.ge.f32.partialorder %v404_v33, 0.0 }
 0x106   :  { %v702_v38 = vmul.f32 0.1, %v404_v33  ;;  %1086 = vst.msk [vmem:[%s2040_s3 + $0x18] sm:$0xf] %vm1079_vm0, %v1259_v34  ;;  %v763_v39 = vsel %vm635_vm11, %v393_v28, %v699_v36  ;;  %v532_v41 = vadd.f32 %v1412_v18, %v1636_v40  ;;  %v396_v42 = vadd.f32 %v1636_v40, %v395_v21  ;;  %v1383_v44 = vpop.f32.mrb[8].mxu0  ;;  %v1415_v45 = vpop.f32.mrb[8].mxu1 }
 0x107   :  { %1118 = vst.msk [vmem:[%s2040_s3 + $0x98] sm:$0xf] %vm1079_vm0, %v1291_v35  ;;  %v524_v43 = vadd.f32 %v1636_v40, %v523_v22  ;;  %v1257_v46 = vpack.c.bf16 %v763_v39, %v763_v39  ;;  %v795_v47 = vsel %vm667_vm12, %v521_v29, %v731_v37  ;;  %v417_v49 = vadd.f32 %v1383_v44, %v1636_v40  ;;  %v408_v50 = vpop.f32.mrb[9].mxu0  ;;  %v536_v51 = vpop.f32.mrb[9].mxu1 }
 0x108   :  { %v766_v48 = vsel %vm638_vm13, %v404_v33, %v702_v38  ;;  %v1289_v52 = vpack.c.bf16 %v795_v47, %v795_v47  ;;  %vm670_vm14 = vcmp.ge.f32.partialorder %v532_v41, 0.0  ;;  %v734_v54 = vmul.f32 0.1, %v532_v41  ;;  %v1384_v55 = vpop.f32.mrb[10].mxu0  ;;  %v1416_v56 = vpop.f32.mrb[10].mxu1 }
 0x109   :  { %v1260_v53 = vpack.c.bf16 %v766_v48, %v766_v48  ;;  %1084 = vst.msk [vmem:[%s2040_s3 + $0x10] sm:$0xf] %vm1079_vm0, %v1257_v46  ;;  %vm636_vm15 = vcmp.ge.f32.partialorder %v396_v42, 0.0  ;;  %v700_v57 = vmul.f32 0.1, %v396_v42  ;;  %vm668_vm1 = vcmp.ge.f32.partialorder %v524_v43, 0.0 }
 0x10a   :  { %v732_v58 = vmul.f32 0.1, %v524_v43  ;;  %1116 = vst.msk [vmem:[%s2040_s3 + $0x90] sm:$0xf] %vm1079_vm0, %v1289_v52  ;;  %v798_v59 = vsel %vm670_vm14, %v532_v41, %v734_v54  ;;  %vm641_vm2 = vcmp.ge.f32.partialorder %v417_v49, 0.0  ;;  %v545_v61 = vadd.f32 %v1415_v45, %v1636_v40  ;;  %v411_v62 = vpop.f32.mrb[11].mxu0 }
 0x10b   :  { %1087 = vst.msk [vmem:[%s2040_s3 + $0x1c] sm:$0xf] %vm1079_vm0, %v1260_v53  ;;  %v705_v60 = vmul.f32 0.1, %v417_v49  ;;  %v539_v63 = vpop.f32.mrb[11].mxu1  ;;  %v1292_v0 = vpack.c.bf16 %v798_v59, %v798_v59  ;;  %v764_v1 = vsel %vm636_vm15, %v396_v42, %v700_v57  ;;  %v409_v3 = vadd.f32 %v1636_v40, %v408_v50 }
 0x10c   :  { %v796_v2 = vsel %vm668_vm1, %v524_v43, %v732_v58  ;;  %v1258_v4 = vpack.c.bf16 %v764_v1, %v764_v1  ;;  %vm673_vm3 = vcmp.ge.f32.partialorder %v545_v61, 0.0  ;;  %v737_v8 = vmul.f32 0.1, %v545_v61 }
 0x10d   :  { %v1290_v5 = vpack.c.bf16 %v796_v2, %v796_v2  ;;  %v769_v6 = vsel %vm641_vm2, %v417_v49, %v705_v60  ;;  %1119 = vst.msk [vmem:[%s2040_s3 + $0x9c] sm:$0xf] %vm1079_vm0, %v1292_v0  ;;  %vm639_vm4 = vcmp.ge.f32.partialorder %v409_v3, 0.0  ;;  %v703_v9 = vmul.f32 0.1, %v409_v3  ;;  %v1387_v10 = vpop.f32.mrb[12].mxu0 }
 0x10e   :  { %v1263_v7 = vpack.c.bf16 %v769_v6, %v769_v6  ;;  %1085 = vst.msk [vmem:[%s2040_s3 + $0x14] sm:$0xf] %vm1079_vm0, %v1258_v4  ;;  %v537_v11 = vadd.f32 %v1636_v40, %v536_v51  ;;  %v420_v12 = vadd.f32 %v1384_v55, %v1636_v40  ;;  %v548_v13 = vadd.f32 %v1416_v56, %v1636_v40  ;;  %v1419_v15 = vpop.f32.mrb[12].mxu1  ;;  %v424_v16 = vpop.f32.mrb[13].mxu0 }
 0x10f   :  { %1117 = vst.msk [vmem:[%s2040_s3 + $0x94] sm:$0xf] %vm1079_vm0, %v1290_v5  ;;  %v412_v14 = vadd.f32 %v1636_v40, %v411_v62  ;;  %v801_v17 = vsel %vm673_vm3, %v545_v61, %v737_v8  ;;  %v767_v18 = vsel %vm639_vm4, %v409_v3, %v703_v9  ;;  %v540_v19 = vadd.f32 %v1636_v40, %v539_v63  ;;  %v552_v21 = vpop.f32.mrb[13].mxu1  ;;  %v1388_v22 = vpop.f32.mrb[14].mxu0 }
 0x110   :  { %1090 = vst.msk [vmem:[%s2040_s3 + $0x28] sm:$0xf] %vm1079_vm0, %v1263_v7  ;;  %v433_v20 = vadd.f32 %v1387_v10, %v1636_v40  ;;  %v1295_v23 = vpack.c.bf16 %v801_v17, %v801_v17  ;;  %v1261_v24 = vpack.c.bf16 %v767_v18, %v767_v18  ;;  %vm671_vm5 = vcmp.ge.f32.partialorder %v537_v11, 0.0  ;;  %v1420_v26 = vpop.f32.mrb[14].mxu1  ;;  %v427_v27 = vpop.f32.mrb[15].mxu0 }
 0x111   :  { %v735_v25 = vmul.f32 0.1, %v537_v11  ;;  %vm642_vm6 = vcmp.ge.f32.partialorder %v420_v12, 0.0  ;;  %v706_v28 = vmul.f32 0.1, %v420_v12  ;;  %vm674_vm7 = vcmp.ge.f32.partialorder %v548_v13, 0.0 }
 0x112   :  { %v738_v29 = vmul.f32 0.1, %v548_v13  ;;  %1122 = vst.msk [vmem:[%s2040_s3 + $0xa8] sm:$0xf] %vm1079_vm0, %v1295_v23  ;;  %1088 = vst.msk [vmem:[%s2040_s3 + $0x20] sm:$0xf] %vm1079_vm0, %v1261_v24  ;;  %v561_v44 = vadd.f32 %v1419_v15, %v1636_v40  ;;  %v425_v48 = vadd.f32 %v1636_v40, %v424_v16  ;;  %v553_v49 = vadd.f32 %v1636_v40, %v552_v21 }
 0x113   :  { %v799_v30 = vsel %vm671_vm5, %v537_v11, %v735_v25  ;;  %vm640_vm8 = vcmp.ge.f32.partialorder %v412_v14, 0.0  ;;  %v704_v31 = vmul.f32 0.1, %v412_v14  ;;  %vm672_vm9 = vcmp.ge.f32.partialorder %v540_v19, 0.0  ;;  %v555_v32 = vpop.f32.mrb[15].mxu1 }
 0x114   :  { %v1293_v33 = vpack.c.bf16 %v799_v30, %v799_v30  ;;  %v770_v34 = vsel %vm642_vm6, %v420_v12, %v706_v28  ;;  %v802_v35 = vsel %vm674_vm7, %v548_v13, %v738_v29  ;;  %v736_v36 = vmul.f32 0.1, %v540_v19 }
 0x115   :  { %v1264_v37 = vpack.c.bf16 %v770_v34, %v770_v34  ;;  %v1296_v38 = vpack.c.bf16 %v802_v35, %v802_v35  ;;  %v768_v39 = vsel %vm640_vm8, %v412_v14, %v704_v31  ;;  %vm645_vm10 = vcmp.ge.f32.partialorder %v433_v20, 0.0  ;;  %v1391_v45 = vpop.f32.mrb[16].mxu0  ;;  %v1423_v46 = vpop.f32.mrb[16].mxu1 }
 0x116   :  { %1120 = vst.msk [vmem:[%s2040_s3 + $0xa0] sm:$0xf] %vm1079_vm0, %v1293_v33  ;;  %v1262_v41 = vpack.c.bf16 %v768_v39, %v768_v39  ;;  %v800_v42 = vsel %vm672_vm9, %v540_v19, %v736_v36  ;;  %v709_v43 = vmul.f32 0.1, %v433_v20  ;;  %v436_v50 = vadd.f32 %v1388_v22, %v1636_v40  ;;  %v440_v51 = vpop.f32.mrb[17].mxu0  ;;  %v568_v52 = vpop.f32.mrb[17].mxu1 }
 0x117   :  { %1091 = vst.msk [vmem:[%s2040_s3 + $0x2c] sm:$0xf] %vm1079_vm0, %v1264_v37  ;;  %1123 = vst.msk [vmem:[%s2040_s3 + $0xac] sm:$0xf] %vm1079_vm0, %v1296_v38  ;;  %v1294_v47 = vpack.c.bf16 %v800_v42, %v800_v42  ;;  %vm677_vm11 = vcmp.ge.f32.partialorder %v561_v44, 0.0  ;;  %v564_v55 = vadd.f32 %v1420_v26, %v1636_v40  ;;  %v1762_v56 = vpop.f32.mrb[18].mxu0  ;;  %v428_v7 = vadd.f32 %v1636_v40, %v427_v27 }
 0x118   :  { %1089 = vst.msk [vmem:[%s2040_s3 + $0x24] sm:$0xf] %vm1079_vm0, %v1262_v41  ;;  %v773_v53 = vsel %vm645_vm10, %v433_v20, %v709_v43  ;;  %v741_v54 = vmul.f32 0.1, %v561_v44  ;;  %v1764_v57 = vpop.f32.mrb[18].mxu1  ;;  %vm643_vm12 = vcmp.ge.f32.partialorder %v425_v48, 0.0  ;;  %v556_v11 = vadd.f32 %v1636_v40, %v555_v32 }
 0x119   :  { %1121 = vst.msk [vmem:[%s2040_s3 + $0xa4] sm:$0xf] %vm1079_vm0, %v1294_v47  ;;  %v1267_v58 = vpack.c.bf16 %v773_v53, %v773_v53  ;;  %v707_v59 = vmul.f32 0.1, %v425_v48  ;;  %vm675_vm13 = vcmp.ge.f32.partialorder %v553_v49, 0.0  ;;  %v1770_v60 = vpop.f32.mrb[19].mxu0  ;;  %v449_v14 = vadd.f32 %v1391_v45, %v1636_v40 }
 0x11a   :  { %v1772_v61 = vpop.f32.mrb[19].mxu1  ;;  %v805_v62 = vsel %vm677_vm11, %v561_v44, %v741_v54  ;;  %v739_v63 = vmul.f32 0.1, %v553_v49  ;;  %vm646_vm14 = vcmp.ge.f32.partialorder %v436_v50, 0.0  ;;  %v710_v0 = vmul.f32 0.1, %v436_v50 }
 0x11b   :  { %1094 = vst.msk [vmem:[%s2040_s3 + $0x38] sm:$0xf] %vm1079_vm0, %v1267_v58  ;;  %v1299_v1 = vpack.c.bf16 %v805_v62, %v805_v62  ;;  %v771_v2 = vsel %vm643_vm12, %v425_v48, %v707_v59  ;;  %vm678_vm15 = vcmp.ge.f32.partialorder %v564_v55, 0.0  ;;  %v742_v3 = vmul.f32 0.1, %v564_v55 }
 0x11c   :  { %v1265_v4 = vpack.c.bf16 %v771_v2, %v771_v2  ;;  %v803_v5 = vsel %vm675_vm13, %v553_v49, %v739_v63  ;;  %v774_v6 = vsel %vm646_vm14, %v436_v50, %v710_v0  ;;  %vm644_vm1 = vcmp.ge.f32.partialorder %v428_v7, 0.0 }
 0x11d   :  { %1126 = vst.msk [vmem:[%s2040_s3 + $0xb8] sm:$0xf] %vm1079_vm0, %v1299_v1  ;;  %v1297_v8 = vpack.c.bf16 %v803_v5, %v803_v5  ;;  %v1268_v9 = vpack.c.bf16 %v774_v6, %v774_v6  ;;  %v806_v10 = vsel %vm678_vm15, %v564_v55, %v742_v3  ;;  %v708_v13 = vmul.f32 0.1, %v428_v7  ;;  %v1395_v15 = vpop.f32.mrb[20].mxu0  ;;  %v1427_v16 = vpop.f32.mrb[20].mxu1 }
 0x11e   :  { %1092 = vst.msk [vmem:[%s2040_s3 + $0x30] sm:$0xf] %vm1079_vm0, %v1265_v4  ;;  %v1300_v12 = vpack.c.bf16 %v806_v10, %v806_v10  ;;  %vm676_vm2 = vcmp.ge.f32.partialorder %v556_v11, 0.0  ;;  %v740_v17 = vmul.f32 0.1, %v556_v11  ;;  %v577_v18 = vadd.f32 %v1423_v46, %v1636_v40  ;;  %v456_v20 = vpop.f32.mrb[21].mxu0 }
 0x11f   :  { %1124 = vst.msk [vmem:[%s2040_s3 + $0xb0] sm:$0xf] %vm1079_vm0, %v1297_v8  ;;  %1095 = vst.msk [vmem:[%s2040_s3 + $0x3c] sm:$0xf] %vm1079_vm0, %v1268_v9  ;;  %v441_v19 = vadd.f32 %v1636_v40, %v440_v51  ;;  %v1799_v21 = vpop.f32.mrb[21].mxu1  ;;  %v772_v22 = vsel %vm644_vm1, %v428_v7, %v708_v13  ;;  %vm649_vm3 = vcmp.ge.f32.partialorder %v449_v14, 0.0  ;;  %v569_v24 = vadd.f32 %v1636_v40, %v568_v52 }
 0x120   :  { %1127 = vst.msk [vmem:[%s2040_s3 + $0xbc] sm:$0xf] %vm1079_vm0, %v1300_v12  ;;  %v713_v23 = vmul.f32 0.1, %v449_v14  ;;  %v1806_v25 = vpop.f32.mrb[22].mxu0  ;;  %v1808_v26 = vpop.f32.mrb[22].mxu1  ;;  %v1266_v27 = vpack.c.bf16 %v772_v22, %v772_v22  ;;  %v804_v28 = vsel %vm676_vm2, %v556_v11, %v740_v17  ;;  %v452_v41 = vadd.f32 %v1762_v56, %v1636_v40 }
 0x121   :  { %vm681_vm4 = vcmp.ge.f32.partialorder %v577_v18, 0.0  ;;  %v745_v29 = vmul.f32 0.1, %v577_v18  ;;  %v1810_v30 = vpop.f32.mrb[23].mxu0  ;;  %v1812_v31 = vpop.f32.mrb[23].mxu1  ;;  %v1298_v32 = vpack.c.bf16 %v804_v28, %v804_v28  ;;  %vm647_vm5 = vcmp.ge.f32.partialorder %v441_v19, 0.0 }
 0x122   :  { %v777_v33 = vsel %vm649_vm3, %v449_v14, %v713_v23  ;;  %v711_v34 = vmul.f32 0.1, %v441_v19  ;;  %1093 = vst.msk [vmem:[%s2040_s3 + $0x34] sm:$0xf] %vm1079_vm0, %v1266_v27  ;;  %vm679_vm6 = vcmp.ge.f32.partialorder %v569_v24, 0.0  ;;  %v580_v42 = vadd.f32 %v1764_v57, %v1636_v40 }
 0x123   :  { %v1271_v35 = vpack.c.bf16 %v777_v33, %v777_v33  ;;  %v809_v36 = vsel %vm681_vm4, %v577_v18, %v745_v29  ;;  %v743_v37 = vmul.f32 0.1, %v569_v24  ;;  %1125 = vst.msk [vmem:[%s2040_s3 + $0xb4] sm:$0xf] %vm1079_vm0, %v1298_v32  ;;  %v444_v45 = vadd.f32 %v1636_v40, %v1770_v60 }
 0x124   :  { %v1303_v38 = vpack.c.bf16 %v809_v36, %v809_v36  ;;  %v775_v39 = vsel %vm647_vm5, %v441_v19, %v711_v34  ;;  %v572_v46 = vadd.f32 %v1636_v40, %v1772_v61  ;;  %vm650_vm7 = vcmp.ge.f32.partialorder %v452_v41, 0.0 }
 0x125   :  { %1098 = vst.msk [vmem:[%s2040_s3 + $0x48] sm:$0xf] %vm1079_vm0, %v1271_v35  ;;  %v1269_v43 = vpack.c.bf16 %v775_v39, %v775_v39  ;;  %v807_v44 = vsel %vm679_vm6, %v569_v24, %v743_v37  ;;  %v714_v48 = vmul.f32 0.1, %v452_v41  ;;  %vm682_vm8 = vcmp.ge.f32.partialorder %v580_v42, 0.0  ;;  %v1838_v49 = vpop.f32.mrb[24].mxu0 }
 0x126   :  { %1130 = vst.msk [vmem:[%s2040_s3 + $0xc8] sm:$0xf] %vm1079_vm0, %v1303_v38  ;;  %v1301_v47 = vpack.c.bf16 %v807_v44, %v807_v44  ;;  %v1840_v50 = vpop.f32.mrb[24].mxu1  ;;  %v746_v51 = vmul.f32 0.1, %v580_v42  ;;  %vm648_vm9 = vcmp.ge.f32.partialorder %v444_v45, 0.0  ;;  %v465_v55 = vadd.f32 %v1395_v15, %v1636_v40 }
 0x127   :  { %1096 = vst.msk [vmem:[%s2040_s3 + $0x40] sm:$0xf] %vm1079_vm0, %v1269_v43  ;;  %v712_v52 = vmul.f32 0.1, %v444_v45  ;;  %vm680_vm10 = vcmp.ge.f32.partialorder %v572_v46, 0.0  ;;  %v778_v53 = vsel %vm650_vm7, %v452_v41, %v714_v48  ;;  %v593_v56 = vadd.f32 %v1427_v16, %v1636_v40  ;;  %v1852_v57 = vpop.f32.mrb[25].mxu0 }
 0x128   :  { %1128 = vst.msk [vmem:[%s2040_s3 + $0xc0] sm:$0xf] %vm1079_vm0, %v1301_v47  ;;  %v744_v54 = vmul.f32 0.1, %v572_v46  ;;  %v1854_v58 = vpop.f32.mrb[25].mxu1  ;;  %v1272_v59 = vpack.c.bf16 %v778_v53, %v778_v53  ;;  %v810_v60 = vsel %vm682_vm8, %v580_v42, %v746_v51  ;;  %v457_v62 = vadd.f32 %v1636_v40, %v456_v20  ;;  %v1858_v63 = vpop.f32.mrb[26].mxu0 }
 0x129   :  { %v776_v61 = vsel %vm648_vm9, %v444_v45, %v712_v52  ;;  %v1860_v0 = vpop.f32.mrb[26].mxu1  ;;  %v1304_v1 = vpack.c.bf16 %v810_v60, %v810_v60  ;;  %vm653_vm11 = vcmp.ge.f32.partialorder %v465_v55, 0.0  ;;  %v1863_v4 = vpop.f32.mrb[27].mxu0  ;;  %v717_v7 = vmul.f32 0.1, %v465_v55 }
 0x12a   :  { %v1270_v2 = vpack.c.bf16 %v776_v61, %v776_v61  ;;  %v808_v3 = vsel %vm680_vm10, %v572_v46, %v744_v54  ;;  %v1865_v5 = vpop.f32.mrb[27].mxu1  ;;  %1099 = vst.msk [vmem:[%s2040_s3 + $0x4c] sm:$0xf] %vm1079_vm0, %v1272_v59  ;;  %vm685_vm12 = vcmp.ge.f32.partialorder %v593_v56, 0.0  ;;  %v749_v8 = vmul.f32 0.1, %v593_v56 }
 0x12b   :  { %v1302_v6 = vpack.c.bf16 %v808_v3, %v808_v3  ;;  %1131 = vst.msk [vmem:[%s2040_s3 + $0xcc] sm:$0xf] %vm1079_vm0, %v1304_v1  ;;  %vm651_vm13 = vcmp.ge.f32.partialorder %v457_v62, 0.0  ;;  %v715_v9 = vmul.f32 0.1, %v457_v62  ;;  %v585_v10 = vadd.f32 %v1636_v40, %v1799_v21 }
 0x12c   :  { %1097 = vst.msk [vmem:[%s2040_s3 + $0x44] sm:$0xf] %vm1079_vm0, %v1270_v2  ;;  %v468_v11 = vadd.f32 %v1806_v25, %v1636_v40  ;;  %v781_v12 = vsel %vm653_vm11, %v465_v55, %v717_v7  ;;  %v813_v13 = vsel %vm685_vm12, %v593_v56, %v749_v8  ;;  %v596_v14 = vadd.f32 %v1808_v26, %v1636_v40 }
 0x12d   :  { %1129 = vst.msk [vmem:[%s2040_s3 + $0xc4] sm:$0xf] %vm1079_vm0, %v1302_v6  ;;  %v460_v15 = vadd.f32 %v1636_v40, %v1810_v30  ;;  %v1275_v16 = vpack.c.bf16 %v781_v12, %v781_v12  ;;  %v1307_v17 = vpack.c.bf16 %v813_v13, %v813_v13  ;;  %v779_v18 = vsel %vm651_vm13, %v457_v62, %v715_v9  ;;  %v1891_v19 = vpop.f32.mrb[28].mxu0  ;;  %v1893_v20 = vpop.f32.mrb[28].mxu1 }
 0x12e   :  { %vm683_vm14 = vcmp.ge.f32.partialorder %v585_v10, 0.0  ;;  %v1273_v21 = vpack.c.bf16 %v779_v18, %v779_v18  ;;  %v747_v22 = vmul.f32 0.1, %v585_v10  ;;  %vm654_vm15 = vcmp.ge.f32.partialorder %v468_v11, 0.0  ;;  %v1895_v24 = vpop.f32.mrb[29].mxu0  ;;  %v1913_v32 = vpop.f32.mrb[29].mxu1 }
 0x12f   :  { %v718_v23 = vmul.f32 0.1, %v468_v11  ;;  %1102 = vst.msk [vmem:[%s2040_s3 + $0x58] sm:$0xf] %vm1079_vm0, %v1275_v16  ;;  %1134 = vst.msk [vmem:[%s2040_s3 + $0xd8] sm:$0xf] %vm1079_vm0, %v1307_v17  ;;  %v588_v29 = vadd.f32 %v1636_v40, %v1812_v31  ;;  %v481_v30 = vadd.f32 %v1838_v49, %v1636_v40  ;;  %v609_v45 = vadd.f32 %v1840_v50, %v1636_v40 }
 0x130   :  { %vm686_vm1 = vcmp.ge.f32.partialorder %v596_v14, 0.0  ;;  %v750_v25 = vmul.f32 0.1, %v596_v14  ;;  %vm652_vm2 = vcmp.ge.f32.partialorder %v460_v15, 0.0  ;;  %v716_v26 = vmul.f32 0.1, %v460_v15 }
 0x131   :  { %1100 = vst.msk [vmem:[%s2040_s3 + $0x50] sm:$0xf] %vm1079_vm0, %v1273_v21  ;;  %v811_v27 = vsel %vm683_vm14, %v585_v10, %v747_v22  ;;  %v782_v28 = vsel %vm654_vm15, %v468_v11, %v718_v23  ;;  %v1915_v33 = vpop.f32.mrb[30].mxu0  ;;  %v1917_v38 = vpop.f32.mrb[30].mxu1  ;;  %vm684_vm3 = vcmp.ge.f32.partialorder %v588_v29, 0.0  ;;  %vm657_vm4 = vcmp.ge.f32.partialorder %v481_v30, 0.0 }
 0x132   :  { %v1305_v34 = vpack.c.bf16 %v811_v27, %v811_v27  ;;  %v1276_v35 = vpack.c.bf16 %v782_v28, %v782_v28  ;;  %v814_v36 = vsel %vm686_vm1, %v596_v14, %v750_v25  ;;  %v780_v37 = vsel %vm652_vm2, %v460_v15, %v716_v26  ;;  %v1919_v39 = vpop.f32.mrb[31].mxu0  ;;  %v1921_v31 = vpop.f32.mrb[31].mxu1 }
 0x133   :  { %v1308_v41 = vpack.c.bf16 %v814_v36, %v814_v36  ;;  %v1274_v42 = vpack.c.bf16 %v780_v37, %v780_v37  ;;  %v748_v43 = vmul.f32 0.1, %v588_v29  ;;  %v721_v44 = vmul.f32 0.1, %v481_v30 }
 0x134   :  { %1132 = vst.msk [vmem:[%s2040_s3 + $0xd0] sm:$0xf] %vm1079_vm0, %v1305_v34  ;;  %1103 = vst.msk [vmem:[%s2040_s3 + $0x5c] sm:$0xf] %vm1079_vm0, %v1276_v35  ;;  %v473_v46 = vadd.f32 %v1636_v40, %v1852_v57  ;;  %v601_v48 = vadd.f32 %v1636_v40, %v1854_v58  ;;  %v484_v49 = vadd.f32 %v1858_v63, %v1636_v40  ;;  %vm689_vm5 = vcmp.ge.f32.partialorder %v609_v45, 0.0 }
 0x135   :  { %1135 = vst.msk [vmem:[%s2040_s3 + $0xdc] sm:$0xf] %vm1079_vm0, %v1308_v41  ;;  %1101 = vst.msk [vmem:[%s2040_s3 + $0x54] sm:$0xf] %vm1079_vm0, %v1274_v42  ;;  %v812_v47 = vsel %vm684_vm3, %v588_v29, %v748_v43  ;;  %v612_v50 = vadd.f32 %v1860_v0, %v1636_v40  ;;  %v785_v52 = vsel %vm657_vm4, %v481_v30, %v721_v44  ;;  %v753_v53 = vmul.f32 0.1, %v609_v45 }
 0x136   :  { %v1306_v51 = vpack.c.bf16 %v812_v47, %v812_v47  ;;  %v1279_v54 = vpack.c.bf16 %v785_v52, %v785_v52  ;;  %vm655_vm6 = vcmp.ge.f32.partialorder %v473_v46, 0.0  ;;  %v719_v55 = vmul.f32 0.1, %v473_v46 }
 0x137   :  { %vm687_vm7 = vcmp.ge.f32.partialorder %v601_v48, 0.0  ;;  %v817_v56 = vsel %vm689_vm5, %v609_v45, %v753_v53  ;;  %v751_v57 = vmul.f32 0.1, %v601_v48  ;;  %vm658_vm8 = vcmp.ge.f32.partialorder %v484_v49, 0.0 }
 0x138   :  { %1133 = vst.msk [vmem:[%s2040_s3 + $0xd4] sm:$0xf] %vm1079_vm0, %v1306_v51  ;;  %v722_v58 = vmul.f32 0.1, %v484_v49  ;;  %1106 = vst.msk [vmem:[%s2040_s3 + $0x68] sm:$0xf] %vm1079_vm0, %v1279_v54  ;;  %v1311_v59 = vpack.c.bf16 %v817_v56, %v817_v56  ;;  %v783_v60 = vsel %vm655_vm6, %v473_v46, %v719_v55  ;;  %v476_v1 = vadd.f32 %v1636_v40, %v1863_v4 }
 0x139   :  { %vm690_vm9 = vcmp.ge.f32.partialorder %v612_v50, 0.0  ;;  %v754_v61 = vmul.f32 0.1, %v612_v50  ;;  %v1277_v62 = vpack.c.bf16 %v783_v60, %v783_v60  ;;  %v815_v63 = vsel %vm687_vm7, %v601_v48, %v751_v57 }
 0x13a   :  { %v786_v0 = vsel %vm658_vm8, %v484_v49, %v722_v58  ;;  %1138 = vst.msk [vmem:[%s2040_s3 + $0xe8] sm:$0xf] %vm1079_vm0, %v1311_v59  ;;  %v1309_v2 = vpack.c.bf16 %v815_v63, %v815_v63  ;;  %v604_v7 = vadd.f32 %v1636_v40, %v1865_v5  ;;  %vm656_vm10 = vcmp.ge.f32.partialorder %v476_v1, 0.0 }
 0x13b   :  { %v1280_v3 = vpack.c.bf16 %v786_v0, %v786_v0  ;;  %v818_v6 = vsel %vm690_vm9, %v612_v50, %v754_v61  ;;  %1104 = vst.msk [vmem:[%s2040_s3 + $0x60] sm:$0xf] %vm1079_vm0, %v1277_v62  ;;  %v720_v9 = vmul.f32 0.1, %v476_v1  ;;  %v497_v4 = vadd.f32 %v1891_v19, %v1636_v40 }
 0x13c   :  { %v1312_v8 = vpack.c.bf16 %v818_v6, %v818_v6  ;;  %1136 = vst.msk [vmem:[%s2040_s3 + $0xe0] sm:$0xf] %vm1079_vm0, %v1309_v2  ;;  %vm688_vm11 = vcmp.ge.f32.partialorder %v604_v7, 0.0  ;;  %v752_v5 = vmul.f32 0.1, %v604_v7  ;;  %v625_v10 = vadd.f32 %v1893_v20, %v1636_v40 }
 0x13d   :  { %1107 = vst.msk [vmem:[%s2040_s3 + $0x6c] sm:$0xf] %vm1079_vm0, %v1280_v3  ;;  %v489_v11 = vadd.f32 %v1636_v40, %v1895_v24  ;;  %v784_v12 = vsel %vm656_vm10, %v476_v1, %v720_v9  ;;  %vm661_vm12 = vcmp.ge.f32.partialorder %v497_v4, 0.0  ;;  %v725_v13 = vmul.f32 0.1, %v497_v4 }
 0x13e   :  { %1139 = vst.msk [vmem:[%s2040_s3 + $0xec] sm:$0xf] %vm1079_vm0, %v1312_v8  ;;  %v617_v14 = vadd.f32 %v1636_v40, %v1913_v32  ;;  %v1278_v15 = vpack.c.bf16 %v784_v12, %v784_v12  ;;  %v816_v16 = vsel %vm688_vm11, %v604_v7, %v752_v5  ;;  %vm693_vm13 = vcmp.ge.f32.partialorder %v625_v10, 0.0 }
 0x13f   :  { %v757_v17 = vmul.f32 0.1, %v625_v10  ;;  %v1310_v18 = vpack.c.bf16 %v816_v16, %v816_v16  ;;  %v789_v19 = vsel %vm661_vm12, %v497_v4, %v725_v13  ;;  %vm659_vm14 = vcmp.ge.f32.partialorder %v489_v11, 0.0 }
 0x140   :  { %v723_v20 = vmul.f32 0.1, %v489_v11  ;;  %1105 = vst.msk [vmem:[%s2040_s3 + $0x64] sm:$0xf] %vm1079_vm0, %v1278_v15  ;;  %v1283_v21 = vpack.c.bf16 %v789_v19, %v789_v19  ;;  %vm691_vm15 = vcmp.ge.f32.partialorder %v617_v14, 0.0  ;;  %v500_v26 = vadd.f32 %v1915_v33, %v1636_v40 }
 0x141   :  { %v821_v22 = vsel %vm693_vm13, %v625_v10, %v757_v17  ;;  %v755_v23 = vmul.f32 0.1, %v617_v14  ;;  %1137 = vst.msk [vmem:[%s2040_s3 + $0xe4] sm:$0xf] %vm1079_vm0, %v1310_v18  ;;  %v628_v27 = vadd.f32 %v1917_v38, %v1636_v40  ;;  %v492_v30 = vadd.f32 %v1636_v40, %v1919_v39 }
 0x142   :  { %v1315_v24 = vpack.c.bf16 %v821_v22, %v821_v22  ;;  %v787_v25 = vsel %vm659_vm14, %v489_v11, %v723_v20  ;;  %1110 = vst.msk [vmem:[%s2040_s3 + $0x78] sm:$0xf] %vm1079_vm0, %v1283_v21  ;;  %v620_v32 = vadd.f32 %v1636_v40, %v1921_v31  ;;  %vm662_vm1 = vcmp.ge.f32.partialorder %v500_v26, 0.0 }
 0x143   :  { %v1281_v28 = vpack.c.bf16 %v787_v25, %v787_v25  ;;  %v819_v29 = vsel %vm691_vm15, %v617_v14, %v755_v23  ;;  %v726_v34 = vmul.f32 0.1, %v500_v26  ;;  %vm694_vm2 = vcmp.ge.f32.partialorder %v628_v27, 0.0 }
 0x144   :  { %1142 = vst.msk [vmem:[%s2040_s3 + $0xf8] sm:$0xf] %vm1079_vm0, %v1315_v24  ;;  %v1313_v33 = vpack.c.bf16 %v819_v29, %v819_v29  ;;  %v758_v35 = vmul.f32 0.1, %v628_v27  ;;  %vm660_vm3 = vcmp.ge.f32.partialorder %v492_v30, 0.0  ;;  %vm692_vm4 = vcmp.ge.f32.partialorder %v620_v32, 0.0 }
 0x145   :  { %1108 = vst.msk [vmem:[%s2040_s3 + $0x70] sm:$0xf] %vm1079_vm0, %v1281_v28  ;;  %v724_v36 = vmul.f32 0.1, %v492_v30  ;;  %v790_v40 = vsel %vm662_vm1, %v500_v26, %v726_v34  ;;  %v756_v37 = vmul.f32 0.1, %v620_v32 }
 0x146   :  { %1140 = vst.msk [vmem:[%s2040_s3 + $0xf0] sm:$0xf] %vm1079_vm0, %v1313_v33  ;;  %v1284_v38 = vpack.c.bf16 %v790_v40, %v790_v40  ;;  %v822_v39 = vsel %vm694_vm2, %v628_v27, %v758_v35 }
 0x147   :  { %v788_v41 = vsel %vm660_vm3, %v492_v30, %v724_v36  ;;  %v1316_v42 = vpack.c.bf16 %v822_v39, %v822_v39  ;;  %v820_v31 = vsel %vm692_vm4, %v620_v32, %v756_v37 }
 0x148   :  { %v1282_v43 = vpack.c.bf16 %v788_v41, %v788_v41  ;;  %1111 = vst.msk [vmem:[%s2040_s3 + $0x7c] sm:$0xf] %vm1079_vm0, %v1284_v38  ;;  %v1314_v44 = vpack.c.bf16 %v820_v31, %v820_v31 }
 0x149   :  { %1143 = vst.msk [vmem:[%s2040_s3 + $0xfc] sm:$0xf] %vm1079_vm0, %v1316_v42 }
 0x14a   :  { %1109 = vst.msk [vmem:[%s2040_s3 + $0x74] sm:$0xf] %vm1079_vm0, %v1282_v43  ;;  %1141 = vst.msk [vmem:[%s2040_s3 + $0xf4] sm:$0xf] %vm1079_vm0, %v1314_v44 }

// kernel: discriminator_forward.6
= control target key start
LH: loop header
LB: loop body
LE: loop exit
PB: predicated region body
PF: predicated region fallthrough
CT: control target
= control target key end

     0   :  { %s2441_s0 = inlined_call_operand.vmem [shape: bf16[2,64,256], index: 0, kind: input, shape index: {}]   ;;  %s2442_s1 = inlined_call_operand.vmem [shape: bf16[256,32], index: 1, kind: input, shape index: {}]   ;;  %s2443_s2 = inlined_call_operand.vmem [shape: f32[1,32], index: 2, kind: input, shape index: {}]   ;;  %s2444_s3 = inlined_call_operand.vmem [shape: bf16[32,4], index: 3, kind: input, shape index: {}]   ;;  %s2445_s4 = inlined_call_operand.vmem [shape: bf16[32,4], index: 4, kind: input, shape index: {}]   ;;  %s2446_s5 = inlined_call_operand.vmem [shape: bf16[32,32], index: 5, kind: input, shape index: {}]   ;;  %s2447_s6 = inlined_call_operand.vmem [shape: f32[1,4], index: 6, kind: input, shape index: {}]   ;;  %s2448_s7 = inlined_call_operand.vmem [shape: f32[1,4], index: 7, kind: input, shape index: {}]   ;;  %s2449_s8 = inlined_call_operand.vmem [shape: f32[1,32], index: 8, kind: input, shape index: {}]   ;;  %s2450_s9 = inlined_call_operand.<no memory space> [shape: f32[1,1], index: 9, kind: input, shape index: {}]   ;;  %s2451_s10 = inlined_call_operand.vmem [shape: bf16[2,64,32], index: 10, kind: output, shape index: {0}]   ;;  %s2452_s11 = inlined_call_operand.hbm [shape: f32[2,64,64], index: 11, kind: output, shape index: {1}]  }
   0x1   :  { %17 = sst [smem:[#allocation2]] %s2450_s9 }
   0x2   :  { %18 = vsyncpa [#allocation4], 0 }
   0x3   :  { %20 = vsyncpa [#allocation4 + $0x1], 0  ;;  %s2063_s19 = smov 0   ;;  %s2065_s20 = smov 0  }
   0x4   :  { %s2067_s21 = smov 0   ;;  %s2069_s22 = smov 0  }
   0x5 LB: > { %s2084_s9 = sadd.s32 4294967295, %s1995_s22   ;;  %s1501_s23 = sadd.s32 4294967294, %s1995_s22   ;;  %s1995_s22 = sphi %s2069_s22, %s2460_s22   ;;  %s1991_s21 = sphi %s2067_s21, %s2459_s21   ;;  %s1987_s20 = sphi %s2065_s20, %s2458_s20   ;;  %s1983_s19 = sphi %s2063_s19, %s2457_s19  }
   0x6   : > { %s2088_s24 = sadd.s32 1, %s1995_s22   ;;  %s274_s25 = sadd.s32 1, %s1991_s21 }
   0x7   : > { %s271_s26 = ssub.s32 %s1995_s22, %s2088_s24  ;;  %p284_p0 = scmp.ne.s32.totalorder %s1991_s21, %s1987_s20 }
   0x8   : > { %p272_p1 = scmp.eq.s32.totalorder %s271_s26, 0  ;;  %p285_p2 = scmp.eq.s32.totalorder %s2084_s9, 1 }
   0x9   : > { %p290_p3 = scmp.ne.s32.totalorder %s1987_s20, %s1983_s19  ;;  %p291_p4 = scmp.eq.s32.totalorder %s1501_s23, 1 }
   0xa   : > { %s2099_s27 = scalar_select %p272_p1, %s1991_s21, %s274_s25  }
   0xb   : > { %p2101_p5 = por %p285_p2, %p284_p0  ;;  %p2105_p6 = por %p291_p4, %p290_p3 }
   0xc   : > { %p1504_p7 = scmp.ge.s32.totalorder %s1995_s22, 1  ;;  %p344_p8 = scmp.lt.s32.totalorder %s1995_s22, 3 }
   0xe   : > { %p345_p9 = pnand %p1504_p7, %p344_p8 }
   0xf   : > { %v1867_v0 = vld [vmem:[%s2442_s1 + $0x40] sm:$0xff] (!%p345_p9)   ;;  %v1869_v2 = vld [vmem:[%s2442_s1 + $0x48] sm:$0xff] (!%p345_p9)   ;;  %p389_p10 = scmp.lt.s32.totalorder (!%p345_p9), %s2084_s9, 1  ;;  %v1871_v4 = vld [vmem:[%s2442_s1 + $0x50] sm:$0xff] (!%p345_p9)   ;;  %vm699_vm2 = vcmask (!%p345_p9), 261120   ;;  %vm953_vm9 = vcmask (!%p345_p9), 31744  }
  0x10   : > { %348 = sbr.rel (%p345_p9) target bundleno = 1318 (0x526), region = 60  ;;  %v1868_v1 = vld [vmem:[%s2442_s1] sm:$0xff] (!%p345_p9)   ;;  %1604 = vmatprep.subr.bf16.mxu0 (!%p345_p9), %v1867_v0  ;;  %v1870_v3 = vld [vmem:[%s2442_s1 + $0x8] sm:$0xff] (!%p345_p9)   ;;  %v1872_v5 = vld [vmem:[%s2442_s1 + $0x10] sm:$0xff] (!%p345_p9)   ;;  %vm1107_vm11 = vcmask (!%p345_p9), 523264   ;;  %s386_s23 = sand.u32 (!%p345_p9), 1, %s1987_s20  }
  0x11   : > { %1605 = vmatpush3.bf16.msra.mxu0 (!%p345_p9), %v1868_v1  ;;  %v1873_v6 = vld [vmem:[%s2442_s1 + $0x58] sm:$0xff] (!%p345_p9)   ;;  %v1875_v8 = vld [vmem:[%s2442_s1 + $0x60] sm:$0xff] (!%p345_p9)   ;;  %v1877_v10 = vld [vmem:[%s2442_s1 + $0x68] sm:$0xff] (!%p345_p9)   ;;  %s1603_s26 = sshll.u32 (!%p345_p9), %s2084_s9, 10  ;;  %s2370_s16 = scalar_lea.sflag (!%p345_p9), [#allocation4], %s386_s23 }
  0x12   : > { %1606 = vmatprep.subr.bf16.mxu0 (!%p345_p9), %v1869_v2  ;;  %v1874_v7 = vld [vmem:[%s2442_s1 + $0x18] sm:$0xff] (!%p345_p9)   ;;  %v1876_v9 = vld [vmem:[%s2442_s1 + $0x20] sm:$0xff] (!%p345_p9)   ;;  %v1878_v12 = vld [vmem:[%s2442_s1 + $0x28] sm:$0xff] (!%p345_p9)   ;;  %s2364_s15 = scalar_lea.hbm (!%p345_p9), %s2452_s11, %s1603_s26 }
  0x13   : > { %v1879_v13 = vld [vmem:[%s2442_s1 + $0x70] sm:$0xff] (!%p345_p9)   ;;  %v1881_v15 = vld [vmem:[%s2442_s1 + $0x78] sm:$0xff] (!%p345_p9)   ;;  %v1895_v24 = vld [vmem:[%s2444_s3] sm:$0xff] (!%p345_p9)  }
  0x14   : > { %v1880_v14 = vld [vmem:[%s2442_s1 + $0x30] sm:$0xff] (!%p345_p9)   ;;  %v1882_v16 = vld [vmem:[%s2442_s1 + $0x38] sm:$0xff] (!%p345_p9)   ;;  %1694 = vmatprep.subr.bf16.mxu1 (!%p345_p9), %v1895_v24  ;;  %v1896_v25 = vld [vmem:[%s2444_s3 + $0x8] sm:$0xff] (!%p345_p9)  }
  0x15   : > { %1607 = vmatpush3.bf16.msra.mxu0 (!%p345_p9), %v1870_v3  ;;  %1695 = vmatpush3.bf16.msra.mxu1 (!%p345_p9), %v1895_v24  ;;  %v1897_v26 = vld [vmem:[%s2445_s4] sm:$0xff] (!%p345_p9)   ;;  %v1898_v59 = vld [vmem:[%s2445_s4 + $0x8] sm:$0xff] (!%p345_p9)   ;;  %vm2275_vm10 = vmpackc.low (!%p345_p9), %vm953_vm9, %vm953_vm9 }
  0x16   : > { %1608 = vmatprep.subr.bf16.mxu0 (!%p345_p9), %v1871_v4  ;;  %1696 = vmatprep.subr.bf16.mxu1 (!%p345_p9), %v1896_v25  ;;  %v2189_v28 = vld [vmem:[%s2443_s2] ss:$0 sm:$0xff] (!%p345_p9) }
  0x17   : > { %s2131_s12 = scalar_select %p389_p10, %s2084_s9, 1  ;;  %v1899_v0 = vld [vmem:[%s2446_s5] sm:$0xff]  }
  0x18   : > { %s1997_s9 = smov [#allocation3]  }
  0x19   : > { %1609 = vmatpush3.bf16.msra.mxu0 %v1872_v5  ;;  %s1593_s17 = sshll.u32 %s2131_s12, 6  ;;  %1697 = vmatpush3.bf16.msra.mxu1 %v1896_v25 }
  0x1a   : > { %1610 = vmatprep.subr.bf16.mxu0 %v1873_v6  ;;  %s2146_s30 = scalar_lea.vmem %s2441_s0, %s1593_s17  ;;  %1706 = vmatprep.subr.bf16.mxu1 %v1897_v26  ;;  %s1505_s17 = sshll.u32 %s386_s23, 6 }
  0x1b   : > { %v1885_v11 = vld [vmem:[%s2146_s30 + $0x4] ss:$8 sps:$4 sm:$0xff]   ;;  %v1883_v17 = vld [vmem:[%s2146_s30] ss:$8 sps:$4 sm:$0xff]   ;;  %v1886_v18 = vld [vmem:[%s2146_s30 + $0x14] ss:$8 sps:$4 sm:$0xff]  }
  0x1c   : > { %615 = vmatprep.mubr.bf16.mxu0 %v1885_v11  ;;  %v1888_v19 = vld [vmem:[%s2146_s30 + $0x10] ss:$8 sps:$4 sm:$0xff]   ;;  %v1889_v20 = vld [vmem:[%s2146_s30 + $0x24] ss:$8 sps:$4 sm:$0xff]   ;;  %v1891_v21 = vld [vmem:[%s2146_s30 + $0x20] ss:$8 sps:$4 sm:$0xff]  }
  0x1d   : > { %1611 = vmatpush3.bf16.msra.mxu0 %v1874_v7  ;;  %v1892_v22 = vld [vmem:[%s2146_s30 + $0x34] ss:$8 sps:$4 sm:$0xff]   ;;  %v1894_v23 = vld [vmem:[%s2146_s30 + $0x30] ss:$8 sps:$4 sm:$0xff]   ;;  %s2334_s25 = scalar_lea.vmem [#allocation3], %s1505_s17  ;;  %s1937_s17 = sshll.u32 %s1997_s9, 4  ;;  %s1938_s17 = int_to_ptr.vmem [resolvable:$false] %s1937_s17 }
  0x1e   : > { %1612 = vmatprep.subr.bf16.mxu0 %v1875_v8  ;;  %s1414_s13 = sshll.u32 %s2334_s25, 4  ;;  %s2366_s13 = int_to_ptr.vmem [resolvable:$true] %s1414_s13 }
  0x1f   : > { %s1933_s18 = scalar_lea.vmem %s2366_s13, 1024  ;;  %p1940_p0 = scmp.lt.s32.totalorder %s2366_s13, %s1938_s17 }
  0x20   : > { %p1934_p11 = scmp.ne.s32.totalorder %s2366_s13, %s1933_s18 }
  0x21   : > { %1613 = vmatpush3.bf16.msra.mxu0 %v1876_v9 }
  0x22   : > { %1614 = vmatprep.subr.bf16.mxu0 %v1877_v10  ;;  %p1935_p12 = pnand %p1934_p11, %p2101_p5 }
  0x24   : > { %p1936_p13 = pneg %p1935_p12 }
  0x25   : > { %1615 = vmatpush3.bf16.msra.mxu0 %v1878_v12 }
  0x26   : > { %1616 = vmatprep.subr.bf16.mxu0 %v1879_v13 }
  0x29   : > { %1617 = vmatpush3.bf16.msra.mxu0 %v1880_v14 }
  0x2a   : > { %1618 = vmatprep.subr.bf16.mxu0 %v1881_v15 }
  0x2d   : > { %1619 = vmatpush3.bf16.msra.mxu0 %v1882_v16 }
  0x30   : > { %616 = vmatmul.mubr.bf16.vlgmr.msra.gmra.mrb[0].mxu0 %v1883_v17 }
  0x31   : > { %623 = vmatprep.mubr.bf16.mxu0 %v1886_v18  ;;  %v1900_v18 = vld [vmem:[%s2446_s5 + $0x8] sm:$0xff]  }
  0x38   : > { %624 = vmatmul.mubr.bf16.gmra.mrb[4].mxu0 %v1888_v19  ;;  %v2247_v19 = vld [vmem:[%s2447_s6] ss:$0 sm:$0xff] }
  0x39   : > { %631 = vmatprep.mubr.bf16.mxu0 %v1889_v20 }
  0x40   : > { %632 = vmatmul.mubr.bf16.gmra.mrb[8].mxu0 %v1891_v21 }
  0x41   : > { %639 = vmatprep.mubr.bf16.mxu0 %v1892_v22 }
  0x48   : > { %640 = vmatmul.mubr.bf16.gmra.mrb[12].mxu0 %v1894_v23 }
 0x103   : > { %v1620_v27 = vpop.f32.mrb[0].mxu0 }
 0x104   : > { %v1621_v29 = vpop.f32.mrb[1].mxu0 }
 0x105   : > { %v1622_v30 = vadd.f32 %v1621_v29, %v1620_v27  ;;  %v1623_v31 = vpop.f32.mrb[2].mxu0 }
 0x106   : > { %v1624_v32 = vpop.f32.mrb[3].mxu0 }
 0x107   : > { %v618_v33 = vadd.f32 %v1622_v30, %v2189_v28  ;;  %v1625_v34 = vadd.f32 %v1624_v32, %v1623_v31 }
 0x109   : > { %v656_v35 = vmul.f32 0.1, %v618_v33  ;;  %v621_v36 = vadd.f32 %v1625_v34, %v2189_v28  ;;  %vm648_vm0 = vcmp.ge.f32.partialorder %v618_v33, 0.0 }
 0x10b   : > { %vm649_vm1 = vcmp.ge.f32.partialorder %v621_v36, 0.0  ;;  %v657_v37 = vmul.f32 0.1, %v621_v36  ;;  %v1626_v38 = vpop.f32.mrb[4].mxu0  ;;  %v2193_v42 = vsel %vm648_vm0, %v618_v33, %v656_v35  ;;  %v1542_v35 = vld [vmem:[%s2448_s7] ss:$0 sm:$0xff] }
 0x10c   : > { %v1627_v39 = vpop.f32.mrb[5].mxu0 }
 0x10d   : > { %v1628_v40 = vadd.f32 %v1627_v39, %v1626_v38  ;;  %v1629_v41 = vpop.f32.mrb[6].mxu0  ;;  %v2195_v43 = vsel %vm649_vm1, %v621_v36, %v657_v37 }
 0x10e   : > { %v1630_v44 = vpop.f32.mrb[7].mxu0  ;;  %v672_v45 = vpack.c.bf16 %v2195_v43, %v2193_v42 }
 0x10f   : > { %v626_v46 = vadd.f32 %v1628_v40, %v2189_v28  ;;  %v1631_v47 = vadd.f32 %v1630_v44, %v1629_v41 }
 0x110   : > { %1698 = vmatprep.mubr.msk.bf16.mxu1 %vm699_vm2, %v672_v45 }
 0x111   : > { %v658_v48 = vmul.f32 0.1, %v626_v46  ;;  %v629_v49 = vadd.f32 %v1631_v47, %v2189_v28  ;;  %vm650_vm3 = vcmp.ge.f32.partialorder %v626_v46, 0.0 }
 0x113   : > { %vm651_vm4 = vcmp.ge.f32.partialorder %v629_v49, 0.0  ;;  %v659_v50 = vmul.f32 0.1, %v629_v49  ;;  %v1632_v51 = vpop.f32.mrb[8].mxu0  ;;  %v2202_v53 = vsel %vm650_vm3, %v626_v46, %v658_v48 }
 0x114   : > { %v1633_v52 = vpop.f32.mrb[9].mxu0 }
 0x115   : > { %v2204_v54 = vsel %vm651_vm4, %v629_v49, %v659_v50  ;;  %v1634_v55 = vadd.f32 %v1633_v52, %v1632_v51  ;;  %v1635_v56 = vpop.f32.mrb[10].mxu0 }
 0x116   : > { %v1636_v57 = vpop.f32.mrb[11].mxu0  ;;  %v673_v58 = vpack.c.bf16 %v2204_v54, %v2202_v53 }
 0x117   : > { %v634_v60 = vadd.f32 %v1634_v55, %v2189_v28  ;;  %v1637_v61 = vadd.f32 %v1636_v57, %v1635_v56 }
 0x118   : > { %1699 = vmatmul.mubr.msk.bf16.vlgmr.msra.gmra.mrb[0].mxu1 %vm699_vm2, %v673_v58 }
 0x119   : > { %v660_v62 = vmul.f32 0.1, %v634_v60  ;;  %v637_v63 = vadd.f32 %v1637_v61, %v2189_v28  ;;  %1707 = vmatpush3.bf16.msra.mxu1 %v1897_v26  ;;  %vm652_vm5 = vcmp.ge.f32.partialorder %v634_v60, 0.0  ;;  %v1549_v61 = vld [vmem:[%s2449_s8] ss:$0 sm:$0xff] }
 0x11a   : > { %1708 = vmatprep.subr.bf16.mxu1 %v1898_v59 }
 0x11b   : > { %vm653_vm6 = vcmp.ge.f32.partialorder %v637_v63, 0.0  ;;  %v661_v1 = vmul.f32 0.1, %v637_v63  ;;  %v1638_v2 = vpop.f32.mrb[12].mxu0  ;;  %v2217_v4 = vsel %vm652_vm5, %v634_v60, %v660_v62 }
 0x11c   : > { %v1639_v3 = vpop.f32.mrb[13].mxu0 }
 0x11d   : > { %v2219_v5 = vsel %vm653_vm6, %v637_v63, %v661_v1  ;;  %v1640_v6 = vadd.f32 %v1639_v3, %v1638_v2  ;;  %v1641_v7 = vpop.f32.mrb[14].mxu0  ;;  %1709 = vmatpush3.bf16.msra.mxu1 %v1898_v59 }
 0x11e   : > { %v1642_v8 = vpop.f32.mrb[15].mxu0  ;;  %v674_v9 = vpack.c.bf16 %v2219_v5, %v2217_v4  ;;  %1718 = vmatprep.subr.bf16.mxu1 %v1899_v0 }
 0x11f   : > { %v642_v10 = vadd.f32 %v1640_v6, %v2189_v28  ;;  %v1643_v11 = vadd.f32 %v1642_v8, %v1641_v7 }
 0x120   : > { %1702 = vmatprep.mubr.msk.bf16.mxu1 %vm699_vm2, %v674_v9 }
 0x121   : > { %v662_v12 = vmul.f32 0.1, %v642_v10  ;;  %v645_v13 = vadd.f32 %v1643_v11, %v2189_v28  ;;  %vm654_vm7 = vcmp.ge.f32.partialorder %v642_v10, 0.0 }
 0x123   : > { %vm655_vm8 = vcmp.ge.f32.partialorder %v645_v13, 0.0  ;;  %v663_v14 = vmul.f32 0.1, %v645_v13  ;;  %v2226_v15 = vsel %vm654_vm7, %v642_v10, %v662_v12 }
 0x125   : > { %v2228_v16 = vsel %vm655_vm8, %v645_v13, %v663_v14 }
 0x126   : > { %v675_v17 = vpack.c.bf16 %v2228_v16, %v2226_v15 }
 0x128   : > { %1703 = vmatmul.mubr.msk.bf16.gmra.mrb[4].mxu1 %vm699_vm2, %v675_v17 }
 0x129   : > { %1710 = vmatprep.mubr.msk.bf16.mxu1 %vm699_vm2, %v672_v45 }
 0x130   : > { %1711 = vmatmul.mubr.msk.bf16.vlgmr.msra.gmra.mrb[8].mxu1 %vm699_vm2, %v673_v58 }
 0x131   : > { %1714 = vmatprep.mubr.msk.bf16.mxu1 %vm699_vm2, %v674_v9  ;;  %1719 = vmatpush3.bf16.msra.mxu1 %v1899_v0 }
 0x132   : > { %1720 = vmatprep.subr.bf16.mxu1 %v1900_v18 }
 0x135   : > { %1721 = vmatpush3.bf16.msra.mxu1 %v1900_v18 }
 0x138   : > { %1715 = vmatmul.mubr.msk.bf16.gmra.mrb[12].mxu1 %vm699_vm2, %v675_v17 }
 0x139   : > { %1722 = vmatprep.mubr.msk.bf16.mxu1 %vm699_vm2, %v672_v45 }
 0x140   : > { %1723 = vmatmul.mubr.msk.bf16.vlgmr.msra.gmra.mrb[16].mxu1 %vm699_vm2, %v673_v58 }
 0x141   : > { %1726 = vmatprep.mubr.msk.bf16.mxu1 %vm699_vm2, %v674_v9 }
 0x148   : > { %1727 = vmatmul.mubr.msk.bf16.gmra.mrb[20].mxu1 %vm699_vm2, %v675_v17 }
 0x1eb   : > { %v2249_v20 = vpop.f32.mrb[0].mxu1 }
 0x1ec   : > { %v746_v21 = vpop.f32.mrb[1].mxu1 }
 0x1ed   : > { %v747_v22 = vadd.f32 %v2247_v19, %v746_v21  ;;  %v1701_v23 = vpop.f32.mrb[2].mxu1 }
 0x1ee   : > { %v2253_v24 = vadd.f32 %v1701_v23, %v2247_v19  ;;  %v2255_v25 = vpop.f32.mrb[3].mxu1 }
 0x1ef   : > { %1746 = vmatprep.mubr.msk.f32.mxu0 %vm953_vm9, %v747_v22  ;;  %v750_v23 = vadd.f32 %v2247_v19, %v2255_v25 }
 0x1fb   : > { %v1704_v26 = vpop.f32.mrb[4].mxu1 }
 0x1fc   : > { %v2259_v27 = vadd.f32 %v1704_v26, %v2247_v19  ;;  %v762_v28 = vpop.f32.mrb[5].mxu1  ;;  %v755_v26 = vadd.f32 %v2249_v20, %v2247_v19 }
 0x1fd   : > { %v2262_v29 = vadd.f32 %v2247_v19, %v762_v28  ;;  %v1705_v30 = vpop.f32.mrb[6].mxu1 }
 0x1fe   : > { %v2265_v31 = vadd.f32 %v1705_v30, %v2247_v19  ;;  %v765_v32 = vpop.f32.mrb[7].mxu1 }
 0x1ff   : > { %v2268_v33 = vadd.f32 %v2247_v19, %v765_v32 }
 0x203   : > { %v1712_v34 = vpop.f32.mrb[8].mxu1 }
 0x204   : > { %v834_v36 = vpop.f32.mrb[9].mxu1  ;;  %v843_v38 = vadd.f32 %v1712_v34, %v1542_v35 }
 0x205   : > { %v1713_v37 = vpop.f32.mrb[10].mxu1  ;;  %v835_v41 = vadd.f32 %v1542_v35, %v834_v36 }
 0x206   : > { %v846_v39 = vadd.f32 %v1713_v37, %v1542_v35  ;;  %v837_v40 = vpop.f32.mrb[11].mxu1 }
 0x207   : > { %v838_v44 = vadd.f32 %v1542_v35, %v837_v40 }
 0x208   : > { %v1792_v45 = vpack.c.bf16 %v846_v39, %v843_v38 }
 0x209   : > { %v1786_v47 = vpack.c.bf16 %v838_v44, %v835_v41 }
 0x20b   : > { %v1716_v48 = vpop.f32.mrb[12].mxu1  ;;  %1788 = vmatprep.subr.msk.bf16.mxu0 %vm2275_vm10, %v1786_v47 }
 0x20c   : > { %v850_v49 = vpop.f32.mrb[13].mxu1  ;;  %1791 = vmatpush3.bf16.xpose.msk.msra.mxu0 %vm2275_vm10, %v1786_v47  ;;  %v859_v51 = vadd.f32 %v1716_v48, %v1542_v35 }
 0x20d   : > { %v1717_v50 = vpop.f32.mrb[14].mxu1  ;;  %1794 = vmatprep.subr.msk.bf16.mxu0 %vm2275_vm10, %v1792_v45  ;;  %v851_v56 = vadd.f32 %v1542_v35, %v850_v49 }
 0x20e   : > { %v862_v52 = vadd.f32 %v1717_v50, %v1542_v35  ;;  %v853_v55 = vpop.f32.mrb[15].mxu1 }
 0x20f   : > { %v854_v57 = vadd.f32 %v1542_v35, %v853_v55 }
 0x210   : > { %v1804_v58 = vpack.c.bf16 %v862_v52, %v859_v51 }
 0x211   : > { %v1798_v59 = vpack.c.bf16 %v854_v57, %v851_v56 }
 0x213   : > { %v1724_v60 = vpop.f32.mrb[16].mxu1 }
 0x214   : > { %v922_v62 = vpop.f32.mrb[17].mxu1  ;;  %1797 = vmatpush3.bf16.xpose.msk.msra.mxu0 %vm2275_vm10, %v1792_v45  ;;  %v931_v0 = vadd.f32 %v1724_v60, %v1549_v61 }
 0x215   : > { %v1725_v63 = vpop.f32.mrb[18].mxu1  ;;  %1800 = vmatprep.subr.msk.bf16.mxu0 %vm2275_vm10, %v1798_v59  ;;  %v923_v3 = vadd.f32 %v1549_v61, %v922_v62 }
 0x216   : > { %v934_v1 = vadd.f32 %v1725_v63, %v1549_v61  ;;  %v925_v2 = vpop.f32.mrb[19].mxu1 }
 0x217   : > { %v926_v6 = vadd.f32 %v1549_v61, %v925_v2 }
 0x218   : > { %v1814_v7 = vpack.c.bf16 %v934_v1, %v931_v0 }
 0x219   : > { %v1810_v8 = vpack.c.bf16 %v926_v6, %v923_v3 }
 0x21b   : > { %v1728_v9 = vpop.f32.mrb[20].mxu1  ;;  %1811 = vmatprep.subr.bf16.mxu1 %v1810_v8 }
 0x21c   : > { %v938_v10 = vpop.f32.mrb[21].mxu1  ;;  %1803 = vmatpush3.bf16.xpose.msk.msra.mxu0 %vm2275_vm10, %v1798_v59  ;;  %1813 = vmatpush3.bf16.msra.mxu1 %v1810_v8  ;;  %v947_v12 = vadd.f32 %v1728_v9, %v1549_v61 }
 0x21d   : > { %v1729_v11 = vpop.f32.mrb[22].mxu1  ;;  %1806 = vmatprep.subr.msk.bf16.mxu0 %vm2275_vm10, %v1804_v58  ;;  %1815 = vmatprep.subr.bf16.mxu1 %v1814_v7  ;;  %v939_v17 = vadd.f32 %v1549_v61, %v938_v10 }
 0x21e   : > { %v950_v13 = vadd.f32 %v1729_v11, %v1549_v61  ;;  %v941_v14 = vpop.f32.mrb[23].mxu1 }
 0x21f   : > { %v942_v18 = vadd.f32 %v1549_v61, %v941_v14 }
 0x220   : > { %v1822_v21 = vpack.c.bf16 %v950_v13, %v947_v12  ;;  %1817 = vmatpush3.bf16.msra.mxu1 %v1814_v7 }
 0x221   : > { %v1818_v22 = vpack.c.bf16 %v942_v18, %v939_v17 }
 0x223   : > { %1819 = vmatprep.subr.bf16.mxu1 %v1818_v22 }
 0x224   : > { %1809 = vmatpush3.bf16.xpose.msk.msra.mxu0 %vm2275_vm10, %v1804_v58  ;;  %1821 = vmatpush3.bf16.msra.mxu1 %v1818_v22 }
 0x225   : > { %1823 = vmatprep.subr.bf16.mxu1 %v1822_v21 }
 0x228   : > { %1825 = vmatpush3.bf16.msra.mxu1 %v1822_v21 }
 0x22b   : > { %1747 = vmatmul.mubr.msk.f32.vlgmr.msra.gmra.mrb[16].mxu0 %vm953_vm9, %v750_v23 }
 0x22c   : > { %1749 = vmatprep.mubr.msk.f32.mxu0 %vm953_vm9, %v755_v26 }
 0x22f   : > { %1750 = vmatmul.mubr.msk.f32.gmra.mrb[18].mxu0 %vm953_vm9, %v2253_v24 }
 0x230   : > { %1752 = vmatprep.mubr.msk.f32.mxu0 %vm953_vm9, %v2262_v29 }
 0x233   : > { %1753 = vmatmul.mubr.msk.f32.gmra.mrb[20].mxu0 %vm953_vm9, %v2268_v33 }
 0x234   : > { %1755 = vmatprep.mubr.msk.f32.mxu0 %vm953_vm9, %v2259_v27 }
 0x237   : > { %1756 = vmatmul.mubr.msk.f32.gmra.mrb[22].mxu0 %vm953_vm9, %v2265_v31 }
 0x2fe   : > { %v1748_v19 = vpop.f32.mrb[16].mxu0 }
 0x2ff   : > { %v1068_v20 = vpop.f32.mrb[17].mxu0  ;;  %v1111_v30 = vsel %vm1107_vm11, %v1748_v19, -inf }
 0x300   : > { %v1108_v25 = vsel %vm1107_vm11, %v1068_v20, -inf }
 0x301   : > { %1109 = vmax.xlane.f32.xlu0 %v1108_v25 }
 0x302   : > { %v1751_v28 = vpop.f32.mrb[18].mxu0 }
 0x303   : > { %v1078_v24 = vpop.f32.mrb[19].mxu0  ;;  %v1117_v27 = vsel %vm1107_vm11, %v1751_v28, -inf }
 0x304   : > { %v1114_v29 = vsel %vm1107_vm11, %v1078_v24, -inf }
 0x305   : > { %1112 = vmax.xlane.f32.xlu0 %v1111_v30  ;;  %1115 = vmax.xlane.f32.xlu1 %v1114_v29 }
 0x306   : > { %v1754_v32 = vpop.f32.mrb[20].mxu0 }
 0x307   : > { %v1088_v33 = vpop.f32.mrb[21].mxu0  ;;  %v1123_v36 = vsel %vm1107_vm11, %v1754_v32, -inf }
 0x308   : > { %v1120_v31 = vsel %vm1107_vm11, %v1088_v33, -inf }
 0x309   : > { %1118 = vmax.xlane.f32.xlu1 %v1117_v27  ;;  %1121 = vmax.xlane.f32.xlu0 %v1120_v31 }
 0x30a   : > { %v1757_v34 = vpop.f32.mrb[22].mxu0 }
 0x30b   : > { %v1098_v35 = vpop.f32.mrb[23].mxu0  ;;  %v1129_v38 = vsel %vm1107_vm11, %v1757_v34, -inf }
 0x30c   : > { %v1126_v37 = vsel %vm1107_vm11, %v1098_v35, -inf }
 0x30d   : > { %1124 = vmax.xlane.f32.xlu1 %v1123_v36  ;;  %1127 = vmax.xlane.f32.xlu0 %v1126_v37 }
 0x311   : > { %1130 = vmax.xlane.f32.xlu1 %v1129_v38 }
 0x38e   : > { %v1110_v39 = vpop.xlane.xlu0 %1109 }
 0x38f   : > { %v1132_v40 = vsub.f32 %v1068_v20, %v1110_v39 }
 0x391   : > { %v1140_v41 = vmul.f32 1.442695, %v1132_v40 }
 0x392   : > { %v1113_v44 = vpop.xlane.xlu0 %1112  ;;  %v1116_v45 = vpop.xlane.xlu1 %1115 }
 0x393   : > { %1901 = vpow2.f32 %v1140_v41  ;;  %v1133_v46 = vsub.f32 %v1748_v19, %v1113_v44  ;;  %v1134_v47 = vsub.f32 %v1078_v24, %v1116_v45 }
 0x395   : > { %v1142_v48 = vmul.f32 1.442695, %v1133_v46  ;;  %v1144_v49 = vmul.f32 1.442695, %v1134_v47 }
 0x396   : > { %v1119_v50 = vpop.xlane.xlu1 %1118  ;;  %v1122_v51 = vpop.xlane.xlu0 %1121 }
 0x397   : > { %1903 = vpow2.f32 %v1142_v48  ;;  %v1135_v52 = vsub.f32 %v1751_v28, %v1119_v50  ;;  %v1136_v55 = vsub.f32 %v1088_v33, %v1122_v51 }
 0x398   : > { %1905 = vpow2.f32 %v1144_v49 }
 0x399   : > { %v1146_v56 = vmul.f32 1.442695, %v1135_v52  ;;  %v1148_v57 = vmul.f32 1.442695, %v1136_v55 }
 0x39a   : > { %v1125_v58 = vpop.xlane.xlu1 %1124  ;;  %v1128_v59 = vpop.xlane.xlu0 %1127 }
 0x39b   : > { %1907 = vpow2.f32 %v1146_v56  ;;  %v1137_v60 = vsub.f32 %v1754_v32, %v1125_v58  ;;  %v1138_v61 = vsub.f32 %v1098_v35, %v1128_v59 }
 0x39c   : > { %1909 = vpow2.f32 %v1148_v57 }
 0x39d   : > { %v1902_v62 = vpop.eup %1901  ;;  %v1150_v63 = vmul.f32 1.442695, %v1137_v60  ;;  %v1152_v0 = vmul.f32 1.442695, %v1138_v61 }
 0x39e   : > { %v1131_v1 = vpop.xlane.xlu1 %1130  ;;  %v1156_v2 = vsel %vm1107_vm11, %v1902_v62, 0.0 }
 0x39f   : > { %1911 = vpow2.f32 %v1150_v63  ;;  %v1139_v3 = vsub.f32 %v1757_v34, %v1131_v1  ;;  %1157 = vadd.xlane.f32.xlu0 %v1156_v2 }
 0x3a0   : > { %1913 = vpow2.f32 %v1152_v0 }
 0x3a1   : > { %v1904_v6 = vpop.eup %1903  ;;  %v1154_v7 = vmul.f32 1.442695, %v1139_v3 }
 0x3a2   : > { %v1906_v8 = vpop.eup %1905  ;;  %v1159_v9 = vsel %vm1107_vm11, %v1904_v6, 0.0 }
 0x3a3   : > { %1915 = vpow2.f32 %v1154_v7  ;;  %1160 = vadd.xlane.f32.xlu1 %v1159_v9  ;;  %v1162_v10 = vsel %vm1107_vm11, %v1906_v8, 0.0 }
 0x3a4   : > { %1163 = vadd.xlane.f32.xlu0 %v1162_v10 }
 0x3a5   : > { %v1908_v11 = vpop.eup %1907 }
 0x3a6   : > { %v1910_v12 = vpop.eup %1909  ;;  %v1165_v13 = vsel %vm1107_vm11, %v1908_v11, 0.0 }
 0x3a7   : > { %1166 = vadd.xlane.f32.xlu1 %v1165_v13  ;;  %v1168_v14 = vsel %vm1107_vm11, %v1910_v12, 0.0 }
 0x3a8   : > { %1169 = vadd.xlane.f32.xlu0 %v1168_v14 }
 0x3a9   : > { %v1912_v17 = vpop.eup %1911 }
 0x3aa   : > { %v1914_v18 = vpop.eup %1913  ;;  %v1171_v21 = vsel %vm1107_vm11, %v1912_v17, 0.0 }
 0x3ab   : > { %1172 = vadd.xlane.f32.xlu1 %v1171_v21  ;;  %v1174_v22 = vsel %vm1107_vm11, %v1914_v18, 0.0 }
 0x3ac   : > { %1175 = vadd.xlane.f32.xlu0 %v1174_v22 }
 0x3ad   : > { %v1916_v23 = vpop.eup %1915 }
 0x3ae   : > { %v1177_v26 = vsel %vm1107_vm11, %v1916_v23, 0.0 }
 0x3af   : > { %1178 = vadd.xlane.f32.xlu1 %v1177_v26 }
 0x42c   : > { %v1158_v19 = vpop.xlane.xlu0 %1157 }
 0x42d   : > { %1917 = vrcp.f32 %v1158_v19 }
 0x430   : > { %v1161_v20 = vpop.xlane.xlu1 %1160 }
 0x431   : > { %1919 = vrcp.f32 %v1161_v20  ;;  %v1164_v25 = vpop.xlane.xlu0 %1163 }
 0x432   : > { %1921 = vrcp.f32 %v1164_v25 }
 0x434   : > { %v1167_v28 = vpop.xlane.xlu1 %1166 }
 0x435   : > { %1923 = vrcp.f32 %v1167_v28  ;;  %v1170_v24 = vpop.xlane.xlu0 %1169 }
 0x436   : > { %1925 = vrcp.f32 %v1170_v24 }
 0x437   : > { %v1918_v30 = vpop.eup %1917 }
 0x438   : > { %v1173_v29 = vpop.xlane.xlu1 %1172  ;;  %v1188_v32 = vmul.f32 %v1918_v30, %v1902_v62 }
 0x439   : > { %1927 = vrcp.f32 %v1173_v29  ;;  %v1176_v33 = vpop.xlane.xlu0 %1175 }
 0x43a   : > { %1929 = vrcp.f32 %v1176_v33  ;;  %1774 = vmatprep.mubr.msk.f32.mxu1 %vm1107_vm11, %v1188_v32  ;;  %1384 = vst.msk [vmem:[%s2334_s25] sm:$0xff] %vm1107_vm11, %v1188_v32 }
 0x43b   : > { %v1920_v27 = vpop.eup %1919 }
 0x43c   : > { %v1922_v31 = vpop.eup %1921  ;;  %v1189_v34 = vmul.f32 %v1920_v27, %v1904_v6  ;;  %v1179_v35 = vpop.xlane.xlu1 %1178 }
 0x43d   : > { %1931 = vrcp.f32 %v1179_v35  ;;  %v1190_v36 = vmul.f32 %v1922_v31, %v1906_v8 }
 0x43e   : > { %1385 = vst.msk [vmem:[%s2334_s25 + $0x8] sm:$0xff] %vm1107_vm11, %v1189_v34  ;;  %1775 = vmatmul.mubr.msk.f32.vlgmr.msra.gmra.mrb[24].mxu1 %vm1107_vm11, %v1189_v34 }
 0x43f   : > { %v1924_v37 = vpop.eup %1923  ;;  %1777 = vmatprep.mubr.msk.f32.mxu1 %vm1107_vm11, %v1190_v36  ;;  %1386 = vst.msk [vmem:[%s2334_s25 + $0x10] sm:$0xff] %vm1107_vm11, %v1190_v36 }
 0x440   : > { %v1926_v38 = vpop.eup %1925  ;;  %v1191_v39 = vmul.f32 %v1924_v37, %v1908_v11 }
 0x441   : > { %v1192_v40 = vmul.f32 %v1926_v38, %v1910_v12 }
 0x442   : > { %1778 = vmatmul.mubr.msk.f32.gmra.mrb[26].mxu1 %vm1107_vm11, %v1191_v39  ;;  %1387 = vst.msk [vmem:[%s2334_s25 + $0x18] sm:$0xff] %vm1107_vm11, %v1191_v39 }
 0x443   : > { %v1928_v41 = vpop.eup %1927  ;;  %1780 = vmatprep.mubr.msk.f32.mxu1 %vm1107_vm11, %v1192_v40  ;;  %1388 = vst.msk [vmem:[%s2334_s25 + $0x20] sm:$0xff] %vm1107_vm11, %v1192_v40 }
 0x444   : > { %v1930_v44 = vpop.eup %1929  ;;  %v1193_v45 = vmul.f32 %v1928_v41, %v1912_v17 }
 0x445   : > { %v1194_v46 = vmul.f32 %v1930_v44, %v1914_v18 }
 0x446   : > { %1781 = vmatmul.mubr.msk.f32.gmra.mrb[28].mxu1 %vm1107_vm11, %v1193_v45  ;;  %1389 = vst.msk [vmem:[%s2334_s25 + $0x28] sm:$0xff] %vm1107_vm11, %v1193_v45 }
 0x447   : > { %v1932_v47 = vpop.eup %1931  ;;  %1783 = vmatprep.mubr.msk.f32.mxu1 %vm1107_vm11, %v1194_v46  ;;  %1390 = vst.msk [vmem:[%s2334_s25 + $0x30] sm:$0xff] %vm1107_vm11, %v1194_v46 }
 0x448   : > { %v1195_v48 = vmul.f32 %v1932_v47, %v1916_v23 }
 0x44a   : > { %1784 = vmatmul.mubr.msk.f32.gmra.mrb[30].mxu1 %vm1107_vm11, %v1195_v48  ;;  %1391 = vst.msk [vmem:[%s2334_s25 + $0x38] sm:$0xff] %vm1107_vm11, %v1195_v48  ;;  %s1939_s25 = scalar_lea.vmem %s1938_s17, 2048 }
 0x44b   : > { %p1941_p1 = scmp.lt.s32.totalorder %s1939_s25, %s1933_s18 }
 0x44d   : > { %p1942_p2 = por %p1941_p1, %p1940_p0 }
 0x44f   : > { %p1943_p3 = pnand %p1942_p2, %p1936_p13 }
 0x451   : > { %1946 = shalt.err (!%p1943_p3)
}
 0x452   : > { %s1947_s23 = scalar_lea.hbm %s2364_s15, 1024  ;;  %s1951_s30 = scalar_lea.hbm %s2452_s11, 2048 }
 0x453   : > { %p1948_p4 = scmp.ne.s32.totalorder %s2364_s15, %s1947_s23  ;;  %p1952_p9 = scmp.lt.u32.totalorder %s2364_s15, %s2452_s11 }
 0x454   : > { %p1953_p10 = scmp.lt.u32.totalorder %s1951_s30, %s1947_s23  ;;  %p1955_p12 = scmp.lt.u32.totalorder %s1947_s23, %s2364_s15 }
 0x455   : > { %p1949_p7 = pnand %p1948_p4, %p2101_p5 }
 0x456   : > { %p1954_p11 = por %p1953_p10, %p1952_p9 }
 0x457   : > { %p1950_p8 = pneg %p1949_p7 }
 0x458   : > { %p1956_p13 = por %p1955_p12, %p1954_p11 }
 0x45a   : > { %p1957_p0 = pnand %p1956_p13, %p1950_p8 }
 0x45c   : > { %1960 = shalt.err (!%p1957_p0)
}
 0x45d   : > { %s1998_s18 = smov 128   ;;  %s1999_s25 = smov 8   ;;  %vm1375_vm12 = vcmask 257024  }
 0x45e   : > { %1826 = dma.vmem_to_hbm [thread:$0]  (%p2101_p5), %s2366_s13, 1024, %s2364_s15, %s2370_s16, %s1998_s18, %s1998_s18, %s1999_s25  }
 0x45f   : > { %s1325_s26 = sld [smem:[#allocation2]]  ;;  %s1594_s14 = sshll.u32 %s2131_s12, 5 }
 0x460   : > { %s2399_s9 = scalar_lea.vmem %s2451_s10, %s1594_s14 }
 0x465   : > { %v1326_v49 = vstv %s1325_s26 }
 0x511   : > { %v1776_v50 = vpop.f32.mrb[24].mxu1 }
 0x512   : > { %v1328_v51 = vmul.f32 %v1776_v50, %v1326_v49  ;;  %v1286_v52 = vpop.f32.mrb[25].mxu1 }
 0x513   : > { %v1327_v55 = vmul.f32 %v1326_v49, %v1286_v52 }
 0x514   : > { %v1336_v56 = vadd.f32 %v1328_v51, %v2195_v43 }
 0x515   : > { %v1335_v57 = vadd.f32 %v1327_v55, %v2193_v42  ;;  %v1779_v58 = vpop.f32.mrb[26].mxu1 }
 0x516   : > { %v1596_v59 = vpack.c.bf16 %v1336_v56, %v1336_v56  ;;  %v1330_v60 = vmul.f32 %v1779_v58, %v1326_v49  ;;  %v1296_v61 = vpop.f32.mrb[27].mxu1 }
 0x517   : > { %v1595_v62 = vpack.c.bf16 %v1335_v57, %v1335_v57  ;;  %v1329_v63 = vmul.f32 %v1326_v49, %v1296_v61 }
 0x518   : > { %1377 = vst.msk [vmem:[%s2399_s9 + $0x4] sm:$0xf] %vm1375_vm12, %v1596_v59  ;;  %v1338_v43 = vadd.f32 %v1330_v60, %v2204_v54 }
 0x519   : > { %1376 = vst.msk [vmem:[%s2399_s9] sm:$0xf] %vm1375_vm12, %v1595_v62  ;;  %v1337_v0 = vadd.f32 %v1329_v63, %v2202_v53  ;;  %v1782_v1 = vpop.f32.mrb[28].mxu1 }
 0x51a   : > { %v1598_v2 = vpack.c.bf16 %v1338_v43, %v1338_v43  ;;  %v1332_v42 = vmul.f32 %v1782_v1, %v1326_v49  ;;  %v1306_v3 = vpop.f32.mrb[29].mxu1 }
 0x51b   : > { %v1597_v6 = vpack.c.bf16 %v1337_v0, %v1337_v0  ;;  %v1331_v7 = vmul.f32 %v1326_v49, %v1306_v3 }
 0x51c   : > { %1379 = vst.msk [vmem:[%s2399_s9 + $0xc] sm:$0xf] %vm1375_vm12, %v1598_v2  ;;  %v1340_v8 = vadd.f32 %v1332_v42, %v2219_v5 }
 0x51d   : > { %1378 = vst.msk [vmem:[%s2399_s9 + $0x8] sm:$0xf] %vm1375_vm12, %v1597_v6  ;;  %v1339_v54 = vadd.f32 %v1331_v7, %v2217_v4  ;;  %v1785_v9 = vpop.f32.mrb[30].mxu1 }
 0x51e   : > { %v1600_v53 = vpack.c.bf16 %v1340_v8, %v1340_v8  ;;  %v1334_v10 = vmul.f32 %v1785_v9, %v1326_v49  ;;  %v1316_v11 = vpop.f32.mrb[31].mxu1 }
 0x51f   : > { %v1599_v12 = vpack.c.bf16 %v1339_v54, %v1339_v54  ;;  %v1333_v13 = vmul.f32 %v1326_v49, %v1316_v11 }
 0x520   : > { %1381 = vst.msk [vmem:[%s2399_s9 + $0x14] sm:$0xf] %vm1375_vm12, %v1600_v53  ;;  %v1342_v14 = vadd.f32 %v1334_v10, %v2228_v16 }
 0x521   : > { %1380 = vst.msk [vmem:[%s2399_s9 + $0x10] sm:$0xf] %vm1375_vm12, %v1599_v12  ;;  %v1341_v17 = vadd.f32 %v1333_v13, %v2226_v15 }
 0x522   : > { %v1602_v5 = vpack.c.bf16 %v1342_v14, %v1342_v14 }
 0x523   : > { %v1601_v18 = vpack.c.bf16 %v1341_v17, %v1341_v17 }
 0x524   : > { %1383 = vst.msk [vmem:[%s2399_s9 + $0x1c] sm:$0xf] %vm1375_vm12, %v1602_v5 }
 0x525   : > { %1382 = vst.msk [vmem:[%s2399_s9 + $0x18] sm:$0xf] %vm1375_vm12, %v1601_v18 }
 0x526 PF: > { %p1832_p5 = scmp.ge.s32.totalorder %s1995_s22, 2  ;;  %s1437_s28 = sand.u32 1, %s1983_s19  }
 0x527   : > { %s1438_s12 = scalar_lea.sflag [#allocation4], %s1437_s28 }
 0x528   : > { %p1829_p1 = pnand %p1832_p5, %p2105_p6 }
 0x52a   : > { %1978 = dma.done.wait (!%p1829_p1), %s1438_s12, 1024  }
 0x52b   : > { %1980 = vsyncadd (!%p1829_p1), %s1438_s12, 4294966272  ;;  %p23_p2 = scmp.ge.s32.totalorder %s2088_s24, 4   ;;  %s2457_s19 = smov %s1987_s20 }
 0x52c   : > { %s2458_s20 = smov %s1991_s21  ;;  %s2459_s21 = smov %s2099_s27 }
 0x52d   : > { %s2460_s22 = smov %s2088_s24  ;;  %25 = sbr.rel (!%p23_p2) target bundleno = 5 (0x5), region = 107 }
 0x534   :  { %1443 = vsyncpa [#allocation4], 1 }
 0x535   :  { %1445 = vsyncpa [#allocation4 + $0x1], 1 }

// kernel: discriminator_forward.7
= control target key start
LH: loop header
LB: loop body
LE: loop exit
PB: predicated region body
PF: predicated region fallthrough
CT: control target
= control target key end

     0   :  { %s2149_s0 = inlined_call_operand.vmem [shape: bf16[2,16,512], index: 0, kind: input, shape index: {}]   ;;  %s2150_s1 = inlined_call_operand.vmem [shape: bf16[512,64], index: 1, kind: input, shape index: {}]   ;;  %s2151_s2 = inlined_call_operand.vmem [shape: f32[1,64], index: 2, kind: input, shape index: {}]   ;;  %s2152_s3 = inlined_call_operand.vmem [shape: bf16[64,8], index: 3, kind: input, shape index: {}]   ;;  %s2153_s4 = inlined_call_operand.vmem [shape: bf16[64,8], index: 4, kind: input, shape index: {}]   ;;  %s2154_s5 = inlined_call_operand.vmem [shape: bf16[64,64], index: 5, kind: input, shape index: {}]   ;;  %s2155_s6 = inlined_call_operand.vmem [shape: f32[1,8], index: 6, kind: input, shape index: {}]   ;;  %s2156_s7 = inlined_call_operand.vmem [shape: f32[1,8], index: 7, kind: input, shape index: {}]   ;;  %s2157_s8 = inlined_call_operand.vmem [shape: f32[1,64], index: 8, kind: input, shape index: {}]   ;;  %s2158_s9 = inlined_call_operand.<no memory space> [shape: f32[1,1], index: 9, kind: input, shape index: {}]   ;;  %s2159_s10 = inlined_call_operand.vmem [shape: f32[16,64], index: 10, kind: input, shape index: {}]   ;;  %s2160_s11 = inlined_call_operand.<no memory space> [shape: f32[1,1], index: 11, kind: input, shape index: {}]   ;;  %s2161_s12 = inlined_call_operand.vmem [shape: f32[2,1,1], index: 12, kind: output, shape index: {0}]   ;;  %s2162_s13 = inlined_call_operand.hbm [shape: f32[2,16,16], index: 13, kind: output, shape index: {1}]  }
   0x1   :  { %19 = sst [smem:[#allocation2]] %s2158_s9  ;;  %v20_v0 = vstv %s2160_s11 }
   0x2   :  { %21 = vst [vmem:[#allocation3] sm:$0x1] %v20_v0 }
   0x3   :  { %22 = vsyncpa [#allocation5], 0 }
   0x4   :  { %24 = vsyncpa [#allocation5 + $0x1], 0  ;;  %s1842_s29 = smov 0   ;;  %s1844_s30 = smov 0  }
   0x5   :  { %s1846_s14 = smov 0   ;;  %s1848_s15 = smov 0  }
   0x6 LB: > { %2166 = sst [smem:[#allocation7_spill]] %s1755_s14  ;;  %s1863_s9 = sadd.s32 4294967295, %s1759_s15   ;;  %s1759_s15 = sphi %s1848_s15, %s2171_s15   ;;  %s1755_s14 = sphi %s1846_s14, %s2173_s14   ;;  %s1751_s30 = sphi %s1844_s30, %s2175_s30   ;;  %s1747_s29 = sphi %s1842_s29, %s2174_s29  }
   0x7   : > { %s1394_s11 = sadd.s32 4294967294, %s1759_s15   ;;  %s1867_s16 = sadd.s32 1, %s1759_s15  }
   0x8   : > { %2167 = sst [smem:[#allocation8_spill]] %s1867_s16  ;;  %s320_s17 = sadd.s32 1, %s1755_s14 }
   0x9   : > { %s317_s18 = ssub.s32 %s1759_s15, %s1867_s16  ;;  %p330_p0 = scmp.ne.s32.totalorder %s1755_s14, %s1751_s30 }
   0xa   : > { %p318_p1 = scmp.eq.s32.totalorder %s317_s18, 0  ;;  %p331_p2 = scmp.eq.s32.totalorder %s1863_s9, 1 }
   0xb   : > { %p336_p3 = scmp.ne.s32.totalorder %s1751_s30, %s1747_s29  ;;  %p337_p4 = scmp.eq.s32.totalorder %s1394_s11, 1 }
   0xc   : > { %s1878_s19 = scalar_select %p318_p1, %s1755_s14, %s320_s17  }
   0xd   : > { %p1880_p5 = por %p331_p2, %p330_p0  ;;  %p1884_p6 = por %p337_p4, %p336_p3 }
   0xe   : > { %2168 = sst [smem:[#allocation9_spill]] %s1878_s19  ;;  %p1397_p7 = scmp.ge.s32.totalorder %s1759_s15, 1 }
   0xf   : > { %p396_p8 = scmp.lt.s32.totalorder %s1759_s15, 3 }
  0x11   : > { %p397_p9 = pnand %p1397_p7, %p396_p8 }
  0x12   : > { %v1639_v1 = vld [vmem:[%s2150_s1 + $0x40] sm:$0xff] (!%p397_p9)   ;;  %v1643_v5 = vld [vmem:[%s2150_s1 + $0x48] sm:$0xff] (!%p397_p9)   ;;  %v1647_v9 = vld [vmem:[%s2150_s1 + $0x50] sm:$0xff] (!%p397_p9)   ;;  %p443_p10 = scmp.lt.s32.totalorder (!%p397_p9), %s1863_s9, 1  ;;  %v1761_v35 = vmov (!%p397_p9), 0.0   ;;  %vm1762_vm0 = vmmov (!%p397_p9), 0  }
  0x13   : > { %400 = sbr.rel (%p397_p9) target bundleno = 1414 (0x586), region = 68  ;;  %v1640_v2 = vld [vmem:[%s2150_s1 + $0xc0] sm:$0xff] (!%p397_p9)   ;;  %1469 = vmatprep.subr.bf16.mxu0 (!%p397_p9), %v1639_v1  ;;  %v1644_v6 = vld [vmem:[%s2150_s1 + $0xc8] sm:$0xff] (!%p397_p9)   ;;  %v1648_v10 = vld [vmem:[%s2150_s1 + $0xd0] sm:$0xff] (!%p397_p9)   ;;  %vm867_vm3 = vcmask (!%p397_p9), 523264   ;;  %vm1072_vm4 = vcmask (!%p397_p9), 64512  }
  0x14   : > { %v1641_v3 = vld [vmem:[%s2150_s1] sm:$0xff] (!%p397_p9)   ;;  %1491 = vmatprep.subr.bf16.mxu1 (!%p397_p9), %v1640_v2  ;;  %v1645_v7 = vld [vmem:[%s2150_s1 + $0x8] sm:$0xff] (!%p397_p9)   ;;  %v1649_v11 = vld [vmem:[%s2150_s1 + $0x10] sm:$0xff] (!%p397_p9)   ;;  %vm1160_vm6 = vcmask (!%p397_p9), 130048   ;;  %s1264_s11 = sld [smem:[#allocation2]] (!%p397_p9)  ;;  %s1468_s18 = sshll.u32 (!%p397_p9), %s1863_s9, 8 }
  0x15   : > { %v1642_v4 = vld [vmem:[%s2150_s1 + $0x80] sm:$0xff] (!%p397_p9)   ;;  %1470 = vmatpush3.bf16.msra.mxu0 (!%p397_p9), %v1641_v3  ;;  %v1646_v8 = vld [vmem:[%s2150_s1 + $0x88] sm:$0xff] (!%p397_p9)   ;;  %v1650_v12 = vld [vmem:[%s2150_s1 + $0x90] sm:$0xff] (!%p397_p9)  }
  0x16   : > { %1492 = vmatpush3.bf16.msra.mxu1 (!%p397_p9), %v1642_v4  ;;  %1471 = vmatprep.subr.bf16.mxu0 (!%p397_p9), %v1643_v5  ;;  %v1651_v13 = vld [vmem:[%s2150_s1 + $0x58] sm:$0xff] (!%p397_p9)   ;;  %v1655_v17 = vld [vmem:[%s2150_s1 + $0x60] sm:$0xff] (!%p397_p9)   ;;  %v1659_v21 = vld [vmem:[%s2150_s1 + $0x68] sm:$0xff] (!%p397_p9)  }
  0x17   : > { %1493 = vmatprep.subr.bf16.mxu1 (!%p397_p9), %v1644_v6  ;;  %v1652_v14 = vld [vmem:[%s2150_s1 + $0xd8] sm:$0xff] (!%p397_p9)   ;;  %v1656_v18 = vld [vmem:[%s2150_s1 + $0xe0] sm:$0xff] (!%p397_p9)   ;;  %v1660_v22 = vld [vmem:[%s2150_s1 + $0xe8] sm:$0xff] (!%p397_p9)  }
  0x18   : > { %v1653_v15 = vld [vmem:[%s2150_s1 + $0x18] sm:$0xff] (!%p397_p9)   ;;  %v1657_v19 = vld [vmem:[%s2150_s1 + $0x20] sm:$0xff] (!%p397_p9)   ;;  %v1661_v23 = vld [vmem:[%s2150_s1 + $0x28] sm:$0xff] (!%p397_p9)  }
  0x19   : > { %1472 = vmatpush3.bf16.msra.mxu0 (!%p397_p9), %v1645_v7  ;;  %v1654_v16 = vld [vmem:[%s2150_s1 + $0x98] sm:$0xff] (!%p397_p9)   ;;  %v1658_v20 = vld [vmem:[%s2150_s1 + $0xa0] sm:$0xff] (!%p397_p9)   ;;  %v1662_v24 = vld [vmem:[%s2150_s1 + $0xa8] sm:$0xff] (!%p397_p9)  }
  0x1a   : > { %1494 = vmatpush3.bf16.msra.mxu1 %v1646_v8  ;;  %1473 = vmatprep.subr.bf16.mxu0 %v1647_v9  ;;  %s1961_s28 = scalar_select %p443_p10, %s1863_s9, 1  ;;  %v1663_v25 = vld [vmem:[%s2150_s1 + $0x70] sm:$0xff]   ;;  %v1667_v29 = vld [vmem:[%s2150_s1 + $0x78] sm:$0xff]   ;;  %v1677_v38 = vld [vmem:[%s2152_s3] sm:$0xff]  }
  0x1b   : > { %1495 = vmatprep.subr.bf16.mxu1 %v1648_v10  ;;  %v1664_v26 = vld [vmem:[%s2150_s1 + $0xf0] sm:$0xff]   ;;  %v1668_v30 = vld [vmem:[%s2150_s1 + $0xf8] sm:$0xff]   ;;  %v1678_v39 = vld [vmem:[%s2153_s4] sm:$0xff]   ;;  %s1763_s9 = smov [#allocation4]  }
  0x1c   : > { %v1665_v27 = vld [vmem:[%s2150_s1 + $0x30] sm:$0xff]   ;;  %s1467_s27 = sshll.u32 %s1961_s28, 5  ;;  %v1669_v31 = vld [vmem:[%s2150_s1 + $0x38] sm:$0xff]   ;;  %v1679_v40 = vld [vmem:[%s2152_s3 + $0x8] sm:$0xff]  }
  0x1d   : > { %1474 = vmatpush3.bf16.msra.mxu0 %v1649_v11  ;;  %v1666_v28 = vld [vmem:[%s2150_s1 + $0xb0] sm:$0xff]   ;;  %s447_s25 = scalar_lea.vmem %s2149_s0, %s1467_s27  ;;  %v1670_v32 = vld [vmem:[%s2150_s1 + $0xb8] sm:$0xff]   ;;  %v1680_v41 = vld [vmem:[%s2153_s4 + $0x8] sm:$0xff]  }
  0x1e   : > { %1496 = vmatpush3.bf16.msra.mxu1 %v1650_v12  ;;  %1475 = vmatprep.subr.bf16.mxu0 %v1651_v13  ;;  %v1671_v33 = vld [vmem:[%s447_s25] ss:$16 sps:$4 sm:$0xff]   ;;  %v1673_v34 = vld [vmem:[%s447_s25 + $0x4] ss:$16 sps:$4 sm:$0xff]   ;;  %v1674_v36 = vld [vmem:[%s447_s25 + $0x8] ss:$16 sps:$4 sm:$0xff]  }
  0x1f   : > { %1497 = vmatprep.subr.bf16.mxu1 %v1652_v14  ;;  %v1676_v37 = vld [vmem:[%s447_s25 + $0xc] ss:$16 sps:$4 sm:$0xff]   ;;  %771 = vmatprep.mubr.bf16.mxu0 %v1673_v34  ;;  %v1681_v42 = vld [vmem:[%s2152_s3 + $0x10] sm:$0xff]   ;;  %v1401_v48 = vld [vmem:[%s2151_s2] ss:$0 sm:$0xff]  ;;  %s440_s25 = sand.u32 1, %s1751_s30  }
  0x20   : > { %812 = vmatprep.mubr.bf16.mxu1 %v1676_v37  ;;  %v1682_v43 = vld [vmem:[%s2153_s4 + $0x10] sm:$0xff]   ;;  %v1683_v44 = vld [vmem:[%s2152_s3 + $0x18] sm:$0xff]   ;;  %v1685_v3 = vld [vmem:[%s2154_s5] sm:$0xff]   ;;  %s1398_s26 = sshll.u32 %s440_s25, 4 }
  0x21   : > { %1476 = vmatpush3.bf16.msra.mxu0 %v1653_v15  ;;  %v1684_v45 = vld [vmem:[%s2153_s4 + $0x18] sm:$0xff]   ;;  %v1686_v5 = vld [vmem:[%s2154_s5 + $0x8] sm:$0xff]   ;;  %v1687_v6 = vld [vmem:[%s2154_s5 + $0x10] sm:$0xff]   ;;  %s442_s19 = scalar_lea.vmem [#allocation4], %s1398_s26  ;;  %s2098_s26 = scalar_lea.hbm %s2162_s13, %s1468_s18 }
  0x22   : > { %1498 = vmatpush3.bf16.msra.mxu1 %v1654_v16  ;;  %1477 = vmatprep.subr.bf16.mxu0 %v1655_v17  ;;  %v1688_v7 = vld [vmem:[%s2154_s5 + $0x18] sm:$0xff]   ;;  %v1438_v8 = vld [vmem:[%s2155_s6] ss:$0 sm:$0xff]  ;;  %vm1587_vm5 = vmpackc.low %vm1072_vm4, %vm1072_vm4  ;;  %s1313_s22 = sshll.u32 %s442_s19, 4  ;;  %s2100_s22 = int_to_ptr.vmem [resolvable:$true] %s1313_s22 }
  0x23   : > { %1499 = vmatprep.subr.bf16.mxu1 %v1656_v18  ;;  %v1444_v10 = vld [vmem:[%s2156_s7] ss:$0 sm:$0xff]  ;;  %s1697_s14 = scalar_lea.vmem %s2100_s22, 256 }
  0x24   : > { %p1698_p11 = scmp.ne.s32.totalorder %s2100_s22, %s1697_s14 }
  0x25   : > { %1478 = vmatpush3.bf16.msra.mxu0 %v1657_v19 }
  0x26   : > { %1500 = vmatpush3.bf16.msra.mxu1 %v1658_v20  ;;  %1479 = vmatprep.subr.bf16.mxu0 %v1659_v21  ;;  %p1699_p12 = pnand %p1698_p11, %p1880_p5 }
  0x27   : > { %1501 = vmatprep.subr.bf16.mxu1 %v1660_v22 }
  0x28   : > { %p1700_p13 = pneg %p1699_p12 }
  0x29   : > { %1480 = vmatpush3.bf16.msra.mxu0 %v1661_v23  ;;  %v1450_v23 = vld [vmem:[%s2157_s8] ss:$0 sm:$0xff] }
  0x2a   : > { %1502 = vmatpush3.bf16.msra.mxu1 %v1662_v24  ;;  %1481 = vmatprep.subr.bf16.mxu0 %v1663_v25 }
  0x2b   : > { %1503 = vmatprep.subr.bf16.mxu1 %v1664_v26 }
  0x2d   : > { %1482 = vmatpush3.bf16.msra.mxu0 %v1665_v27 }
  0x2e   : > { %1504 = vmatpush3.bf16.msra.mxu1 %v1666_v28  ;;  %1483 = vmatprep.subr.bf16.mxu0 %v1667_v29 }
  0x2f   : > { %1505 = vmatprep.subr.bf16.mxu1 %v1668_v30 }
  0x31   : > { %1484 = vmatpush3.bf16.msra.mxu0 %v1669_v31 }
  0x32   : > { %1506 = vmatpush3.bf16.msra.mxu1 %v1670_v32  ;;  %1536 = vmatprep.subr.bf16.mxu0 %v1761_v35 }
  0x33   : > { %1548 = vmatprep.subr.bf16.mxu1 %v1761_v35 }
  0x34   : > { %772 = vmatmul.mubr.bf16.vlgmr.msra.gmra.mrb[0].mxu0 %v1671_v33 }
  0x35   : > { %813 = vmatmul.mubr.bf16.vlgmr.msra.gmra.mrb[0].mxu1 %v1674_v36  ;;  %1537 = vmatpush3.bf16.msra.mxu0 %v1677_v38 }
  0x36   : > { %1538 = vmatprep.subr.bf16.mxu0 %v1761_v35  ;;  %1549 = vmatpush3.bf16.msra.mxu1 %v1678_v39 }
  0x37   : > { %1550 = vmatprep.subr.bf16.mxu1 %v1761_v35  ;;  %1544 = vmatprep.mubr.msk.bf16.mxu0 %vm1762_vm0, %v1761_v35 }
  0x38   : > { %1556 = vmatprep.mubr.msk.bf16.mxu1 %vm1762_vm0, %v1761_v35 }
  0x39   : > { %1539 = vmatpush3.bf16.msra.mxu0 %v1679_v40 }
  0x3a   : > { %1551 = vmatpush3.bf16.msra.mxu1 %v1680_v41  ;;  %1540 = vmatprep.subr.bf16.mxu0 %v1761_v35 }
  0x3b   : > { %1552 = vmatprep.subr.bf16.mxu1 %v1761_v35 }
  0x3d   : > { %1541 = vmatpush3.bf16.msra.mxu0 %v1681_v42 }
  0x3e   : > { %1553 = vmatpush3.bf16.msra.mxu1 %v1682_v43  ;;  %1542 = vmatprep.subr.bf16.mxu0 %v1761_v35 }
  0x3f   : > { %1554 = vmatprep.subr.bf16.mxu1 %v1761_v35 }
  0x41   : > { %1543 = vmatpush3.bf16.msra.mxu0 %v1683_v44 }
  0x42   : > { %1555 = vmatpush3.bf16.msra.mxu1 %v1684_v45  ;;  %1560 = vmatprep.subr.bf16.mxu0 %v1761_v35 }
 0x107   : > { %v1485_v46 = vpop.f32.mrb[0].mxu0 }
 0x108   : > { %v1507_v47 = vpop.f32.mrb[0].mxu1  ;;  %v1486_v49 = vpop.f32.mrb[1].mxu0 }
 0x109   : > { %v1487_v50 = vadd.f32 %v1486_v49, %v1485_v46  ;;  %v1508_v51 = vpop.f32.mrb[1].mxu1  ;;  %v1488_v52 = vpop.f32.mrb[2].mxu0 }
 0x10a   : > { %v1509_v53 = vadd.f32 %v1508_v51, %v1507_v47  ;;  %v1510_v54 = vpop.f32.mrb[2].mxu1  ;;  %v1489_v55 = vpop.f32.mrb[3].mxu0  ;;  %v1265_v51 = vstv %s1264_s11  ;;  %s2104_s11 = scalar_lea.sflag [#allocation5], %s440_s25 }
 0x10b   : > { %v774_v56 = vadd.f32 %v1487_v50, %v1401_v48  ;;  %v1490_v57 = vadd.f32 %v1489_v55, %v1488_v52  ;;  %v1511_v58 = vpop.f32.mrb[3].mxu1 }
 0x10c   : > { %v1512_v59 = vadd.f32 %v1511_v58, %v1510_v54  ;;  %v1270_v58 = vld [vmem:[%s2159_s10] sm:$0xff] }
 0x10d   : > { %v815_v60 = vadd.f32 %v1509_v53, %v774_v56  ;;  %v777_v61 = vadd.f32 %v1490_v57, %v1401_v48  ;;  %v1271_v56 = vld [vmem:[%s2159_s10 + $0x8] sm:$0xff] }
 0x10f   : > { %v823_v62 = vmul.f32 0.1, %v815_v60  ;;  %v818_v63 = vadd.f32 %v1512_v59, %v777_v61  ;;  %vm821_vm1 = vcmp.ge.f32.partialorder %v815_v60, 0.0 }
 0x111   : > { %vm822_vm2 = vcmp.ge.f32.partialorder %v818_v63, 0.0  ;;  %v824_v0 = vmul.f32 0.1, %v818_v63  ;;  %v2034_v1 = vsel %vm821_vm1, %v815_v60, %v823_v62 }
 0x113   : > { %v2036_v2 = vsel %vm822_vm2, %v818_v63, %v824_v0 }
 0x114   : > { %v827_v4 = vpack.c.bf16 %v2036_v2, %v2034_v1 }
 0x116   : > { %1545 = vmatmul.mubr.msk.bf16.vlgmr.msra.gmra.mrb[4].mxu0 %vm867_vm3, %v827_v4  ;;  %1557 = vmatmul.mubr.msk.bf16.vlgmr.msra.gmra.mrb[4].mxu1 %vm867_vm3, %v827_v4 }
 0x117   : > { %1561 = vmatpush3.bf16.msra.mxu0 %v1685_v3  ;;  %1568 = vmatprep.mubr.msk.bf16.mxu0 %vm1762_vm0, %v1761_v35 }
 0x118   : > { %1562 = vmatprep.subr.bf16.mxu0 %v1761_v35 }
 0x11b   : > { %1563 = vmatpush3.bf16.msra.mxu0 %v1686_v5 }
 0x11c   : > { %1564 = vmatprep.subr.bf16.mxu0 %v1761_v35 }
 0x11f   : > { %1565 = vmatpush3.bf16.msra.mxu0 %v1687_v6 }
 0x120   : > { %1566 = vmatprep.subr.bf16.mxu0 %v1761_v35 }
 0x123   : > { %1567 = vmatpush3.bf16.msra.mxu0 %v1688_v7 }
 0x126   : > { %1569 = vmatmul.mubr.msk.bf16.vlgmr.msra.gmra.mrb[8].mxu0 %vm867_vm3, %v827_v4 }
 0x1e9   : > { %v905_v9 = vpop.f32.mrb[4].mxu0  ;;  %v985_v11 = vpop.f32.mrb[4].mxu1 }
 0x1ea   : > { %v906_v12 = vadd.f32 %v1438_v8, %v905_v9  ;;  %v1546_v13 = vpop.f32.mrb[5].mxu0  ;;  %v1558_v14 = vpop.f32.mrb[5].mxu1  ;;  %v986_v17 = vadd.f32 %v1444_v10, %v985_v11 }
 0x1eb   : > { %v908_v15 = vpop.f32.mrb[6].mxu0  ;;  %v988_v16 = vpop.f32.mrb[6].mxu1 }
 0x1ec   : > { %v989_v18 = vadd.f32 %v1444_v10, %v988_v16  ;;  %v1547_v19 = vpop.f32.mrb[7].mxu0  ;;  %v1559_v20 = vpop.f32.mrb[7].mxu1  ;;  %1576 = vmatprep.mubr.msk.f32.mxu1 %vm1072_vm4, %v906_v12  ;;  %v909_v22 = vadd.f32 %v1438_v8, %v908_v15 }
 0x1ee   : > { %v1586_v21 = vpack.c.bf16 %v989_v18, %v986_v17 }
 0x1f0   : > { %1588 = vmatprep.subr.msk.bf16.mxu1 %vm1587_vm5, %v1586_v21 }
 0x1f1   : > { %1591 = vmatpush3.bf16.xpose.msk.msra.mxu1 %vm1587_vm5, %v1586_v21 }
 0x1f8   : > { %1577 = vmatmul.mubr.msk.f32.vlgmr.msra.gmra.mrb[8].mxu1 %vm1072_vm4, %v909_v22 }
 0x1f9   : > { %v1065_v24 = vpop.f32.mrb[8].mxu0 }
 0x1fa   : > { %v1570_v25 = vpop.f32.mrb[9].mxu0  ;;  %v1066_v27 = vadd.f32 %v1450_v23, %v1065_v24 }
 0x1fb   : > { %v1068_v26 = vpop.f32.mrb[10].mxu0 }
 0x1fc   : > { %v1069_v28 = vadd.f32 %v1450_v23, %v1068_v26  ;;  %v1571_v29 = vpop.f32.mrb[11].mxu0 }
 0x1fe   : > { %v1592_v30 = vpack.c.bf16 %v1069_v28, %v1066_v27 }
 0x200   : > { %1593 = vmatprep.subr.bf16.mxu1 %v1592_v30 }
 0x201   : > { %1595 = vmatpush3.bf16.msra.mxu1 %v1592_v30 }
 0x2cb   : > { %v1578_v31 = vpop.f32.mrb[8].mxu1 }
 0x2cc   : > { %v1151_v32 = vpop.f32.mrb[9].mxu1  ;;  %v1164_v34 = vsel %vm1160_vm6, %v1578_v31, -inf }
 0x2cd   : > { %v1161_v33 = vsel %vm1160_vm6, %v1151_v32, -inf }
 0x2ce   : > { %1162 = vmax.xlane.f32.xlu0 %v1161_v33 }
 0x2d2   : > { %1165 = vmax.xlane.f32.xlu0 %v1164_v34 }
 0x35b   : > { %v1163_v35 = vpop.xlane.xlu0 %1162 }
 0x35c   : > { %v1167_v36 = vsub.f32 %v1151_v32, %v1163_v35 }
 0x35e   : > { %v1169_v37 = vmul.f32 1.442695, %v1167_v36 }
 0x35f   : > { %v1166_v38 = vpop.xlane.xlu0 %1165 }
 0x360   : > { %1689 = vpow2.f32 %v1169_v37  ;;  %v1168_v39 = vsub.f32 %v1578_v31, %v1166_v38 }
 0x362   : > { %v1171_v40 = vmul.f32 1.442695, %v1168_v39 }
 0x364   : > { %1691 = vpow2.f32 %v1171_v40 }
 0x36a   : > { %v1690_v41 = vpop.eup %1689 }
 0x36b   : > { %v1173_v42 = vsel %vm1160_vm6, %v1690_v41, 0.0 }
 0x36c   : > { %1174 = vadd.xlane.f32.xlu1 %v1173_v42 }
 0x36e   : > { %v1692_v43 = vpop.eup %1691 }
 0x36f   : > { %v1176_v44 = vsel %vm1160_vm6, %v1692_v43, 0.0 }
 0x370   : > { %1177 = vadd.xlane.f32.xlu1 %v1176_v44 }
 0x3f9   : > { %v1175_v45 = vpop.xlane.xlu1 %1174 }
 0x3fa   : > { %1693 = vrcp.f32 %v1175_v45 }
 0x3fd   : > { %v1178_v46 = vpop.xlane.xlu1 %1177 }
 0x3fe   : > { %1695 = vrcp.f32 %v1178_v46 }
 0x404   : > { %v1694_v47 = vpop.eup %1693 }
 0x405   : > { %v1181_v48 = vmul.f32 %v1694_v47, %v1690_v41 }
 0x407   : > { %1583 = vmatprep.mubr.msk.f32.mxu1 %vm1160_vm6, %v1181_v48  ;;  %1291 = vst.msk [vmem:[%s442_s19] sm:$0xff] %vm1160_vm6, %v1181_v48 }
 0x408   : > { %v1696_v49 = vpop.eup %1695 }
 0x409   : > { %v1182_v50 = vmul.f32 %v1696_v49, %v1692_v43 }
 0x40b   : > { %1584 = vmatmul.mubr.msk.f32.vlgmr.msra.gmra.mrb[10].mxu1 %vm1160_vm6, %v1182_v50  ;;  %1292 = vst.msk [vmem:[%s442_s19 + $0x8] sm:$0xff] %vm1160_vm6, %v1182_v50  ;;  %s1701_s19 = sshll.u32 %s1763_s9, 4  ;;  %s1702_s19 = int_to_ptr.vmem [resolvable:$false] %s1701_s19 }
 0x40c   : > { %s1703_s16 = scalar_lea.vmem %s1702_s19, 512  ;;  %p1704_p0 = scmp.lt.s32.totalorder %s2100_s22, %s1702_s19 }
 0x40d   : > { %p1705_p1 = scmp.lt.s32.totalorder %s1703_s16, %s1697_s14 }
 0x40f   : > { %p1706_p2 = por %p1705_p1, %p1704_p0 }
 0x411   : > { %p1707_p3 = pnand %p1706_p2, %p1700_p13 }
 0x4de   : > { %v1585_v52 = vpop.f32.mrb[10].mxu1 }
 0x4df   : > { %v1267_v53 = vmul.f32 %v1585_v52, %v1265_v51  ;;  %v1255_v54 = vpop.f32.mrb[11].mxu1 }
 0x4e0   : > { %v1266_v55 = vmul.f32 %v1265_v51, %v1255_v54 }
 0x4e1   : > { %v1269_v57 = vadd.f32 %v1267_v53, %v2036_v2 }
 0x4e2   : > { %v1268_v59 = vadd.f32 %v1266_v55, %v2034_v1 }
 0x4e3   : > { %v1273_v60 = vmul.f32 %v1271_v56, %v1269_v57 }
 0x4e4   : > { %v1272_v61 = vmul.f32 %v1270_v58, %v1268_v59 }
 0x4e5   : > { %v1277_v62 = vsel %vm867_vm3, %v1273_v60, 0.0 }
 0x4e6   : > { %1278 = vadd.xlane.f32.xlu1 %v1277_v62  ;;  %v1274_v63 = vsel %vm867_vm3, %v1272_v61, 0.0 }
 0x4e7   : > { %1275 = vadd.xlane.f32.xlu0 %v1274_v63 }
 0x4e8   : > { %1710 = shalt.err (!%p1707_p3)
}
 0x4e9   : > { %s1711_s25 = scalar_lea.hbm %s2098_s26, 256  ;;  %s1715_s18 = scalar_lea.hbm %s2162_s13, 512 }
 0x4ea   : > { %p1712_p4 = scmp.ne.s32.totalorder %s2098_s26, %s1711_s25  ;;  %p1716_p9 = scmp.lt.u32.totalorder %s2098_s26, %s2162_s13 }
 0x4eb   : > { %p1717_p10 = scmp.lt.u32.totalorder %s1715_s18, %s1711_s25  ;;  %p1719_p12 = scmp.lt.u32.totalorder %s1711_s25, %s2098_s26 }
 0x4ec   : > { %p1713_p7 = pnand %p1712_p4, %p1880_p5 }
 0x4ed   : > { %p1718_p11 = por %p1717_p10, %p1716_p9 }
 0x4ee   : > { %p1714_p8 = pneg %p1713_p7 }
 0x4ef   : > { %p1720_p13 = por %p1719_p12, %p1718_p11 }
 0x4f1   : > { %p1721_p0 = pnand %p1720_p13, %p1714_p8 }
 0x4f3   : > { %1724 = shalt.err (!%p1721_p0)
}
 0x4f4   : > { %s1764_s14 = smov 128   ;;  %s1765_s9 = smov 8   ;;  %v1287_v8 = vld [vmem:[#allocation3] sm:$0x1]  ;;  %vm1289_vm7 = vcmask 0  }
 0x4f5   : > { %1596 = dma.vmem_to_hbm [thread:$0]  (%p1880_p5), %s2100_s22, 256, %s2098_s26, %s2104_s11, %s1764_s14, %s1764_s14, %s1765_s9  }
 0x4f6   : > { %s450_s25 = scalar_lea.vmem %s2161_s12, %s1961_s28 }
 0x573   : > { %v1279_v0 = vpop.xlane.xlu1 %1278 }
 0x574   : > { %v1276_v1 = vpop.xlane.xlu0 %1275 }
 0x575   : > { %v1280_v2 = vadd.f32 %v1279_v0, %v1276_v1 }
 0x577   : > { %v1281_v3 = vrot.slane %v1280_v2, 4 }
 0x579   : > { %v1282_v4 = vadd.f32 %v1281_v3, %v1280_v2 }
 0x57b   : > { %v1283_v5 = vrot.slane %v1282_v4, 2 }
 0x57d   : > { %v1284_v6 = vadd.f32 %v1283_v5, %v1282_v4 }
 0x57f   : > { %v1285_v7 = vrot.slane %v1284_v6, 1 }
 0x581   : > { %v1286_v9 = vadd.f32 %v1285_v7, %v1284_v6 }
 0x583   : > { %v1288_v10 = vadd.f32 %v1287_v8, %v1286_v9 }
 0x585   : > { %1290 = vst.msk [vmem:[%s450_s25] sm:$0x1] %vm1289_vm7, %v1288_v10 }
 0x586 PF: > { %p1602_p5 = scmp.ge.s32.totalorder %s1759_s15, 2  ;;  %s1334_s20 = sand.u32 1, %s1747_s29  }
 0x587   : > { %s1335_s22 = scalar_lea.sflag [#allocation5], %s1334_s20 }
 0x588   : > { %p1599_p1 = pnand %p1602_p5, %p1884_p6 }
 0x58a   : > { %1742 = dma.done.wait (!%p1599_p1), %s1335_s22, 256  }
 0x58b   : > { %1744 = vsyncadd (!%p1599_p1), %s1335_s22, 4294967040  ;;  %s2171_s15 = sld [smem:[#allocation8_spill]]  ;;  %s2172_s26 = sld [smem:[#allocation7_spill]] }
 0x58c   : > { %s2173_s14 = sld [smem:[#allocation9_spill]]  ;;  %s2174_s29 = smov %s1751_s30 }
 0x591   : > { %p27_p2 = scmp.ge.s32.totalorder %s2171_s15, 4   ;;  %s2175_s30 = smov %s2172_s26 }
 0x593   :  { %29 = sbr.rel (!%p27_p2) target bundleno = 6 (0x6), region = 115 }
 0x59a   :  { %1340 = vsyncpa [#allocation5], 1 }
 0x59b   :  { %1342 = vsyncpa [#allocation5 + $0x1], 1 }

</bundles_post_ra>
